<compile_context>
chip_gen: v5e
topology: v5e:2x2
jax: 0.10.0
libtpu: 0.0.40
codegen_flags: <defaults>
</compile_context>

<pallas_src>
import numpy as np
import jax
import jax.numpy as jnp
from jax.experimental import pallas as pl
from jax.experimental.pallas import tpu as pltpu


def softplus_beta100(x):
    # torch.nn.Softplus(beta=100, threshold=20): linear when beta*x > 20
    bx = 100.0 * x
    return jnp.where(bx > 20.0, x, jnp.log1p(jnp.exp(jnp.minimum(bx, 20.0))) / 100.0)


# ----------------------------------------------------------------------------
# Pallas kernel (transposed, batch-on-lanes layout)
# ----------------------------------------------------------------------------
def make_sdf_kernel(plan, out_rows, use_bf16_matmul):
    """plan: per-layer dicts {"skip","act","inp",("prev","d0")}.
    Kernel args: x (d_in,T), w_slab (L,P,Kmax), b_slab (L,P,1) -> out (out_rows,T),
    scratch: cat_ref (P,T) f32."""
    cdt = jnp.bfloat16 if use_bf16_matmul else jnp.float32

    def mm(w, act):
        # Weight slab is already pre-cast (bf16 or f32) in the wrapper; only the
        # activation needs a cast here.  Accumulate in f32 on the MXU.
        return jnp.dot(w, act.astype(cdt), preferred_element_type=jnp.float32)

    def kernel(x_ref, w_ref, b_ref, out_ref, cat_ref):
        inputs = x_ref[...]                                   # (d_in, T) f32; `* scale` folded into W
        h = inputs
        for l, lp in enumerate(plan):
            i = lp["inp"]
            if lp["skip"]:
                prev, d0 = lp["prev"], lp["d0"]
                # Single fused dot for torch's cat([x, inputs], 1)/sqrt(2) @ W^T:
                # full aligned (P,T) store of h, then overwrite the raw-x rows.
                # (1/sqrt(2) and scale are folded into the weight columns.)
                cat_ref[...] = h
                cat_ref[prev:prev + d0, :] = inputs
                opnd = cat_ref[...]
            else:
                opnd = h
            y = mm(w_ref[l, :, :i], opnd) + b_ref[l, :, :]    # (P, T) f32
            h = softplus_beta100(y) if lp["act"] else y
        out_ref[...] = h[:out_rows, :]                        # (d_sdf + d_out, T), lane-dense

    return kernel


# ----------------------------------------------------------------------------
# Parameter construction (mirrors SDFNetwork.__init__ geometric init)
# ----------------------------------------------------------------------------
def build_raw_params(key, d_in, d_out, d_sdf, d_hidden, n_layers, skip_in, bias_init):
    dims = [d_in] + [d_hidden for _ in range(n_layers)] + [d_out]
    num_layers = len(dims)
    lin_w, lin_b = [], []
    for l in range(num_layers - 1):
        out_dim = dims[l + 1] - dims[0] if (l + 1) in skip_in else dims[l + 1]
        key, k = jax.random.split(key)
        if l == num_layers - 2:
            # DTU-style geometric init for the last lin layer
            w = (np.sqrt(np.pi) / np.sqrt(dims[l])
                 + 1e-4 * jax.random.normal(k, (out_dim, dims[l]), jnp.float32))
            b = jnp.full((out_dim,), -bias_init, jnp.float32)
        else:
            w = jax.random.normal(k, (out_dim, dims[l]), jnp.float32) * (
                np.sqrt(2.0) / np.sqrt(out_dim))
            b = jnp.zeros((out_dim,), jnp.float32)
        lin_w.append(jnp.asarray(w, jnp.float32))
        lin_b.append(b)
    # sdf_linear (MyLinear): dims[-2] -> d_sdf, DTU geometric init
    key, k = jax.random.split(key)
    wsdf = (np.sqrt(np.pi) / np.sqrt(dims[-2])
            + 1e-4 * jax.random.normal(k, (d_sdf, dims[-2]), jnp.float32))
    bsdf = jnp.full((d_sdf,), -bias_init, jnp.float32)
    return dims, lin_w, lin_b, jnp.asarray(wsdf, jnp.float32), bsdf


def build_kernel_params(dims, lin_w, lin_b, wsdf, bsdf, skip_in, scale,
                        weights_dtype=jnp.bfloat16):
    """Build the layer plan, fold scale / 1/sqrt(2) / sdf fusion into the
    parameters, and pack all weights + biases into resident slabs:
      w_slab (L, P, Kmax) in `weights_dtype`, b_slab (L, P, 1) f32.
    Every layer is zero-padded to P output rows so all activations are
    P(=d_hidden)-row, 8-sublane-aligned tensors."""
    num_layers = len(dims)
    d0 = dims[0]
    assert 0 not in skip_in, "skip at layer 0 unsupported"
    assert (num_layers - 2) not in skip_in, "skip at the final lin layer unsupported"

    blocks, meta = [], []
    for l in range(num_layers - 2):                      # hidden layers (softplus)
        w = np.array(lin_w[l], np.float32)               # torch-native (out, in)
        b = np.array(lin_b[l], np.float32)
        m = {"skip": l in skip_in, "act": True}
        if l == 0:
            w = w * scale                                # fold `inputs = x * self.scale`
        if m["skip"]:
            prev = w.shape[1] - d0                       # width of the running activation
            m["prev"], m["d0"] = prev, d0
            w = w / np.sqrt(2.0)                         # fold cat([x, inputs])/sqrt(2)
            w[:, prev:prev + d0] *= scale                # raw-x columns absorb scale too
        blocks.append((w, b))
        meta.append(m)

    # fused final layer: rows = [W_sdf/scale ; W_last], bias = [b_sdf/scale ; b_last]
    w_last = np.array(lin_w[num_layers - 2], np.float32)
    b_last = np.array(lin_b[num_layers - 2], np.float32)
    w_f = np.concatenate([np.array(wsdf, np.float32) / scale, w_last], axis=0)
    b_f = np.concatenate([np.array(bsdf, np.float32) / scale, b_last], axis=0)
    blocks.append((w_f, b_f))
    meta.append({"skip": False, "act": False})

    # Pad every layer to P rows / Kmax cols with zeros.  Padded-row garbage is
    # killed by the next layer's zero columns (or overwritten at the skip).
    P = max(w.shape[0] for w, _ in blocks)
    Kmax = max(max(w.shape[1] for w, _ in blocks), P)
    L = len(blocks)
    w_slab = np.zeros((L, P, Kmax), np.float32)
    b_slab = np.zeros((L, P, 1), np.float32)
    plan = []
    for l, ((w, b), m) in enumerate(zip(blocks, meta)):
        o, i = w.shape
        w_slab[l, :o, :i] = w
        b_slab[l, :o, 0] = b
        entry = dict(m)
        entry["inp"] = i if l == 0 else P                # layers > 0 consume the padded P rows
        plan.append(entry)
    out_rows = blocks[-1][0].shape[0]                    # d_sdf + d_out
    return plan, jnp.asarray(w_slab, weights_dtype), jnp.asarray(b_slab, jnp.float32), P, out_rows


# ----------------------------------------------------------------------------
# Tile selection + wrapper around pallas_call
# ----------------------------------------------------------------------------
def pick_tile_n(N, min_blocks=4, max_tile=4096):
    """Largest multiple of 128 (capped at max_tile) that still gives >= min_blocks
    grid steps, so the parallel grid axis keeps both v7x TensorCores busy and
    input/output DMAs overlap compute."""
    t = (N // (min_blocks * 128)) * 128
    t = max(128, min(t, max_tile))
    return min(t, pl.cdiv(N, 128) * 128)


def sdf_forward_pallas(x, plan, w_slab, b_slab, cat_rows, out_rows,
                       tile_n=None, transpose_output=True):
    N, d_in = x.shape
    use_bf16 = (w_slab.dtype == jnp.bfloat16)
    if tile_n is None:
        tile_n = pick_tile_n(N)
    n_blocks = pl.cdiv(N, tile_n)
    Np = n_blocks * tile_n

    xt = x.T                                             # (d_in, N): batch on lanes
    if Np != N:
        # TODO(synk): guard the ragged last block in-kernel (masked store) to
        # avoid this pad copy and the wasted tail compute.
        xt = jnp.pad(xt, ((0, 0), (0, Np - N)))

    kernel = make_sdf_kernel(plan, out_rows, use_bf16)
    out_t = pl.pallas_call(
        kernel,
        out_shape=jax.ShapeDtypeStruct((out_rows, Np), jnp.float32),
        grid=(n_blocks,),
        in_specs=[
            pl.BlockSpec((d_in, tile_n), lambda i: (0, i)),      # points tile
            pl.BlockSpec(w_slab.shape, lambda i: (0, 0, 0)),     # weights: resident
            pl.BlockSpec(b_slab.shape, lambda i: (0, 0, 0)),     # biases (f32): resident
        ],
        out_specs=pl.BlockSpec((out_rows, tile_n), lambda i: (0, i)),
        scratch_shapes=[pltpu.VMEM((cat_rows, tile_n), jnp.float32)],   # skip cat buffer
        compiler_params=pltpu.CompilerParams(
            dimension_semantics=("parallel",),      # shards grid across v7x's 2 TCs
            vmem_limit_bytes=32 * 1024 * 1024,      # guard rail; usage is ~3 MiB
        ),
    )(xt, w_slab, b_slab)

    out_t = out_t[:, :N]
    # Downstream consumers that accept the lane-dense (features, N) layout can
    # pass transpose_output=False to skip this HBM transpose.
    return out_t.T if transpose_output else out_t


# ----------------------------------------------------------------------------
# Pure-JAX reference following the torch forward literally (for validation)
# ----------------------------------------------------------------------------
def sdf_forward_ref(x, dims, lin_w, lin_b, wsdf, bsdf, skip_in, scale):
    num_layers = len(dims)
    inputs = x * scale
    h = inputs
    sdf_output = None
    for l in range(num_layers - 1):
        if l in skip_in:
            h = jnp.concatenate([h, inputs], axis=1) / np.sqrt(2.0)
        if l == num_layers - 2:
            sdf_output = h @ wsdf.T + bsdf
        h = h @ lin_w[l].T + lin_b[l]
        if l < num_layers - 2:
            h = softplus_beta100(h)
    return jnp.concatenate([sdf_output / scale, h], axis=-1)


if __name__ == "__main__":
    # Small config: d_in=3, d_hidden=32, n_layers=6 -> num_layers=8, skip at layer 4.
    d_in, d_out, d_sdf, d_hidden, n_layers = 3, 9, 1, 32, 6
    skip_in = (4,)
    bias_init = 0.5
    scale = 2.0
    N = 2048          # points; pick_tile_n -> tile_n=512, 4 grid blocks

    key = jax.random.PRNGKey(0)
    kp, kx = jax.random.split(key)

    dims, lin_w, lin_b, wsdf, bsdf = build_raw_params(
        kp, d_in, d_out, d_sdf, d_hidden, n_layers, skip_in, bias_init)
    x = jax.random.normal(kx, (N, d_in), jnp.float32)
    ref = sdf_forward_ref(x, dims, lin_w, lin_b, wsdf, bsdf, skip_in, scale)

    # 1) f32 weight-slab path: exact-semantics check (tight tolerance).
    plan32, w32, b32, P, out_rows = build_kernel_params(
        dims, lin_w, lin_b, wsdf, bsdf, skip_in, scale, weights_dtype=jnp.float32)
    out32 = sdf_forward_pallas(x, plan32, w32, b32, P, out_rows)
    out32 = jax.block_until_ready(out32)
    np.testing.assert_allclose(np.asarray(out32), np.asarray(ref), rtol=1e-4, atol=1e-4)

    # 2) bf16 weight-slab path (default / fast on v6e & v7x): quantization-level tolerance.
    plan16, w16, b16, P16, out_rows16 = build_kernel_params(
        dims, lin_w, lin_b, wsdf, bsdf, skip_in, scale, weights_dtype=jnp.bfloat16)
    out16 = sdf_forward_pallas(x, plan16, w16, b16, P16, out_rows16)
    out16 = jax.block_until_ready(out16)
    np.testing.assert_allclose(np.asarray(out16), np.asarray(ref), rtol=5e-2, atol=1e-1)

    assert out32.shape == (N, d_sdf + d_out)
    assert out16.shape == (N, d_sdf + d_out)
    print("KERNEL_OK")
</pallas_src>

<mosaic_0001>
module attributes {stable_mosaic.version = 11 : i64} {
  func.func @kernel(%arg0: i32, %arg1: memref<3x512xf32, #tpu.memory_space<vmem>>, %arg2: memref<7x32x32xf32, #tpu.memory_space<vmem>>, %arg3: memref<7x32x1xf32, #tpu.memory_space<vmem>>, %arg4: memref<10x512xf32, #tpu.memory_space<vmem>>, %arg5: memref<32x512xf32, #tpu.memory_space<vmem>>) attributes {dimension_semantics = [#tpu.dimension_semantics<parallel>], iteration_bounds = array<i64: 4>, scalar_prefetch = 0 : i64, scratch_operands = 1 : i64, tpu.core_type = #tpu.core_type<tc>, window_params = [{transform_indices = @transform_0, window_bounds = array<i64: 3, 512>}, {pipeline_mode = #tpu.pipeline_mode<synchronous>, transform_indices = @transform_1, window_bounds = array<i64: 7, 32, 32>}, {pipeline_mode = #tpu.pipeline_mode<synchronous>, transform_indices = @transform_2, window_bounds = array<i64: 7, 32, 1>}, {transform_indices = @transform_3, window_bounds = array<i64: 10, 512>}]} {
    %c0 = arith.constant 0 : index
    %c0_0 = arith.constant 0 : index
    %0 = vector.load %arg1[%c0, %c0_0] : memref<3x512xf32, #tpu.memory_space<vmem>>, vector<3x512xf32>
    %c0_1 = arith.constant 0 : index
    %c0_2 = arith.constant 0 : index
    %c0_3 = arith.constant 0 : index
    %1 = vector.load %arg2[%c0_1, %c0_2, %c0_3] : memref<7x32x32xf32, #tpu.memory_space<vmem>>, vector<1x32x3xf32>
    %2 = vector.shape_cast %1 : vector<1x32x3xf32> to vector<32x3xf32>
    %cst = arith.constant dense<0.000000e+00> : vector<32x512xf32>
    %3 = tpu.matmul %2, %0, %cst {dimension_numbers = #tpu.dot_dimension_numbers<[1], [0], [0], [1], [0, 0, 1, 1], [], []>} : vector<32x3xf32>, vector<3x512xf32>, vector<32x512xf32> -> vector<32x512xf32>
    %c0_4 = arith.constant 0 : index
    %c0_5 = arith.constant 0 : index
    %c0_6 = arith.constant 0 : index
    %4 = vector.load %arg3[%c0_4, %c0_5, %c0_6] : memref<7x32x1xf32, #tpu.memory_space<vmem>>, vector<1x32x1xf32>
    %5 = vector.shape_cast %4 : vector<1x32x1xf32> to vector<32x1xf32>
    %6 = vector.broadcast %5 : vector<32x1xf32> to vector<32x512xf32>
    %7 = arith.addf %3, %6 : vector<32x512xf32>
    %cst_7 = arith.constant 1.000000e+02 : f32
    %8 = vector.broadcast %cst_7 : f32 to vector<32x512xf32>
    %9 = arith.mulf %8, %7 : vector<32x512xf32>
    %cst_8 = arith.constant 2.000000e+01 : f32
    %10 = vector.broadcast %cst_8 : f32 to vector<32x512xf32>
    %11 = arith.cmpf ogt, %9, %10 : vector<32x512xf32>
    %cst_9 = arith.constant 2.000000e+01 : f32
    %12 = vector.broadcast %cst_9 : f32 to vector<32x512xf32>
    %13 = arith.minimumf %9, %12 : vector<32x512xf32>
    %14 = math.exp %13 : vector<32x512xf32>
    %15 = math.log1p %14 : vector<32x512xf32>
    %cst_10 = arith.constant 1.000000e+02 : f32
    %16 = vector.broadcast %cst_10 : f32 to vector<32x512xf32>
    %17 = arith.divf %15, %16 : vector<32x512xf32>
    %18 = arith.select %11, %7, %17 : vector<32x512xi1>, vector<32x512xf32>
    %c1 = arith.constant 1 : index
    %c0_11 = arith.constant 0 : index
    %c0_12 = arith.constant 0 : index
    %19 = vector.load %arg2[%c1, %c0_11, %c0_12] : memref<7x32x32xf32, #tpu.memory_space<vmem>>, vector<1x32x32xf32>
    %20 = vector.shape_cast %19 : vector<1x32x32xf32> to vector<32x32xf32>
    %cst_13 = arith.constant dense<0.000000e+00> : vector<32x512xf32>
    %21 = tpu.matmul %20, %18, %cst_13 {dimension_numbers = #tpu.dot_dimension_numbers<[1], [0], [0], [1], [0, 0, 1, 1], [], []>} : vector<32x32xf32>, vector<32x512xf32>, vector<32x512xf32> -> vector<32x512xf32>
    %c1_14 = arith.constant 1 : index
    %c0_15 = arith.constant 0 : index
    %c0_16 = arith.constant 0 : index
    %22 = vector.load %arg3[%c1_14, %c0_15, %c0_16] : memref<7x32x1xf32, #tpu.memory_space<vmem>>, vector<1x32x1xf32>
    %23 = vector.shape_cast %22 : vector<1x32x1xf32> to vector<32x1xf32>
    %24 = vector.broadcast %23 : vector<32x1xf32> to vector<32x512xf32>
    %25 = arith.addf %21, %24 : vector<32x512xf32>
    %cst_17 = arith.constant 1.000000e+02 : f32
    %26 = vector.broadcast %cst_17 : f32 to vector<32x512xf32>
    %27 = arith.mulf %26, %25 : vector<32x512xf32>
    %cst_18 = arith.constant 2.000000e+01 : f32
    %28 = vector.broadcast %cst_18 : f32 to vector<32x512xf32>
    %29 = arith.cmpf ogt, %27, %28 : vector<32x512xf32>
    %cst_19 = arith.constant 2.000000e+01 : f32
    %30 = vector.broadcast %cst_19 : f32 to vector<32x512xf32>
    %31 = arith.minimumf %27, %30 : vector<32x512xf32>
    %32 = math.exp %31 : vector<32x512xf32>
    %33 = math.log1p %32 : vector<32x512xf32>
    %cst_20 = arith.constant 1.000000e+02 : f32
    %34 = vector.broadcast %cst_20 : f32 to vector<32x512xf32>
    %35 = arith.divf %33, %34 : vector<32x512xf32>
    %36 = arith.select %29, %25, %35 : vector<32x512xi1>, vector<32x512xf32>
    %c2 = arith.constant 2 : index
    %c0_21 = arith.constant 0 : index
    %c0_22 = arith.constant 0 : index
    %37 = vector.load %arg2[%c2, %c0_21, %c0_22] : memref<7x32x32xf32, #tpu.memory_space<vmem>>, vector<1x32x32xf32>
    %38 = vector.shape_cast %37 : vector<1x32x32xf32> to vector<32x32xf32>
    %cst_23 = arith.constant dense<0.000000e+00> : vector<32x512xf32>
    %39 = tpu.matmul %38, %36, %cst_23 {dimension_numbers = #tpu.dot_dimension_numbers<[1], [0], [0], [1], [0, 0, 1, 1], [], []>} : vector<32x32xf32>, vector<32x512xf32>, vector<32x512xf32> -> vector<32x512xf32>
    %c2_24 = arith.constant 2 : index
    %c0_25 = arith.constant 0 : index
    %c0_26 = arith.constant 0 : index
    %40 = vector.load %arg3[%c2_24, %c0_25, %c0_26] : memref<7x32x1xf32, #tpu.memory_space<vmem>>, vector<1x32x1xf32>
    %41 = vector.shape_cast %40 : vector<1x32x1xf32> to vector<32x1xf32>
    %42 = vector.broadcast %41 : vector<32x1xf32> to vector<32x512xf32>
    %43 = arith.addf %39, %42 : vector<32x512xf32>
    %cst_27 = arith.constant 1.000000e+02 : f32
    %44 = vector.broadcast %cst_27 : f32 to vector<32x512xf32>
    %45 = arith.mulf %44, %43 : vector<32x512xf32>
    %cst_28 = arith.constant 2.000000e+01 : f32
    %46 = vector.broadcast %cst_28 : f32 to vector<32x512xf32>
    %47 = arith.cmpf ogt, %45, %46 : vector<32x512xf32>
    %cst_29 = arith.constant 2.000000e+01 : f32
    %48 = vector.broadcast %cst_29 : f32 to vector<32x512xf32>
    %49 = arith.minimumf %45, %48 : vector<32x512xf32>
    %50 = math.exp %49 : vector<32x512xf32>
    %51 = math.log1p %50 : vector<32x512xf32>
    %cst_30 = arith.constant 1.000000e+02 : f32
    %52 = vector.broadcast %cst_30 : f32 to vector<32x512xf32>
    %53 = arith.divf %51, %52 : vector<32x512xf32>
    %54 = arith.select %47, %43, %53 : vector<32x512xi1>, vector<32x512xf32>
    %c3 = arith.constant 3 : index
    %c0_31 = arith.constant 0 : index
    %c0_32 = arith.constant 0 : index
    %55 = vector.load %arg2[%c3, %c0_31, %c0_32] : memref<7x32x32xf32, #tpu.memory_space<vmem>>, vector<1x32x32xf32>
    %56 = vector.shape_cast %55 : vector<1x32x32xf32> to vector<32x32xf32>
    %cst_33 = arith.constant dense<0.000000e+00> : vector<32x512xf32>
    %57 = tpu.matmul %56, %54, %cst_33 {dimension_numbers = #tpu.dot_dimension_numbers<[1], [0], [0], [1], [0, 0, 1, 1], [], []>} : vector<32x32xf32>, vector<32x512xf32>, vector<32x512xf32> -> vector<32x512xf32>
    %c3_34 = arith.constant 3 : index
    %c0_35 = arith.constant 0 : index
    %c0_36 = arith.constant 0 : index
    %58 = vector.load %arg3[%c3_34, %c0_35, %c0_36] : memref<7x32x1xf32, #tpu.memory_space<vmem>>, vector<1x32x1xf32>
    %59 = vector.shape_cast %58 : vector<1x32x1xf32> to vector<32x1xf32>
    %60 = vector.broadcast %59 : vector<32x1xf32> to vector<32x512xf32>
    %61 = arith.addf %57, %60 : vector<32x512xf32>
    %cst_37 = arith.constant 1.000000e+02 : f32
    %62 = vector.broadcast %cst_37 : f32 to vector<32x512xf32>
    %63 = arith.mulf %62, %61 : vector<32x512xf32>
    %cst_38 = arith.constant 2.000000e+01 : f32
    %64 = vector.broadcast %cst_38 : f32 to vector<32x512xf32>
    %65 = arith.cmpf ogt, %63, %64 : vector<32x512xf32>
    %cst_39 = arith.constant 2.000000e+01 : f32
    %66 = vector.broadcast %cst_39 : f32 to vector<32x512xf32>
    %67 = arith.minimumf %63, %66 : vector<32x512xf32>
    %68 = math.exp %67 : vector<32x512xf32>
    %69 = math.log1p %68 : vector<32x512xf32>
    %cst_40 = arith.constant 1.000000e+02 : f32
    %70 = vector.broadcast %cst_40 : f32 to vector<32x512xf32>
    %71 = arith.divf %69, %70 : vector<32x512xf32>
    %72 = arith.select %65, %61, %71 : vector<32x512xi1>, vector<32x512xf32>
    %c0_41 = arith.constant 0 : index
    %c0_42 = arith.constant 0 : index
    %73 = vector.load %arg5[%c0_41, %c0_42] : memref<32x512xf32, #tpu.memory_space<vmem>>, vector<32x512xf32>
    tpu.vector_store %arg5[%c0_41, %c0_42], %72 {strides = array<i32>} : memref<32x512xf32, #tpu.memory_space<vmem>>, vector<32x512xf32>,
    %c29 = arith.constant 29 : index
    %c0_43 = arith.constant 0 : index
    %74 = vector.load %arg5[%c29, %c0_43] : memref<32x512xf32, #tpu.memory_space<vmem>>, vector<3x512xf32>
    tpu.vector_store %arg5[%c29, %c0_43], %0 {strides = array<i32>} : memref<32x512xf32, #tpu.memory_space<vmem>>, vector<3x512xf32>,
    %c0_44 = arith.constant 0 : index
    %c0_45 = arith.constant 0 : index
    %75 = vector.load %arg5[%c0_44, %c0_45] : memref<32x512xf32, #tpu.memory_space<vmem>>, vector<32x512xf32>
    %c4 = arith.constant 4 : index
    %c0_46 = arith.constant 0 : index
    %c0_47 = arith.constant 0 : index
    %76 = vector.load %arg2[%c4, %c0_46, %c0_47] : memref<7x32x32xf32, #tpu.memory_space<vmem>>, vector<1x32x32xf32>
    %77 = vector.shape_cast %76 : vector<1x32x32xf32> to vector<32x32xf32>
    %cst_48 = arith.constant dense<0.000000e+00> : vector<32x512xf32>
    %78 = tpu.matmul %77, %75, %cst_48 {dimension_numbers = #tpu.dot_dimension_numbers<[1], [0], [0], [1], [0, 0, 1, 1], [], []>} : vector<32x32xf32>, vector<32x512xf32>, vector<32x512xf32> -> vector<32x512xf32>
    %c4_49 = arith.constant 4 : index
    %c0_50 = arith.constant 0 : index
    %c0_51 = arith.constant 0 : index
    %79 = vector.load %arg3[%c4_49, %c0_50, %c0_51] : memref<7x32x1xf32, #tpu.memory_space<vmem>>, vector<1x32x1xf32>
    %80 = vector.shape_cast %79 : vector<1x32x1xf32> to vector<32x1xf32>
    %81 = vector.broadcast %80 : vector<32x1xf32> to vector<32x512xf32>
    %82 = arith.addf %78, %81 : vector<32x512xf32>
    %cst_52 = arith.constant 1.000000e+02 : f32
    %83 = vector.broadcast %cst_52 : f32 to vector<32x512xf32>
    %84 = arith.mulf %83, %82 : vector<32x512xf32>
    %cst_53 = arith.constant 2.000000e+01 : f32
    %85 = vector.broadcast %cst_53 : f32 to vector<32x512xf32>
    %86 = arith.cmpf ogt, %84, %85 : vector<32x512xf32>
    %cst_54 = arith.constant 2.000000e+01 : f32
    %87 = vector.broadcast %cst_54 : f32 to vector<32x512xf32>
    %88 = arith.minimumf %84, %87 : vector<32x512xf32>
    %89 = math.exp %88 : vector<32x512xf32>
    %90 = math.log1p %89 : vector<32x512xf32>
    %cst_55 = arith.constant 1.000000e+02 : f32
    %91 = vector.broadcast %cst_55 : f32 to vector<32x512xf32>
    %92 = arith.divf %90, %91 : vector<32x512xf32>
    %93 = arith.select %86, %82, %92 : vector<32x512xi1>, vector<32x512xf32>
    %c5 = arith.constant 5 : index
    %c0_56 = arith.constant 0 : index
    %c0_57 = arith.constant 0 : index
    %94 = vector.load %arg2[%c5, %c0_56, %c0_57] : memref<7x32x32xf32, #tpu.memory_space<vmem>>, vector<1x32x32xf32>
    %95 = vector.shape_cast %94 : vector<1x32x32xf32> to vector<32x32xf32>
    %cst_58 = arith.constant dense<0.000000e+00> : vector<32x512xf32>
    %96 = tpu.matmul %95, %93, %cst_58 {dimension_numbers = #tpu.dot_dimension_numbers<[1], [0], [0], [1], [0, 0, 1, 1], [], []>} : vector<32x32xf32>, vector<32x512xf32>, vector<32x512xf32> -> vector<32x512xf32>
    %c5_59 = arith.constant 5 : index
    %c0_60 = arith.constant 0 : index
    %c0_61 = arith.constant 0 : index
    %97 = vector.load %arg3[%c5_59, %c0_60, %c0_61] : memref<7x32x1xf32, #tpu.memory_space<vmem>>, vector<1x32x1xf32>
    %98 = vector.shape_cast %97 : vector<1x32x1xf32> to vector<32x1xf32>
    %99 = vector.broadcast %98 : vector<32x1xf32> to vector<32x512xf32>
    %100 = arith.addf %96, %99 : vector<32x512xf32>
    %cst_62 = arith.constant 1.000000e+02 : f32
    %101 = vector.broadcast %cst_62 : f32 to vector<32x512xf32>
    %102 = arith.mulf %101, %100 : vector<32x512xf32>
    %cst_63 = arith.constant 2.000000e+01 : f32
    %103 = vector.broadcast %cst_63 : f32 to vector<32x512xf32>
    %104 = arith.cmpf ogt, %102, %103 : vector<32x512xf32>
    %cst_64 = arith.constant 2.000000e+01 : f32
    %105 = vector.broadcast %cst_64 : f32 to vector<32x512xf32>
    %106 = arith.minimumf %102, %105 : vector<32x512xf32>
    %107 = math.exp %106 : vector<32x512xf32>
    %108 = math.log1p %107 : vector<32x512xf32>
    %cst_65 = arith.constant 1.000000e+02 : f32
    %109 = vector.broadcast %cst_65 : f32 to vector<32x512xf32>
    %110 = arith.divf %108, %109 : vector<32x512xf32>
    %111 = arith.select %104, %100, %110 : vector<32x512xi1>, vector<32x512xf32>
    %c6 = arith.constant 6 : index
    %c0_66 = arith.constant 0 : index
    %c0_67 = arith.constant 0 : index
    %112 = vector.load %arg2[%c6, %c0_66, %c0_67] : memref<7x32x32xf32, #tpu.memory_space<vmem>>, vector<1x32x32xf32>
    %113 = vector.shape_cast %112 : vector<1x32x32xf32> to vector<32x32xf32>
    %cst_68 = arith.constant dense<0.000000e+00> : vector<32x512xf32>
    %114 = tpu.matmul %113, %111, %cst_68 {dimension_numbers = #tpu.dot_dimension_numbers<[1], [0], [0], [1], [0, 0, 1, 1], [], []>} : vector<32x32xf32>, vector<32x512xf32>, vector<32x512xf32> -> vector<32x512xf32>
    %c6_69 = arith.constant 6 : index
    %c0_70 = arith.constant 0 : index
    %c0_71 = arith.constant 0 : index
    %115 = vector.load %arg3[%c6_69, %c0_70, %c0_71] : memref<7x32x1xf32, #tpu.memory_space<vmem>>, vector<1x32x1xf32>
    %116 = vector.shape_cast %115 : vector<1x32x1xf32> to vector<32x1xf32>
    %117 = vector.broadcast %116 : vector<32x1xf32> to vector<32x512xf32>
    %118 = arith.addf %114, %117 : vector<32x512xf32>
    %119 = vector.extract_strided_slice %118 {offsets = [0, 0], sizes = [10, 512], strides = [1, 1]} : vector<32x512xf32> to vector<10x512xf32>
    %c0_72 = arith.constant 0 : index
    %c0_73 = arith.constant 0 : index
    %120 = vector.load %arg4[%c0_72, %c0_73] : memref<10x512xf32, #tpu.memory_space<vmem>>, vector<10x512xf32>
    tpu.vector_store %arg4[%c0_72, %c0_73], %119 {strides = array<i32>} : memref<10x512xf32, #tpu.memory_space<vmem>>, vector<10x512xf32>,
    return
  }
  func.func @transform_0(%arg0: i32) -> (i32, i32) {
    %c0_i32 = arith.constant 0 : i32
    %c0_i32_0 = arith.constant 0 : i32
    return %c0_i32, %arg0 : i32, i32
  }
  func.func @transform_1(%arg0: i32) -> (i32, i32, i32) {
    %c0_i32 = arith.constant 0 : i32
    %c0_i32_0 = arith.constant 0 : i32
    %c0_i32_1 = arith.constant 0 : i32
    %c0_i32_2 = arith.constant 0 : i32
    return %c0_i32, %c0_i32_0, %c0_i32_1 : i32, i32, i32
  }
  func.func @transform_2(%arg0: i32) -> (i32, i32, i32) {
    %c0_i32 = arith.constant 0 : i32
    %c0_i32_0 = arith.constant 0 : i32
    %c0_i32_1 = arith.constant 0 : i32
    %c0_i32_2 = arith.constant 0 : i32
    return %c0_i32, %c0_i32_0, %c0_i32_1 : i32, i32, i32
  }
  func.func @transform_3(%arg0: i32) -> (i32, i32) {
    %c0_i32 = arith.constant 0 : i32
    %c0_i32_0 = arith.constant 0 : i32
    return %c0_i32, %arg0 : i32, i32
  }
}

</mosaic_0001>

<bundles_post_ra>
// kernel: tpu_custom_call.1
= control target key start
LH: loop header
LB: loop body
LE: loop exit
PB: predicated region body
PF: predicated region fallthrough
CT: control target
= control target key end

     0   :  { %8 = vsyncpa [#allocation4], 0  ;;  %s5987_s0 = inlined_call_operand.hbm [shape: f32[3,2048], index: 0, kind: input, shape index: {}]   ;;  %s5988_s1 = inlined_call_operand.vmem [shape: f32[7,32,32], index: 1, kind: input, shape index: {}]   ;;  %s5989_s2 = inlined_call_operand.vmem [shape: f32[7,32,1], index: 2, kind: input, shape index: {}]   ;;  %s5990_s3 = inlined_call_operand.hbm [shape: f32[10,2048], index: 3, kind: output, shape index: {}]  }
   0x1   :  { %10 = vsyncpa [#allocation4 + $0x1], 0 }
   0x2   :  { %11 = vsyncpa [#allocation5], 0 }
   0x3   :  { %13 = vsyncpa [#allocation5 + $0x1], 0  ;;  %s3741_s12 = smov 0   ;;  %s3743_s13 = smov 0  }
   0x4   :  { %s3745_s14 = smov 0   ;;  %s3747_s15 = smov 0  }
   0x5 LB: > { %s3762_s16 = sadd.s32 4294967295, %s3714_s15   ;;  %s2998_s17 = sadd.s32 4294967294, %s3714_s15   ;;  %s3714_s15 = sphi %s3747_s15, %s6127_s15   ;;  %s3710_s14 = sphi %s3745_s14, %s6126_s14   ;;  %s3706_s13 = sphi %s3743_s13, %s6125_s13   ;;  %s3702_s12 = sphi %s3741_s12, %s6124_s12  }
   0x6   : > { %s3766_s18 = sadd.s32 1, %s3714_s15   ;;  %s26_s19 = sadd.s32 1, %s3710_s14 }
   0x7   : > { %s23_s20 = ssub.s32 %s3714_s15, %s3766_s18  ;;  %p33_p0 = scmp.ne.s32.totalorder %s3710_s14, %s3706_s13 }
   0x8   : > { %p24_p1 = scmp.eq.s32.totalorder %s23_s20, 0  ;;  %p34_p2 = scmp.eq.s32.totalorder %s3714_s15, 0 }
   0x9   : > { %p39_p3 = scmp.ne.s32.totalorder %s3706_s13, %s3702_s12  ;;  %p40_p4 = scmp.eq.s32.totalorder %s3762_s16, 0 }
   0xa   : > { %s3778_s21 = scalar_select %p24_p1, %s3710_s14, %s26_s19  }
   0xb   : > { %p3780_p5 = por %p34_p2, %p33_p0  ;;  %p3784_p6 = por %p40_p4, %p39_p3 }
   0xc   : > { %p105_p7 = scmp.eq.s32.totalorder %s3762_s16, 3  ;;  %p111_p8 = scmp.eq.s32.totalorder %s2998_s17, 3 }
   0xd   : > { %p3190_p9 = scmp.lt.s32.totalorder %s3714_s15, 4  ;;  %s137_s26 = sand.u32 1, %s3710_s14  }
   0xe   : > { %p3790_p10 = por %p105_p7, %p33_p0  ;;  %p3794_p11 = por %p111_p8, %p39_p3 }
   0xf   : > { %s3176_s27 = sshll.u32 %s3714_s15, 4  ;;  %s3001_s28 = sshll.u32 %s137_s26, 4 }
  0x10   : > { %s146_s4 = scalar_lea.hbm %s5987_s0, %s3176_s27  ;;  %s141_s6 = scalar_lea.vmem [#allocation3], %s3001_s28 }
  0x11   : > { %s148_s5 = sshll.u32 %s146_s4, 4  ;;  %s150_s7 = sshll.u32 %s141_s6, 4  ;;  %s149_s5 = int_to_ptr.hbm [resolvable:$true] %s148_s5  ;;  %s151_s7 = int_to_ptr.vmem [resolvable:$true] %s150_s7 }
  0x12   : > { %p3805_p12 = pnand %p3190_p9, %p3780_p5  ;;  %p3004_p13 = scmp.ge.s32.totalorder %s3714_s15, 1 }
  0x13   : > { %p155_p0 = scmp.lt.s32.totalorder %s3714_s15, 5  ;;  %s138_s9 = scalar_lea.sflag [#allocation4], %s137_s26 }
  0x14   : > { %s3618_s10 = sshra.s32 %s149_s5, 4  ;;  %p3622_p2 = pneg %p3805_p12  ;;  %s3619_s10 = int_to_ptr.hbm [resolvable:$true] %s3618_s10 }
  0x15   : > { %s3620_s11 = scalar_lea.hbm %s3619_s10, 16  ;;  %s3625_s20 = scalar_lea.hbm %s5987_s0, 64 }
  0x16   : > { %p3621_p1 = scmp.ne.s32.totalorder %s3619_s10, %s3620_s11  ;;  %p3626_p5 = scmp.lt.s32.totalorder %s3619_s10, %s5987_s0 }
  0x17   : > { %p3627_p7 = scmp.lt.s32.totalorder %s3625_s20, %s3620_s11 }
  0x18   : > { %p3623_p3 = pnand %p3622_p2, %p3621_p1 }
  0x19   : > { %p3628_p8 = por %p3627_p7, %p3626_p5 }
  0x1a   : > { %p3624_p4 = pneg %p3623_p3 }
  0x1c   : > { %p3629_p9 = pnand %p3628_p8, %p3624_p4 }
  0x1e   : > { %3632 = shalt.err (!%p3629_p9)
}
  0x1f   : > { %3185 = dma.hbm_to_vmem [thread:$0]  (!%p3805_p12), %s149_s5, 256, %s151_s7, %s138_s9  }
  0x20   : > { %p156_p1 = pnand %p3004_p13, %p155_p0 }
  0x22   : > { %159 = sbr.rel (%p156_p1) target bundleno = 1414 (0x586), region = 32 }
  0x27   : > { %s3826_s26 = sand.u32 1, %s3706_s13  }
  0x28   : > { %s3005_s28 = sshll.u32 %s3826_s26, 4  ;;  %s162_s29 = scalar_lea.sflag [#allocation4], %s3826_s26 }
  0x29   : > { %s165_s30 = scalar_lea.vmem [#allocation3], %s3005_s28 }
  0x2a   : > { %3693 = dma.done.wait (%p3784_p6), %s162_s29, 256  }
  0x2b   : > { %3695 = vsyncadd (%p3784_p6), %s162_s29, 4294967040  ;;  %v3716_v0 = vmov 0   ;;  %v200_v1 = vld [vmem:[%s5989_s2 + $0x18] sm:$0xff]  ;;  %v198_v2 = vld [vmem:[%s5989_s2 + $0x8] sm:$0xff]  ;;  %vm243_vm0 = vcmask 1042432   ;;  %vm230_vm1 = vcmask 23552  }
  0x2c   : > { %3230 = vset.pattern.permute.xlu1 %v3716_v0  ;;  %3229 = vset.pattern.permute.xlu0 %v3716_v0  ;;  %v191_v3 = vld [vmem:[%s165_s30] sm:$0x77]  ;;  %v192_v4 = vld [vmem:[%s165_s30 + $0x8] sm:$0x77]  ;;  %v3717_v30 = vmov 100.0   ;;  %s3006_s9 = sshll.u32 %s3826_s26, 6 }
  0x2d   : > { %3231 = vset.pattern.permute.xlu2 %v3716_v0  ;;  %218 = vperm.xlu0 %3229, %v200_v1   ;;  %223 = vst [vmem:[#allocation1] ss:$2 sm:$0xff] %v191_v3  ;;  %v199_v5 = vld [vmem:[%s5989_s2 + $0x10] sm:$0xff]  ;;  %v197_v6 = vld [vmem:[%s5989_s2] sm:$0xff]  ;;  %v3032_v12 = vld [vmem:[%s5989_s2 + $0x28] sm:$0xff]  ;;  %3232 = vrcp.f32 %v3717_v30  ;;  %s5944_s10 = scalar_lea.vmem [#allocation6], %s3006_s9 }
  0x2e   : > { %208 = vperm.xlu1 %3230, %v198_v2   ;;  %225 = vst [vmem:[#allocation1 + $0x10] ss:$2 sm:$0xff] %v192_v4  ;;  %v193_v7 = vld [vmem:[%s5988_s1] sm:$0xff]  ;;  %v194_v14 = vld [vmem:[%s5988_s1 + $0x8] sm:$0xff]  ;;  %v3057_v15 = vld [vmem:[%s5989_s2 + $0x50] sm:$0xff]  ;;  %s3177_s11 = sshll.u32 %s3762_s16, 5 }
  0x2f   : > { %v3031_v13 = vld [vmem:[%s5989_s2 + $0x20] sm:$0xff]  ;;  %v3056_v16 = vld [vmem:[%s5989_s2 + $0x48] sm:$0xff]  ;;  %v195_v17 = vld [vmem:[%s5988_s1 + $0x10] sm:$0xff]  ;;  %s2921_s20 = scalar_lea.hbm %s5990_s3, %s3177_s11  ;;  %s2922_s22 = sshll.u32 %s5944_s10, 4  ;;  %s2923_s22 = int_to_ptr.vmem [resolvable:$true] %s2922_s22 }
  0x30   : > { %v3082_v18 = vld [vmem:[%s5989_s2 + $0x78] sm:$0xff]  ;;  %v3081_v19 = vld [vmem:[%s5989_s2 + $0x70] sm:$0xff]  ;;  %v3079_v21 = vld [vmem:[%s5989_s2 + $0x60] sm:$0xff]  ;;  %s2924_s27 = sshll.u32 %s2921_s20, 4  ;;  %s2910_s28 = scalar_lea.sflag [#allocation5], %s3826_s26  ;;  %s2925_s27 = int_to_ptr.hbm [resolvable:$true] %s2924_s27 }
  0x31   : > { %v196_v20 = vld [vmem:[%s5988_s1 + $0x18] sm:$0xff]  ;;  %v3104_v23 = vld [vmem:[%s5989_s2 + $0x88] sm:$0xff]  ;;  %v3103_v24 = vld [vmem:[%s5989_s2 + $0x80] sm:$0xff]  ;;  %s3662_s16 = sshra.s32 %s2925_s27, 4  ;;  %s3668_s5 = scalar_lea.hbm %s5990_s3, 256  ;;  %s3663_s16 = int_to_ptr.hbm [resolvable:$true] %s3662_s16 }
  0x32   : > { %v3106_v22 = vld [vmem:[%s5989_s2 + $0x98] sm:$0xff]  ;;  %v3129_v25 = vld [vmem:[%s5989_s2 + $0xb0] sm:$0xff]  ;;  %v3128_v26 = vld [vmem:[%s5989_s2 + $0xa8] sm:$0xff]  ;;  %s3664_s29 = scalar_lea.hbm %s3663_s16, 64  ;;  %p3669_p0 = scmp.lt.s32.totalorder %s3663_s16, %s5990_s3 }
  0x33   : > { %v3151_v27 = vld [vmem:[%s5989_s2 + $0xc0] sm:$0xff]  ;;  %v3152_v28 = vld [vmem:[%s5989_s2 + $0xc8] sm:$0xff]  ;;  %v3233_v36 = vpop.eup %3232  ;;  %p3665_p6 = scmp.ne.s32.totalorder %s3663_s16, %s3664_s29  ;;  %p3670_p2 = scmp.lt.s32.totalorder %s3668_s5, %s3664_s29 }
  0x34   : > { %v226_v8 = vld.sshfl [vmem:[#allocation1] sm:$0xff pattern:$0x75316420]  ;;  %v227_v9 = vld.sshfl [vmem:[#allocation1 + $0x8] sm:$0xff pattern:$0x75316420]  ;;  %vm597_vm2 = vweird.f32 %v3233_v36 }
  0x35   : > { %213 = vperm.xlu0 %3229, %v199_v5   ;;  %3007 = vmatpush.msk.msra.mxu0 %vm243_vm0, %v226_v8  ;;  %1890 = vst [vmem:[#allocation1] ss:$2 sm:$0xff] %v191_v3  ;;  %v228_v10 = vld.sshfl [vmem:[#allocation1 + $0x10] sm:$0xff pattern:$0x75316420]  ;;  %v593_v40 = vmul.f32 100.0, %v3233_v36  ;;  %p3666_p12 = pnand %p3665_p6, %p3790_p10  ;;  %p3671_p3 = por %p3670_p2, %p3669_p0 }
  0x36   : > { %203 = vperm.xlu1 %3230, %v197_v6   ;;  %3012 = vmatpush.msk.msra.mxu1 %vm243_vm0, %v227_v9  ;;  %v229_v11 = vld.sshfl [vmem:[#allocation1 + $0x18] sm:$0xff pattern:$0x75316420] }
  0x37   : > { %3017 = vmatpush.msk.msra.mxu2 %vm243_vm0, %v228_v10  ;;  %3008 = vmatmul.msk.f32.vlgmr.msra.gmra.mxu0 %vm230_vm1, %v193_v7  ;;  %1892 = vst [vmem:[#allocation1 + $0x10] ss:$2 sm:$0xff] %v192_v4  ;;  %v594_v51 = vsub.f32 1.0, %v593_v40  ;;  %p3667_p13 = pneg %p3666_p12 }
  0x38   : > { %3022 = vmatpush.msk.msra.mxu3 %vm243_vm0, %v229_v11  ;;  %3013 = vmatmul.msk.f32.vlgmr.msra.gmra.mxu1 %vm230_vm1, %v193_v7 }
  0x39   : > { %3018 = vmatmul.msk.f32.vlgmr.msra.gmra.mxu2 %vm230_vm1, %v193_v7  ;;  %3023 = vmatmul.msk.f32.vlgmr.msra.gmra.mxu3 %vm230_vm1, %v193_v7  ;;  %v595_v59 = vmul.f32 %v3233_v36, %v594_v51  ;;  %p3672_p4 = pnand %p3671_p3, %p3667_p13 }
  0x3b   : > { %v596_v10 = vadd.f32 %v3233_v36, %v595_v59 }
  0x3d   : > { %648 = vperm.xlu0 %3229, %v3032_v12  }
  0x3e   : > { %643 = vperm.xlu1 %3230, %v3031_v13  }
  0x3f   : > { %3009 = vmatmul.msk.f32.gmra.mxu0 %vm230_vm1, %v194_v14 }
  0x40   : > { %3014 = vmatmul.msk.f32.gmra.mxu1 %vm230_vm1, %v194_v14 }
  0x41   : > { %3019 = vmatmul.msk.f32.gmra.mxu2 %vm230_vm1, %v194_v14  ;;  %3024 = vmatmul.msk.f32.gmra.mxu3 %vm230_vm1, %v194_v14 }
  0x45   : > { %1068 = vperm.xlu0 %3229, %v3057_v15  }
  0x46   : > { %1063 = vperm.xlu1 %3230, %v3056_v16  }
  0x47   : > { %3010 = vmatmul.msk.f32.gmra.mxu0 %vm230_vm1, %v195_v17 }
  0x48   : > { %3015 = vmatmul.msk.f32.gmra.mxu1 %vm230_vm1, %v195_v17 }
  0x49   : > { %3020 = vmatmul.msk.f32.gmra.mxu2 %vm230_vm1, %v195_v17  ;;  %3025 = vmatmul.msk.f32.gmra.mxu3 %vm230_vm1, %v195_v17 }
  0x4d   : > { %1487 = vperm.xlu0 %3229, %v3082_v18  }
  0x4e   : > { %1482 = vperm.xlu1 %3230, %v3081_v19  }
  0x4f   : > { %3011 = vmatmul.msk.f32.gmra.mxu0 %vm230_vm1, %v196_v20 }
  0x50   : > { %3016 = vmatmul.msk.f32.gmra.mxu1 %vm230_vm1, %v196_v20 }
  0x51   : > { %3021 = vmatmul.msk.f32.gmra.mxu2 %vm230_vm1, %v196_v20  ;;  %3026 = vmatmul.msk.f32.gmra.mxu3 %vm230_vm1, %v196_v20 }
  0x55   : > { %1472 = vperm.xlu0 %3229, %v3079_v21  }
  0x56   : > { %1952 = vperm.xlu1 %3230, %v3106_v22   ;;  %v3980_v22 = vsel %vm597_vm2, %v3233_v36, %v596_v10 }
  0x5d   : > { %1942 = vperm.xlu0 %3229, %v3104_v23  }
  0x5e   : > { %1937 = vperm.xlu1 %3230, %v3103_v24  }
  0x65   : > { %2361 = vperm.xlu0 %3229, %v3129_v25  }
  0x66   : > { %2356 = vperm.xlu1 %3230, %v3128_v26  }
  0x6d   : > { %2765 = vperm.xlu0 %3229, %v3151_v27  }
  0x6e   : > { %2770 = vperm.xlu1 %3230, %v3152_v28  }
  0x9f   : > { %v3921_v37 = vpop.permute.xlu0 %218 }
  0xa0   : > { %v209_v29 = vpop.permute.xlu1 %208 }
  0xa7   : > { %v214_v58 = vpop.permute.xlu0 %213 }
  0xa8   : > { %v204_v31 = vpop.permute.xlu1 %203 }
  0xb4   : > { %v269_v32 = vpop.f32.mrf.mxu0 }
  0xb5   : > { %v3916_v33 = vadd.f32 %v269_v32, %v204_v31  ;;  %v298_v34 = vpop.f32.mrf.mxu1 }
  0xb6   : > { %v3923_v38 = vadd.f32 %v298_v34, %v204_v31 }
  0xb7   : > { %v3919_v35 = vmul.f32 100.0, %v3916_v33 }
  0xb8   : > { %v3927_v43 = vmul.f32 100.0, %v3923_v38 }
  0xb9   : > { %v400_v39 = vmin.f32 %v3919_v35, 20.0  ;;  %vm384_vm11 = vcmp.gt.f32.partialorder %v3919_v35, 20.0 }
  0xba   : > { %v401_v55 = vmin.f32 %v3927_v43, 20.0  ;;  %vm385_vm1 = vcmp.gt.f32.partialorder %v3927_v43, 20.0 }
  0xbb   : > { %v416_v47 = vmul.f32 1.442695, %v400_v39 }
  0xbc   : > { %v327_v41 = vpop.f32.mrf.mxu2  ;;  %v356_v42 = vpop.f32.mrf.mxu3  ;;  %v418_v5 = vmul.f32 1.442695, %v401_v55 }
  0xbd   : > { %v3929_v44 = vadd.f32 %v327_v41, %v204_v31  ;;  %v272_v45 = vpop.f32.mrf.mxu0  ;;  %v301_v46 = vpop.f32.mrf.mxu1  ;;  %v3931_v48 = vadd.f32 %v356_v42, %v204_v31  ;;  %3234 = vpow2.f32 %v416_v47 }
  0xbe   : > { %v3933_v49 = vadd.f32 %v272_v45, %v209_v29  ;;  %v3935_v50 = vadd.f32 %v301_v46, %v209_v29 }
  0xbf   : > { %6004 = vst [vmem:[#allocation9_spill] sm:$0xff] %v3929_v44  ;;  %v3938_v52 = vmul.f32 100.0, %v3929_v44  ;;  %v3948_v56 = vmul.f32 100.0, %v3931_v48 }
  0xc0   : > { %6005 = vst [vmem:[#allocation10_spill] sm:$0xff] %v3931_v48  ;;  %v3941_v53 = vmul.f32 100.0, %v3933_v49  ;;  %v3944_v54 = vmul.f32 100.0, %v3935_v50 }
  0xc1   : > { %6006 = vst [vmem:[#allocation11_spill] sm:$0xff] %v3938_v52  ;;  %v402_v60 = vmin.f32 %v3938_v52, 20.0  ;;  %v403_v6 = vmin.f32 %v3948_v56, 20.0 }
  0xc2   : > { %6007 = vst [vmem:[#allocation12_spill] sm:$0xff] %v3948_v56  ;;  %v404_v57 = vmin.f32 %v3941_v53, 20.0  ;;  %v405_v0 = vmin.f32 %v3944_v54, 20.0  ;;  %vm388_vm5 = vcmp.gt.f32.partialorder %v3941_v53, 20.0  ;;  %vm389_vm15 = vcmp.gt.f32.partialorder %v3944_v54, 20.0 }
  0xc3   : > { %v3965_v11 = vpop.eup %3234  ;;  %v420_v12 = vmul.f32 1.442695, %v402_v60  ;;  %v422_v18 = vmul.f32 1.442695, %v403_v6 }
  0xc4   : > { %v424_v61 = vmul.f32 1.442695, %v404_v57  ;;  %v330_v62 = vpop.f32.mrf.mxu2  ;;  %v359_v63 = vpop.f32.mrf.mxu3  ;;  %v426_v16 = vmul.f32 1.442695, %v405_v0  ;;  %v451_v17 = vmul.f32 -0.5, %v3965_v11  ;;  %v448_v23 = vadd.f32 1.0, %v3965_v11 }
  0xc5   : > { %v3953_v1 = vadd.f32 %v330_v62, %v209_v29  ;;  %v3955_v2 = vadd.f32 %v359_v63, %v209_v29  ;;  %v275_v3 = vpop.f32.mrf.mxu0  ;;  %v304_v4 = vpop.f32.mrf.mxu1 }
  0xc6   : > { %v3958_v7 = vadd.f32 %v275_v3, %v214_v58  ;;  %v3960_v8 = vadd.f32 %v304_v4, %v214_v58  ;;  %3236 = vpow2.f32 %v424_v61  ;;  %v452_v39 = vadd.f32 1.0, %v451_v17 }
  0xc7   : > { %6008 = vst [vmem:[#allocation13_spill] sm:$0xff] %v3953_v1  ;;  %v3963_v9 = vmul.f32 100.0, %v3953_v1  ;;  %v3968_v13 = vmul.f32 100.0, %v3955_v2  ;;  %3238 = vpow2.f32 %v418_v5 }
  0xc8   : > { %6009 = vst [vmem:[#allocation14_spill] sm:$0xff] %v3955_v2  ;;  %v3971_v14 = vmul.f32 100.0, %v3958_v7  ;;  %v3974_v15 = vmul.f32 100.0, %v3960_v8  ;;  %3240 = vpow2.f32 %v420_v12  ;;  %v4011_v61 = vmul.f32 %v3965_v11, %v452_v39 }
  0xc9   : > { %6010 = vst [vmem:[#allocation15_spill] sm:$0xff] %v3963_v9  ;;  %v406_v21 = vmin.f32 %v3963_v9, 20.0  ;;  %v407_v25 = vmin.f32 %v3968_v13, 20.0  ;;  %3242 = vpow2.f32 %v426_v16 }
  0xca   : > { %6011 = vst [vmem:[#allocation16_spill] sm:$0xff] %v3968_v13  ;;  %v408_v19 = vmin.f32 %v3971_v14, 20.0  ;;  %v409_v20 = vmin.f32 %v3974_v15, 20.0  ;;  %3244 = vpow2.f32 %v422_v18  ;;  %vm392_vm8 = vcmp.gt.f32.partialorder %v3971_v14, 20.0 }
  0xcb   : > { %v428_v45 = vmul.f32 1.442695, %v406_v21  ;;  %v430_v55 = vmul.f32 1.442695, %v407_v25  ;;  %vm393_vm13 = vcmp.gt.f32.partialorder %v3974_v15, 20.0 }
  0xcc   : > { %v432_v26 = vmul.f32 1.442695, %v408_v19  ;;  %v434_v27 = vmul.f32 1.442695, %v409_v20  ;;  %v333_v28 = vpop.f32.mrf.mxu2  ;;  %v362_v29 = vpop.f32.mrf.mxu3 }
  0xcd   : > { %v3237_v30 = vpop.eup %3236  ;;  %v3985_v31 = vadd.f32 %v333_v28, %v214_v58  ;;  %v3987_v32 = vadd.f32 %v362_v29, %v214_v58  ;;  %v278_v34 = vpop.f32.mrf.mxu0 }
  0xce   : > { %v307_v36 = vpop.f32.mrf.mxu1  ;;  %v3990_v40 = vadd.f32 %v278_v34, %v3921_v37  ;;  %v484_v42 = vadd.f32 1.0, %v3237_v30  ;;  %3246 = vpow2.f32 %v432_v26  ;;  %v487_v47 = vmul.f32 -0.5, %v3237_v30  ;;  %v3998_v51 = vpop.eup %3238 }
  0xcf   : > { %v3993_v41 = vadd.f32 %v307_v36, %v3921_v37  ;;  %v3996_v46 = vmul.f32 100.0, %v3985_v31  ;;  %3248 = vpow2.f32 %v434_v27  ;;  %v4008_v60 = vmul.f32 100.0, %v3987_v32  ;;  %v4013_v62 = vpop.eup %3240 }
  0xd0   : > { %v4001_v57 = vmul.f32 100.0, %v3990_v40  ;;  %3250 = vlog2.f32 %v484_v42  ;;  %v488_v3 = vadd.f32 1.0, %v487_v47  ;;  %v4017_v4 = vpop.eup %3242  ;;  %v4020_v5 = vadd.f32 1.0, %v3998_v51 }
  0xd1   : > { %v4004_v58 = vmul.f32 100.0, %v3993_v41  ;;  %v410_v59 = vmin.f32 %v3996_v46, 20.0  ;;  %3252 = vlog2.f32 %v448_v23  ;;  %v460_v6 = vmul.f32 -0.5, %v3998_v51  ;;  %v4024_v12 = vpop.eup %3244 }
  0xd2   : > { %v412_v63 = vmin.f32 %v4001_v57, 20.0  ;;  %3254 = vpow2.f32 %v428_v45  ;;  %v490_v20 = vand.u32 2147483647, %v3237_v30  ;;  %v411_v25 = vmin.f32 %v4008_v60, 20.0 }
  0xd3   : > { %v413_v0 = vmin.f32 %v4004_v58, 20.0  ;;  %3256 = vpow2.f32 %v430_v55  ;;  %v436_v23 = vmul.f32 1.442695, %v410_v59  ;;  %v489_v36 = vmul.f32 %v3237_v30, %v488_v3 }
  0xd4   : > { %v440_v16 = vmul.f32 1.442695, %v412_v63  ;;  %v336_v18 = vpop.f32.mrf.mxu2  ;;  %v365_v19 = vpop.f32.mrf.mxu3  ;;  %v493_v39 = vadd.f32 1.0, %v4017_v4  ;;  %vm4040_vm3 = vcmp.lt.f32.partialorder %v490_v20, 0.0004427343  ;;  %vm396_vm9 = vcmp.gt.f32.partialorder %v4001_v57, 20.0 }
  0xd5   : > { %v442_v17 = vmul.f32 1.442695, %v413_v0  ;;  %v3247_v21 = vpop.eup %3246  ;;  %v4028_v26 = vadd.f32 %v336_v18, %v3921_v37  ;;  %v4031_v27 = vadd.f32 %v365_v19, %v3921_v37  ;;  %v6014_v20 = vand.u32 2147483647, %v3965_v11 }
  0xd6   : > { %v3249_v28 = vpop.eup %3248  ;;  %v520_v29 = vadd.f32 1.0, %v3247_v21  ;;  %v523_v34 = vmul.f32 -0.5, %v3247_v21  ;;  %3258 = vpow2.f32 %v440_v16  ;;  %v526_v63 = vand.u32 2147483647, %v3247_v21 }
  0xd7   : > { %v3251_v42 = vpop.eup %3250  ;;  %v4035_v45 = vmul.f32 100.0, %v4028_v26  ;;  %v4038_v47 = vmul.f32 100.0, %v4031_v27  ;;  %v529_v55 = vadd.f32 1.0, %v3249_v28  ;;  %3260 = vpow2.f32 %v442_v17 }
  0xd8   : > { %v3253_v59 = vpop.eup %3252  ;;  %v532_v37 = vmul.f32 -0.5, %v3249_v28  ;;  %3262 = vlog2.f32 %v520_v29  ;;  %v524_v18 = vadd.f32 1.0, %v523_v34  ;;  %v535_v10 = vand.u32 2147483647, %v3249_v28 }
  0xd9   : > { %v4044_v30 = vpop.eup %3254  ;;  %v414_v3 = vmin.f32 %v4035_v45, 20.0  ;;  %v415_v16 = vmin.f32 %v4038_v47, 20.0  ;;  %3264 = vlog2.f32 %v529_v55  ;;  %v486_v24 = vmul.f32 0.6931472, %v3251_v42 }
  0xda   : > { %v4048_v19 = vpop.eup %3256  ;;  %v496_v17 = vmul.f32 -0.5, %v4017_v4  ;;  %vm4053_vm4 = vcmp.lt.f32.partialorder %v6014_v20, 0.0004427343  ;;  %v533_v52 = vadd.f32 1.0, %v532_v37  ;;  %3266 = vlog2.f32 %v493_v39 }
  0xdb   : > { %v444_v56 = vmul.f32 1.442695, %v414_v3  ;;  %v446_v44 = vmul.f32 1.442695, %v415_v16  ;;  %3268 = vpow2.f32 %v436_v23  ;;  %v438_v29 = vmul.f32 1.442695, %v411_v25 }
  0xdc   : > { %v499_v34 = vand.u32 2147483647, %v4017_v4  ;;  %v461_v55 = vadd.f32 1.0, %v460_v6  ;;  %v3259_v42 = vpop.eup %3258  ;;  %v525_v2 = vmul.f32 %v3247_v21, %v524_v18  ;;  %vm4059_vm6 = vcmp.lt.f32.partialorder %v526_v63, 0.0004427343 }
  0xdd   : > { %3270 = vpow2.f32 %v444_v56  ;;  %v492_v3 = vsel %vm4040_vm3, %v489_v36, %v486_v24  ;;  %v3261_v16 = vpop.eup %3260  ;;  %v556_v37 = vadd.f32 1.0, %v3259_v42  ;;  %v559_v39 = vmul.f32 -0.5, %v3259_v42 }
  0xde   : > { %vm4065_vm7 = vcmp.lt.f32.partialorder %v535_v10, 0.0004427343  ;;  %v497_v25 = vadd.f32 1.0, %v496_v17  ;;  %v3263_v20 = vpop.eup %3262  ;;  %3272 = vpow2.f32 %v446_v44  ;;  %v565_v6 = vadd.f32 1.0, %v3261_v16 }
  0xdf   : > { %v568_v56 = vmul.f32 -0.5, %v3261_v16  ;;  %v534_v21 = vmul.f32 %v3249_v28, %v533_v52  ;;  %v3265_v63 = vpop.eup %3264  ;;  %3274 = vlog2.f32 %v556_v37  ;;  %v522_v18 = vmul.f32 0.6931472, %v3263_v20 }
  0xe0   : > { %v603_v24 = vmul.f32 %v3980_v22, %v492_v3  ;;  %v450_v36 = vmul.f32 0.6931472, %v3253_v59  ;;  %v3267_v0 = vpop.eup %3266  ;;  %v562_v13 = vand.u32 2147483647, %v3259_v42  ;;  %3276 = vlog2.f32 %v565_v6 }
  0xe1   : > { %v571_v10 = vand.u32 2147483647, %v3261_v16  ;;  %v531_v1 = vmul.f32 0.6931472, %v3265_v63  ;;  %v4071_v9 = vpop.eup %3268  ;;  %v560_v17 = vadd.f32 1.0, %v559_v39  ;;  %v528_v44 = vsel %vm4059_vm6, %v525_v2, %v522_v18 }
  0xe2   : > { %v495_v52 = vmul.f32 0.6931472, %v3267_v0  ;;  %v498_v28 = vmul.f32 %v4017_v4, %v497_v25  ;;  %3278 = vpow2.f32 %v438_v29  ;;  %v569_v59 = vadd.f32 1.0, %v568_v56 }
  0xe3   : > { %v4076_v37 = vpop.eup %3270  ;;  %vm4079_vm10 = vcmp.lt.f32.partialorder %v499_v34, 0.0004427343  ;;  %vm397_vm12 = vcmp.gt.f32.partialorder %v4004_v58, 20.0  ;;  %v537_v2 = vsel %vm4065_vm7, %v534_v21, %v531_v1  ;;  %3280 = vlog2.f32 %v4020_v5 }
  0xe4   : > { %v462_v4 = vmul.f32 %v3998_v51, %v461_v55  ;;  %v4090_v29 = vpop.eup %3272  ;;  %vm4092_vm14 = vcmp.lt.f32.partialorder %v562_v13, 0.0004427343  ;;  %v607_v11 = vmul.f32 %v3980_v22, %v528_v44  ;;  %v619_v39 = vsel %vm388_vm5, %v3933_v49, %v603_v24  ;;  %v4206_v44 = vld [vmem:[%s5988_s1 + $0x28] sm:$0xff] }
  0xe5   : > { %v456_v1 = vsel %vm4053_vm4, %v4011_v61, %v450_v36  ;;  %v3275_v5 = vpop.eup %3274  ;;  %v561_v55 = vmul.f32 %v3259_v42, %v560_v17  ;;  %vm4104_vm0 = vcmp.lt.f32.partialorder %v571_v10, 0.0004427343  ;;  %v501_v13 = vsel %vm4079_vm10, %v498_v28, %v495_v52 }
  0xe6   : > { %v574_v25 = vadd.f32 1.0, %v4076_v37  ;;  %v3277_v20 = vpop.eup %3276  ;;  %v558_v53 = vmul.f32 0.6931472, %v3275_v5  ;;  %v570_v49 = vmul.f32 %v3261_v16, %v569_v59  ;;  %v608_v6 = vmul.f32 %v3980_v22, %v537_v2 }
  0xe7   : > { %v577_v56 = vmul.f32 -0.5, %v4076_v37  ;;  %v567_v48 = vmul.f32 0.6931472, %v3277_v20  ;;  %v599_v61 = vmul.f32 %v3980_v22, %v456_v1  ;;  %v583_v42 = vadd.f32 1.0, %v4090_v29 }
  0xe8   : > { %3282 = vlog2.f32 %v574_v25  ;;  %v4116_v21 = vpop.eup %3278  ;;  %v564_v63 = vsel %vm4092_vm14, %v561_v55, %v558_v53  ;;  %v623_v16 = vsel %vm392_vm8, %v3958_v7, %v607_v11  ;;  %v604_v18 = vmul.f32 %v3980_v22, %v501_v13  ;;  %v3034_v7 = vld [vmem:[%s5989_s2 + $0x38] sm:$0xff]  ;;  %v4168_v13 = vld [vmem:[%s5988_s1 + $0x20] sm:$0xff] }
  0xe9   : > { %v586_v24 = vmul.f32 -0.5, %v4090_v29  ;;  %v3281_v36 = vpop.eup %3280  ;;  %v611_v0 = vmul.f32 %v3980_v22, %v564_v63  ;;  %v573_v10 = vsel %vm4104_vm0, %v570_v49, %v567_v48  ;;  %v6027_v17 = vand.u32 2147483647, %v3998_v51  ;;  %658 = vperm.xlu2 %3231, %v3034_v7  }
  0xea   : > { %3284 = vlog2.f32 %v583_v42  ;;  %v612_v14 = vmul.f32 %v3980_v22, %v573_v10  ;;  %v459_v52 = vmul.f32 0.6931472, %v3281_v36  ;;  %vm398_vm3 = vcmp.gt.f32.partialorder %v4035_v45, 20.0 }
  0xeb   : > { %vm4130_vm2 = vcmp.lt.f32.partialorder %v6027_v17, 0.0004427343  ;;  %v578_v28 = vadd.f32 1.0, %v577_v56  ;;  %v627_v51 = vsel %vm396_vm9, %v3990_v40, %v611_v0  ;;  %v580_v59 = vand.u32 2147483647, %v4076_v37 }
  0xec   : > { %v587_v3 = vadd.f32 1.0, %v586_v24  ;;  %v538_v2 = vadd.f32 1.0, %v4071_v9  ;;  %686 = vmatpush.msrb.mxu0 %v627_v51  ;;  %v628_v34 = vsel %vm397_vm12, %v3993_v41, %v612_v14  ;;  %v624_v11 = vsel %vm393_vm13, %v3960_v8, %v608_v6  ;;  %v3058_v51 = vld [vmem:[%s5989_s2 + $0x58] sm:$0xff] }
  0xed   : > { %v465_v1 = vsel %vm4130_vm2, %v462_v4, %v459_v52  ;;  %v541_v57 = vmul.f32 -0.5, %v4071_v9  ;;  %715 = vmatpush.msrb.mxu1 %v628_v34  ;;  %v620_v5 = vsel %vm389_vm15, %v3935_v50, %v604_v18  ;;  %v615_v58 = vsel %vm384_vm11, %v3916_v33, %v599_v61 }
  0xee   : > { %v3283_v40 = vpop.eup %3282  ;;  %v589_v41 = vand.u32 2147483647, %v4090_v29  ;;  %3286 = vlog2.f32 %v538_v2  ;;  %687 = vmatpush.msrb.mxu0 %v623_v16  ;;  %v600_v8 = vmul.f32 %v3980_v22, %v465_v1  ;;  %v579_v4 = vmul.f32 %v4076_v37, %v578_v28 }
  0xef   : > { %v576_v15 = vmul.f32 0.6931472, %v3283_v40  ;;  %v547_v55 = vadd.f32 1.0, %v4116_v21  ;;  %716 = vmatpush.msrb.mxu1 %v624_v11  ;;  %vm581_vm4 = vcmp.lt.f32.partialorder %v580_v59, 0.0004427343  ;;  %v588_v50 = vmul.f32 %v4090_v29, %v587_v3 }
  0xf0   : > { %v3285_v23 = vpop.eup %3284  ;;  %vm661_vm5 = vcmask 261120   ;;  %v550_v35 = vmul.f32 -0.5, %v4116_v21  ;;  %688 = vmatpush.msrb.mxu0 %v619_v39  ;;  %v542_v25 = vadd.f32 1.0, %v541_v57  ;;  %vm590_vm6 = vcmp.lt.f32.partialorder %v589_v41, 0.0004427343  ;;  %v3033_v39 = vld [vmem:[%s5989_s2 + $0x30] sm:$0xff] }
  0xf1   : > { %v582_v33 = vsel %vm581_vm4, %v579_v4, %v576_v15  ;;  %v585_v54 = vmul.f32 0.6931472, %v3285_v23  ;;  %3288 = vlog2.f32 %v547_v55  ;;  %717 = vmatpush.msrb.mxu1 %v620_v5  ;;  %v544_v20 = vand.u32 2147483647, %v4071_v9  ;;  %653 = vperm.xlu2 %3231, %v3033_v39  }
  0xf2   : > { %v613_v37 = vmul.f32 %v3980_v22, %v582_v33  ;;  %v502_v29 = vadd.f32 1.0, %v4044_v30  ;;  %689 = vmatpush.msrb.mxu0 %v615_v58  ;;  %v616_v53 = vsel %vm385_vm1, %v3923_v38, %v600_v8  ;;  %vm399_vm7 = vcmp.gt.f32.partialorder %v4038_v47, 20.0  ;;  %v6030_v8 = vld [vmem:[#allocation15_spill] sm:$0xff] }
  0xf3   : > { %v591_v49 = vsel %vm590_vm6, %v588_v50, %v585_v54  ;;  %v505_v6 = vmul.f32 -0.5, %v4044_v30  ;;  %718 = vmatpush.msrb.mxu1 %v616_v53  ;;  %3035 = vmatmul.msk.f32.vlgmr.msrb.gmra.mxu0 %vm661_vm5, %v4168_v13  ;;  %v551_v42 = vadd.f32 1.0, %v550_v35  ;;  %v543_v43 = vmul.f32 %v4071_v9, %v542_v25  ;;  %v6032_v54 = vld [vmem:[#allocation16_spill] sm:$0xff] }
  0xf4   : > { %v3287_v56 = vpop.eup %3286  ;;  %v629_v48 = vsel %vm398_vm3, %v4028_v26, %v613_v37  ;;  %v614_v61 = vmul.f32 %v3980_v22, %v591_v49  ;;  %3290 = vlog2.f32 %v502_v29  ;;  %3039 = vmatmul.msk.f32.vlgmr.msrb.gmra.mxu1 %vm661_vm5, %v4168_v13  ;;  %v553_v63 = vand.u32 2147483647, %v4116_v21  ;;  %v3055_v37 = vld [vmem:[%s5989_s2 + $0x40] sm:$0xff]  ;;  %v6034_v49 = vld [vmem:[#allocation11_spill] sm:$0xff] }
  0xf5   : > { %744 = vmatpush.msrb.mxu2 %v629_v48  ;;  %v540_v38 = vmul.f32 0.6931472, %v3287_v56  ;;  %v511_v16 = vadd.f32 1.0, %v4048_v19  ;;  %vm394_vm8 = vcmp.gt.f32.partialorder %v3996_v46, 20.0  ;;  %vm545_vm9 = vcmp.lt.f32.partialorder %v544_v20, 0.0004427343 }
  0xf6   : > { %v630_v26 = vsel %vm399_vm7, %v4031_v27, %v614_v61  ;;  %v514_v45 = vmul.f32 -0.5, %v4048_v19  ;;  %v506_v36 = vadd.f32 1.0, %v505_v6  ;;  %v466_v9 = vadd.f32 1.0, %v4013_v62  ;;  %v6033_v20 = vld [vmem:[#allocation14_spill] sm:$0xff]  ;;  %v6035_v6 = vld [vmem:[#allocation9_spill] sm:$0xff] }
  0xf7   : > { %v3289_v18 = vpop.eup %3288  ;;  %773 = vmatpush.msrb.mxu3 %v630_v26  ;;  %v546_v24 = vsel %vm545_vm9, %v543_v43, %v540_v38  ;;  %3292 = vlog2.f32 %v511_v16  ;;  %v552_v17 = vmul.f32 %v4116_v21, %v551_v42  ;;  %v508_v47 = vand.u32 2147483647, %v4044_v30  ;;  %v6036_v42 = vld [vmem:[#allocation12_spill] sm:$0xff]  ;;  %v3080_v43 = vld [vmem:[%s5989_s2 + $0x68] sm:$0xff]  ;;  %v3105_v16 = vld [vmem:[%s5989_s2 + $0x90] sm:$0xff] }
  0xf8   : > { %v609_v0 = vmul.f32 %v3980_v22, %v546_v24  ;;  %v549_v10 = vmul.f32 0.6931472, %v3289_v18  ;;  %vm395_vm10 = vcmp.gt.f32.partialorder %v4008_v60, 20.0  ;;  %vm554_vm11 = vcmp.lt.f32.partialorder %v553_v63, 0.0004427343  ;;  %v3030_v63 = vld [vmem:[%s5988_s1 + $0x38] sm:$0xff] }
  0xf9   : > { %3294 = vlog2.f32 %v466_v9  ;;  %v469_v27 = vmul.f32 -0.5, %v4013_v62  ;;  %v515_v21 = vadd.f32 1.0, %v514_v45  ;;  %v475_v28 = vadd.f32 1.0, %v4024_v12  ;;  %1073 = vperm.xlu2 %3231, %v3058_v51   ;;  %v3127_v26 = vld [vmem:[%s5989_s2 + $0xa0] sm:$0xff] }
  0xfa   : > { %v3291_v7 = vpop.eup %3290  ;;  %v625_v14 = vsel %vm394_vm8, %v3985_v31, %v609_v0  ;;  %v555_v52 = vsel %vm554_vm11, %v552_v17, %v549_v10  ;;  %v507_v2 = vmul.f32 %v4044_v30, %v506_v36  ;;  %v517_v34 = vand.u32 2147483647, %v4048_v19  ;;  %v4282_v36 = vpop.permute.xlu0 %648 }
  0xfb   : > { %745 = vmatpush.msrb.mxu2 %v625_v14  ;;  %v610_v59 = vmul.f32 %v3980_v22, %v555_v52  ;;  %v504_v3 = vmul.f32 0.6931472, %v3291_v7  ;;  %vm509_vm12 = vcmp.lt.f32.partialorder %v508_v47, 0.0004427343  ;;  %v470_v46 = vadd.f32 1.0, %v469_v27  ;;  %3036 = vmatmul.msk.f32.gmra.mxu0 %vm661_vm5, %v4206_v44  ;;  %v644_v17 = vpop.permute.xlu1 %643 }
  0xfc   : > { %3296 = vlog2.f32 %v475_v28  ;;  %v478_v31 = vmul.f32 -0.5, %v4024_v12  ;;  %v472_v40 = vand.u32 2147483647, %v4013_v62  ;;  %3040 = vmatmul.msk.f32.gmra.mxu1 %vm661_vm5, %v4206_v44  ;;  %v516_v58 = vmul.f32 %v4048_v19, %v515_v21  ;;  %v3029_v19 = vld [vmem:[%s5988_s1 + $0x30] sm:$0xff] }
  0xfd   : > { %v3293_v11 = vpop.eup %3292  ;;  %v626_v1 = vsel %vm395_vm10, %v3987_v32, %v610_v59  ;;  %v510_v57 = vsel %vm509_vm12, %v507_v2, %v504_v3  ;;  %vm390_vm13 = vcmp.gt.f32.partialorder %v6030_v8, 20.0  ;;  %vm518_vm14 = vcmp.lt.f32.partialorder %v517_v34, 0.0004427343  ;;  %v6031_v32 = vld [vmem:[#allocation13_spill] sm:$0xff] }
  0xfe   : > { %774 = vmatpush.msrb.mxu3 %v626_v1  ;;  %v605_v30 = vmul.f32 %v3980_v22, %v510_v57  ;;  %v513_v5 = vmul.f32 0.6931472, %v3293_v11  ;;  %v479_v15 = vadd.f32 1.0, %v478_v31  ;;  %v481_v60 = vand.u32 2147483647, %v4024_v12 }
  0xff   : > { %v3295_v41 = vpop.eup %3294  ;;  %v471_v50 = vmul.f32 %v4013_v62, %v470_v46  ;;  %vm473_vm15 = vcmp.lt.f32.partialorder %v472_v40, 0.0004427343  ;;  %vm391_vm0 = vcmp.gt.f32.partialorder %v6032_v54, 20.0  ;;  %vm386_vm1 = vcmp.gt.f32.partialorder %v6034_v49, 20.0 }
 0x100   : > { %v621_v4 = vsel %vm390_vm13, %v6031_v32, %v605_v30  ;;  %v519_v55 = vsel %vm518_vm14, %v516_v58, %v513_v5  ;;  %v468_v23 = vmul.f32 0.6931472, %v3295_v41  ;;  %v480_v53 = vmul.f32 %v4024_v12, %v479_v15  ;;  %v6037_v12 = vld [vmem:[#allocation10_spill] sm:$0xff] }
 0x101   : > { %746 = vmatpush.msrb.mxu2 %v621_v4  ;;  %v606_v35 = vmul.f32 %v3980_v22, %v519_v55  ;;  %1058 = vperm.xlu2 %3231, %v3055_v37   ;;  %vm482_vm2 = vcmp.lt.f32.partialorder %v481_v60, 0.0004427343  ;;  %vm387_vm3 = vcmp.gt.f32.partialorder %v6036_v42, 20.0 }
 0x102   : > { %v3297_v33 = vpop.eup %3296  ;;  %v474_v25 = vsel %vm473_vm15, %v471_v50, %v468_v23 }
 0x103   : > { %v622_v29 = vsel %vm391_vm0, %v6033_v20, %v606_v35  ;;  %v601_v62 = vmul.f32 %v3980_v22, %v474_v25  ;;  %v477_v39 = vmul.f32 0.6931472, %v3297_v33  ;;  %3037 = vmatmul.msk.f32.gmra.mxu0 %vm661_vm5, %v3029_v19 }
 0x104   : > { %775 = vmatpush.msrb.mxu3 %v622_v29  ;;  %3041 = vmatmul.msk.f32.gmra.mxu1 %vm661_vm5, %v3029_v19 }
 0x105   : > { %v617_v56 = vsel %vm386_vm1, %v6035_v6, %v601_v62  ;;  %v483_v48 = vsel %vm482_vm2, %v480_v53, %v477_v39 }
 0x106   : > { %747 = vmatpush.msrb.mxu2 %v617_v56  ;;  %v602_v61 = vmul.f32 %v3980_v22, %v483_v48 }
 0x107   : > { %3043 = vmatmul.msk.f32.vlgmr.msrb.gmra.mxu2 %vm661_vm5, %v4168_v13 }
 0x108   : > { %v618_v38 = vsel %vm387_vm3, %v6037_v12, %v602_v61 }
 0x109   : > { %776 = vmatpush.msrb.mxu3 %v618_v38  ;;  %1477 = vperm.xlu2 %3231, %v3080_v43  }
 0x10a   : > { %3047 = vmatmul.msk.f32.vlgmr.msrb.gmra.mxu3 %vm661_vm5, %v4168_v13  ;;  %v3130_v13 = vld [vmem:[%s5989_s2 + $0xb8] sm:$0xff] }
 0x10b   : > { %3038 = vmatmul.msk.f32.gmra.mxu0 %vm661_vm5, %v3030_v63 }
 0x10c   : > { %3042 = vmatmul.msk.f32.gmra.mxu1 %vm661_vm5, %v3030_v63 }
 0x10f   : > { %3044 = vmatmul.msk.f32.gmra.mxu2 %vm661_vm5, %v4206_v44 }
 0x111   : > { %1947 = vperm.xlu2 %3231, %v3105_v16  }
 0x112   : > { %3048 = vmatmul.msk.f32.gmra.mxu3 %vm661_vm5, %v4206_v44 }
 0x117   : > { %3045 = vmatmul.msk.f32.gmra.mxu2 %vm661_vm5, %v3029_v19 }
 0x119   : > { %2366 = vperm.xlu2 %3231, %v3130_v13  }
 0x11a   : > { %3049 = vmatmul.msk.f32.gmra.mxu3 %vm661_vm5, %v3029_v19 }
 0x11f   : > { %3046 = vmatmul.msk.f32.gmra.mxu2 %vm661_vm5, %v3030_v63 }
 0x121   : > { %2351 = vperm.xlu2 %3231, %v3127_v26  }
 0x122   : > { %3050 = vmatmul.msk.f32.gmra.mxu3 %vm661_vm5, %v3030_v63 }
 0x143   : > { %v4280_v24 = vpop.permute.xlu2 %658 }
 0x14b   : > { %v4297_v14 = vpop.permute.xlu2 %653 }
 0x170   : > { %v691_v45 = vpop.f32.mrf.mxu0 }
 0x171   : > { %v720_v18 = vpop.f32.mrf.mxu1  ;;  %v4290_v27 = vadd.f32 %v691_v45, %v644_v17 }
 0x172   : > { %v4292_v44 = vadd.f32 %v720_v18, %v644_v17 }
 0x173   : > { %v4301_v28 = vmul.f32 100.0, %v4290_v27 }
 0x174   : > { %v4307_v3 = vmul.f32 100.0, %v4292_v44 }
 0x175   : > { %v822_v1 = vmin.f32 %v4301_v28, 20.0  ;;  %vm806_vm1 = vcmp.gt.f32.partialorder %v4301_v28, 20.0 }
 0x176   : > { %v823_v40 = vmin.f32 %v4307_v3, 20.0 }
 0x177   : > { %v838_v15 = vmul.f32 1.442695, %v822_v1 }
 0x178   : > { %v694_v9 = vpop.f32.mrf.mxu0  ;;  %v840_v55 = vmul.f32 1.442695, %v823_v40 }
 0x179   : > { %v4285_v0 = vadd.f32 %v694_v9, %v4282_v36  ;;  %v723_v10 = vpop.f32.mrf.mxu1 }
 0x17a   : > { %v4295_v7 = vadd.f32 %v723_v10, %v4282_v36 }
 0x17b   : > { %v4288_v47 = vmul.f32 100.0, %v4285_v0 }
 0x17c   : > { %v4313_v34 = vmul.f32 100.0, %v4295_v7 }
 0x17d   : > { %v826_v52 = vmin.f32 %v4288_v47, 20.0  ;;  %vm810_vm15 = vcmp.gt.f32.partialorder %v4288_v47, 20.0 }
 0x17e   : > { %v827_v5 = vmin.f32 %v4313_v34, 20.0  ;;  %vm811_vm0 = vcmp.gt.f32.partialorder %v4313_v34, 20.0 }
 0x17f   : > { %v846_v31 = vmul.f32 1.442695, %v826_v52 }
 0x180   : > { %v697_v21 = vpop.f32.mrf.mxu0  ;;  %v848_v35 = vmul.f32 1.442695, %v827_v5 }
 0x181   : > { %v4304_v51 = vadd.f32 %v697_v21, %v4297_v14  ;;  %v726_v59 = vpop.f32.mrf.mxu1  ;;  %3298 = vpow2.f32 %v846_v31 }
 0x182   : > { %v4310_v2 = vadd.f32 %v726_v59, %v4297_v14 }
 0x183   : > { %v4316_v46 = vmul.f32 100.0, %v4304_v51 }
 0x184   : > { %v4319_v11 = vmul.f32 100.0, %v4310_v2 }
 0x185   : > { %v830_v57 = vmin.f32 %v4316_v46, 20.0  ;;  %vm814_vm10 = vcmp.gt.f32.partialorder %v4316_v46, 20.0 }
 0x186   : > { %v831_v30 = vmin.f32 %v4319_v11, 20.0  ;;  %vm815_vm13 = vcmp.gt.f32.partialorder %v4319_v11, 20.0 }
 0x187   : > { %v854_v58 = vmul.f32 1.442695, %v830_v57  ;;  %v4346_v29 = vpop.eup %3298 }
 0x188   : > { %v856_v41 = vmul.f32 1.442695, %v831_v30  ;;  %v700_v8 = vpop.f32.mrf.mxu0  ;;  %v906_v45 = vadd.f32 1.0, %v4346_v29  ;;  %v909_v57 = vmul.f32 -0.5, %v4346_v29 }
 0x189   : > { %3300 = vpow2.f32 %v854_v58  ;;  %v4327_v32 = vadd.f32 %v700_v8, %v4280_v24  ;;  %v729_v4 = vpop.f32.mrf.mxu1 }
 0x18a   : > { %v749_v60 = vpop.f32.mrf.mxu2  ;;  %3302 = vpow2.f32 %v856_v41  ;;  %v4332_v50 = vadd.f32 %v729_v4, %v4280_v24 }
 0x18b   : > { %v4329_v23 = vadd.f32 %v749_v60, %v644_v17  ;;  %v4335_v19 = vmul.f32 100.0, %v4327_v32  ;;  %3304 = vpow2.f32 %v838_v15 }
 0x18c   : > { %v4341_v25 = vmul.f32 100.0, %v4332_v50  ;;  %3306 = vpow2.f32 %v840_v55 }
 0x18d   : > { %v4338_v33 = vmul.f32 100.0, %v4329_v23  ;;  %v778_v54 = vpop.f32.mrf.mxu3  ;;  %v834_v20 = vmin.f32 %v4335_v19, 20.0  ;;  %3308 = vpow2.f32 %v848_v35  ;;  %vm818_vm7 = vcmp.gt.f32.partialorder %v4335_v19, 20.0 }
 0x18e   : > { %v4343_v37 = vadd.f32 %v778_v54, %v644_v17  ;;  %v835_v39 = vmin.f32 %v4341_v25, 20.0  ;;  %v910_v54 = vadd.f32 1.0, %v909_v57  ;;  %vm819_vm11 = vcmp.gt.f32.partialorder %v4341_v25, 20.0 }
 0x18f   : > { %v824_v62 = vmin.f32 %v4338_v33, 20.0  ;;  %v3301_v53 = vpop.eup %3300  ;;  %v862_v6 = vmul.f32 1.442695, %v834_v20 }
 0x190   : > { %v4351_v49 = vmul.f32 100.0, %v4343_v37  ;;  %v3303_v56 = vpop.eup %3302  ;;  %v864_v61 = vmul.f32 1.442695, %v835_v39  ;;  %v942_v42 = vadd.f32 1.0, %v3301_v53  ;;  %v945_v12 = vmul.f32 -0.5, %v3301_v53 }
 0x191   : > { %v842_v48 = vmul.f32 1.442695, %v824_v62  ;;  %3310 = vpow2.f32 %v862_v6  ;;  %v951_v16 = vadd.f32 1.0, %v3303_v56  ;;  %v954_v13 = vmul.f32 -0.5, %v3303_v56  ;;  %v4357_v26 = vpop.eup %3304 }
 0x192   : > { %v825_v38 = vmin.f32 %v4351_v49, 20.0  ;;  %v752_v43 = vpop.f32.mrf.mxu2  ;;  %v4360_v18 = vpop.eup %3306  ;;  %v946_v17 = vadd.f32 1.0, %v945_v12  ;;  %v948_v52 = vand.u32 2147483647, %v3301_v53  ;;  %v957_v1 = vand.u32 2147483647, %v3303_v56 }
 0x193   : > { %3312 = vpow2.f32 %v842_v48  ;;  %v4355_v63 = vadd.f32 %v752_v43, %v4282_v36  ;;  %v4365_v21 = vpop.eup %3308  ;;  %v955_v30 = vadd.f32 1.0, %v954_v13  ;;  %v879_v47 = vadd.f32 1.0, %v4360_v18 }
 0x194   : > { %3314 = vpow2.f32 %v864_v61  ;;  %v844_v59 = vmul.f32 1.442695, %v825_v38  ;;  %v947_v15 = vmul.f32 %v3301_v53, %v946_v17  ;;  %vm4377_vm4 = vcmp.lt.f32.partialorder %v948_v52, 0.0004427343 }
 0x195   : > { %v4363_v9 = vmul.f32 100.0, %v4355_v63  ;;  %v781_v10 = vpop.f32.mrf.mxu3  ;;  %3316 = vlog2.f32 %v942_v42  ;;  %vm4381_vm6 = vcmp.lt.f32.partialorder %v957_v1, 0.0004427343  ;;  %v956_v6 = vmul.f32 %v3303_v56, %v955_v30 }
 0x196   : > { %v4368_v31 = vadd.f32 %v781_v10, %v4282_v36  ;;  %3318 = vlog2.f32 %v951_v16  ;;  %v912_v53 = vand.u32 2147483647, %v4346_v29  ;;  %v921_v35 = vand.u32 2147483647, %v4365_v21 }
 0x197   : > { %v828_v40 = vmin.f32 %v4363_v9, 20.0  ;;  %v3311_v5 = vpop.eup %3310  ;;  %3320 = vlog2.f32 %v906_v45  ;;  %v915_v45 = vadd.f32 1.0, %v4365_v21  ;;  %v882_v25 = vmul.f32 -0.5, %v4360_v18 }
 0x198   : > { %v4375_v41 = vmul.f32 100.0, %v4368_v31  ;;  %v978_v8 = vadd.f32 1.0, %v3311_v5  ;;  %3322 = vpow2.f32 %v844_v59  ;;  %v981_v55 = vmul.f32 -0.5, %v3311_v5 }
 0x199   : > { %v4372_v58 = vpop.eup %3312  ;;  %v850_v62 = vmul.f32 1.442695, %v828_v40  ;;  %v984_v48 = vand.u32 2147483647, %v3311_v5  ;;  %v911_v59 = vmul.f32 %v4346_v29, %v910_v54  ;;  %vm4409_vm9 = vcmp.lt.f32.partialorder %v912_v53, 0.0004427343 }
 0x19a   : > { %v3315_v36 = vpop.eup %3314  ;;  %v755_v4 = vpop.f32.mrf.mxu2  ;;  %3324 = vlog2.f32 %v978_v8  ;;  %v829_v38 = vmin.f32 %v4375_v41, 20.0  ;;  %v982_v56 = vadd.f32 1.0, %v981_v55  ;;  %vm922_vm14 = vcmp.lt.f32.partialorder %v921_v35, 0.0004427343 }
 0x19b   : > { %v3317_v20 = vpop.eup %3316  ;;  %v4386_v39 = vadd.f32 %v755_v4, %v4297_v14  ;;  %v987_v61 = vadd.f32 1.0, %v3315_v36  ;;  %v990_v42 = vmul.f32 -0.5, %v3315_v36  ;;  %v993_v52 = vand.u32 2147483647, %v3315_v36 }
 0x19c   : > { %v3319_v12 = vpop.eup %3318  ;;  %v944_v13 = vmul.f32 0.6931472, %v3317_v20  ;;  %vm4405_vm8 = vcmp.lt.f32.partialorder %v984_v48, 0.0004427343  ;;  %v852_v46 = vmul.f32 1.442695, %v829_v38 }
 0x19d   : > { %v4391_v43 = vmul.f32 100.0, %v4386_v39  ;;  %v784_v16 = vpop.f32.mrf.mxu3  ;;  %v3321_v10 = vpop.eup %3320  ;;  %3326 = vlog2.f32 %v987_v61  ;;  %v991_v57 = vadd.f32 1.0, %v990_v42  ;;  %v953_v40 = vmul.f32 0.6931472, %v3319_v12 }
 0x19e   : > { %v4395_v17 = vadd.f32 %v784_v16, %v4297_v14  ;;  %v4400_v30 = vpop.eup %3322  ;;  %3328 = vpow2.f32 %v850_v62  ;;  %v950_v55 = vsel %vm4377_vm4, %v947_v15, %v944_v13  ;;  %v908_v54 = vmul.f32 0.6931472, %v3321_v10 }
 0x19f   : > { %v832_v1 = vmin.f32 %v4391_v43, 20.0  ;;  %3330 = vlog2.f32 %v915_v45  ;;  %v983_v61 = vmul.f32 %v3311_v5, %v982_v56  ;;  %vm4418_vm12 = vcmp.lt.f32.partialorder %v993_v52, 0.0004427343 }
 0x1a0   : > { %v4403_v8 = vmul.f32 100.0, %v4395_v17  ;;  %v3325_v20 = vpop.eup %3324  ;;  %v918_v42 = vmul.f32 -0.5, %v4365_v21  ;;  %v992_v15 = vmul.f32 %v3315_v36, %v991_v57  ;;  %v959_v16 = vsel %vm4381_vm6, %v956_v6, %v953_v40 }
 0x1a1   : > { %v858_v29 = vmul.f32 1.442695, %v832_v1  ;;  %v980_v60 = vmul.f32 0.6931472, %v3325_v20  ;;  %v1022_v45 = vmul.f32 %v950_v55, %v3980_v22  ;;  %v914_v5 = vsel %vm4409_vm9, %v911_v59, %v908_v54 }
 0x1a2   : > { %v833_v62 = vmin.f32 %v4403_v8, 20.0  ;;  %v758_v48 = vpop.f32.mrf.mxu2  ;;  %v919_v10 = vadd.f32 1.0, %v918_v42  ;;  %v1023_v4 = vmul.f32 %v959_v16, %v3980_v22  ;;  %v1018_v54 = vmul.f32 %v914_v5, %v3980_v22 }
 0x1a3   : > { %v4424_v12 = vadd.f32 %v758_v48, %v4280_v24  ;;  %v3327_v56 = vpop.eup %3326  ;;  %3332 = vpow2.f32 %v858_v29  ;;  %v986_v36 = vsel %vm4405_vm8, %v983_v61, %v980_v60  ;;  %v870_v60 = vadd.f32 1.0, %v4357_v26 }
 0x1a4   : > { %v860_v13 = vmul.f32 1.442695, %v833_v62  ;;  %v4438_v6 = vpop.eup %3328  ;;  %v1026_v40 = vmul.f32 %v986_v36, %v3980_v22  ;;  %v989_v59 = vmul.f32 0.6931472, %v3327_v56  ;;  %v920_v14 = vmul.f32 %v4365_v21, %v919_v10 }
 0x1a5   : > { %v4433_v52 = vmul.f32 100.0, %v4424_v12  ;;  %v787_v1 = vpop.f32.mrf.mxu3  ;;  %v3331_v29 = vpop.eup %3330  ;;  %v1038_v16 = vsel %vm814_vm10, %v4304_v51, %v1022_v45  ;;  %v1034_v10 = vsel %vm810_vm15, %v4285_v0, %v1018_v54  ;;  %v876_v34 = vand.u32 2147483647, %v4357_v26 }
 0x1a6   : > { %v4441_v57 = vadd.f32 %v787_v1, %v4280_v24  ;;  %3334 = vpow2.f32 %v860_v13  ;;  %v1042_v24 = vsel %vm818_vm7, %v4327_v32, %v1026_v40  ;;  %v995_v62 = vsel %vm4418_vm12, %v992_v15, %v989_v59 }
 0x1a7   : > { %v836_v55 = vmin.f32 %v4433_v52, 20.0  ;;  %v917_v48 = vmul.f32 0.6931472, %v3331_v29  ;;  %1100 = vmatpush.msra.mxu0 %v1042_v24  ;;  %v1027_v42 = vmul.f32 %v995_v62, %v3980_v22  ;;  %v873_v32 = vmul.f32 -0.5, %v4357_v26  ;;  %v4539_v62 = vld [vmem:[%s5988_s1 + $0x48] sm:$0xff] }
 0x1a8   : > { %v4449_v20 = vmul.f32 100.0, %v4441_v57  ;;  %v885_v38 = vand.u32 2147483647, %v4360_v18  ;;  %v883_v11 = vadd.f32 1.0, %v882_v25  ;;  %vm877_vm2 = vcmp.lt.f32.partialorder %v876_v34, 0.0004427343 }
 0x1a9   : > { %v866_v61 = vmul.f32 1.442695, %v836_v55  ;;  %v923_v13 = vsel %vm922_vm14, %v920_v14, %v917_v48  ;;  %v3333_v19 = vpop.eup %3332  ;;  %v1043_v53 = vsel %vm819_vm11, %v4332_v50, %v1027_v42  ;;  %1101 = vmatpush.msra.mxu0 %v1038_v16  ;;  %v1039_v50 = vsel %vm815_vm13, %v4310_v2, %v1023_v4 }
 0x1aa   : > { %v837_v21 = vmin.f32 %v4449_v20, 20.0  ;;  %v1019_v15 = vmul.f32 %v923_v13, %v3980_v22  ;;  %1129 = vmatpush.msra.mxu1 %v1043_v53  ;;  %v874_v0 = vadd.f32 1.0, %v873_v32  ;;  %v960_v45 = vadd.f32 1.0, %v3333_v19 }
 0x1ab   : > { %3336 = vpow2.f32 %v866_v61  ;;  %1102 = vmatpush.msra.mxu0 %v1034_v10  ;;  %v963_v1 = vmul.f32 -0.5, %v3333_v19  ;;  %v966_v2 = vand.u32 2147483647, %v3333_v19  ;;  %v884_v24 = vmul.f32 %v4360_v18, %v883_v11 }
 0x1ac   : > { %v868_v5 = vmul.f32 1.442695, %v837_v21  ;;  %3338 = vlog2.f32 %v870_v60  ;;  %v4470_v51 = vpop.eup %3334  ;;  %1130 = vmatpush.msra.mxu1 %v1039_v50  ;;  %v1035_v56 = vsel %vm811_vm0, %v4295_v7, %v1019_v15  ;;  %v875_v55 = vmul.f32 %v4357_v26, %v874_v0 }
 0x1ad   : > { %v969_v36 = vadd.f32 1.0, %v4470_v51  ;;  %v964_v29 = vadd.f32 1.0, %v963_v1  ;;  %v972_v54 = vmul.f32 -0.5, %v4470_v51  ;;  %vm4487_vm3 = vcmp.lt.f32.partialorder %v885_v38, 0.0004427343 }
 0x1ae   : > { %3340 = vpow2.f32 %v868_v5  ;;  %1131 = vmatpush.msra.mxu1 %v1035_v56  ;;  %vm4491_vm4 = vcmp.lt.f32.partialorder %v966_v2, 0.0004427343  ;;  %vm820_vm6 = vcmp.gt.f32.partialorder %v4433_v52, 20.0  ;;  %v4502_v5 = vld [vmem:[%s5988_s1 + $0x40] sm:$0xff]  ;;  %v975_v50 = vand.u32 2147483647, %v4470_v51 }
 0x1af   : > { %3342 = vlog2.f32 %v879_v47  ;;  %v965_v18 = vmul.f32 %v3333_v19, %v964_v29  ;;  %v924_v34 = vadd.f32 1.0, %v4438_v6  ;;  %vm807_vm7 = vcmp.gt.f32.partialorder %v4307_v3, 20.0 }
 0x1b0   : > { %3344 = vlog2.f32 %v960_v45  ;;  %v927_v11 = vmul.f32 -0.5, %v4438_v6  ;;  %vm816_vm9 = vcmp.gt.f32.partialorder %v4391_v43, 20.0  ;;  %vm4522_vm10 = vcmp.lt.f32.partialorder %v975_v50, 0.0004427343 }
 0x1b1   : > { %v3337_v35 = vpop.eup %3336  ;;  %3346 = vpow2.f32 %v852_v46  ;;  %v973_v46 = vadd.f32 1.0, %v972_v54  ;;  %v930_v43 = vand.u32 2147483647, %v4438_v6  ;;  %vm821_vm11 = vcmp.gt.f32.partialorder %v4449_v20, 20.0 }
 0x1b2   : > { %v3339_v40 = vpop.eup %3338  ;;  %v996_v59 = vadd.f32 1.0, %v3337_v35  ;;  %v999_v4 = vmul.f32 -0.5, %v3337_v35  ;;  %3348 = vlog2.f32 %v969_v36  ;;  %v1002_v60 = vand.u32 2147483647, %v3337_v35 }
 0x1b3   : > { %v872_v7 = vmul.f32 0.6931472, %v3339_v40  ;;  %v974_v40 = vmul.f32 %v4470_v51, %v973_v46  ;;  %vm931_vm13 = vcmp.lt.f32.partialorder %v930_v43, 0.0004427343  ;;  %vm817_vm14 = vcmp.gt.f32.partialorder %v4403_v8, 20.0 }
 0x1b4   : > { %v3341_v14 = vpop.eup %3340  ;;  %3350 = vlog2.f32 %v996_v59  ;;  %v1000_v53 = vadd.f32 1.0, %v999_v4  ;;  %vm1003_vm8 = vcmp.lt.f32.partialorder %v1002_v60, 0.0004427343  ;;  %vm812_vm15 = vcmp.gt.f32.partialorder %v4363_v9, 20.0 }
 0x1b5   : > { %v3343_v61 = vpop.eup %3342  ;;  %v878_v42 = vsel %vm877_vm2, %v875_v55, %v872_v7  ;;  %v1005_v21 = vadd.f32 1.0, %v3341_v14  ;;  %v1008_v26 = vmul.f32 -0.5, %v3341_v14  ;;  %v1011_v28 = vand.u32 2147483647, %v3341_v14 }
 0x1b6   : > { %v3345_v16 = vpop.eup %3344  ;;  %v1014_v13 = vmul.f32 %v878_v42, %v3980_v22  ;;  %v881_v32 = vmul.f32 0.6931472, %v3343_v61  ;;  %v928_v7 = vadd.f32 1.0, %v927_v11  ;;  %v894_v8 = vand.u32 2147483647, %v4372_v58 }
 0x1b7   : > { %v4496_v15 = vpop.eup %3346  ;;  %3352 = vlog2.f32 %v1005_v21  ;;  %v962_v10 = vmul.f32 0.6931472, %v3345_v16  ;;  %v1009_v0 = vadd.f32 1.0, %v1008_v26  ;;  %vm1012_vm12 = vcmp.lt.f32.partialorder %v1011_v28, 0.0004427343 }
 0x1b8   : > { %v3349_v47 = vpop.eup %3348  ;;  %v1030_v25 = vsel %vm806_vm1, %v4290_v27, %v1014_v13  ;;  %v887_v19 = vsel %vm4487_vm3, %v884_v24, %v881_v32  ;;  %v1001_v27 = vmul.f32 %v3337_v35, %v1000_v53  ;;  %3354 = vlog2.f32 %v924_v34 }
 0x1b9   : > { %1103 = vmatpush.msra.mxu0 %v1030_v25  ;;  %v1015_v45 = vmul.f32 %v887_v19, %v3980_v22  ;;  %v968_v56 = vsel %vm4491_vm4, %v965_v18, %v962_v10  ;;  %v971_v38 = vmul.f32 0.6931472, %v3349_v47  ;;  %v1010_v59 = vmul.f32 %v3341_v14, %v1009_v0 }
 0x1ba   : > { %v3351_v1 = vpop.eup %3350  ;;  %3059 = vmatmul.msk.f32.vlgmr.msra.gmra.mxu0 %vm661_vm5, %v4502_v5  ;;  %v1024_v3 = vmul.f32 %v968_v56, %v3980_v22  ;;  %v933_v51 = vadd.f32 1.0, %v4496_v15  ;;  %v936_v14 = vmul.f32 -0.5, %v4496_v15  ;;  %v888_v21 = vadd.f32 1.0, %v4372_v58 }
 0x1bb   : > { %v1031_v2 = vsel %vm807_vm7, %v4292_v44, %v1015_v45  ;;  %v998_v36 = vmul.f32 0.6931472, %v3351_v1  ;;  %v977_v44 = vsel %vm4522_vm10, %v974_v40, %v971_v38  ;;  %v929_v16 = vmul.f32 %v4438_v6, %v928_v7 }
 0x1bc   : > { %1132 = vmatpush.msra.mxu1 %v1031_v2  ;;  %v1040_v24 = vsel %vm816_vm9, %v4386_v39, %v1024_v3  ;;  %3356 = vlog2.f32 %v933_v51  ;;  %v1025_v60 = vmul.f32 %v977_v44, %v3980_v22  ;;  %v891_v13 = vmul.f32 -0.5, %v4372_v58 }
 0x1bd   : > { %v3353_v35 = vpop.eup %3352  ;;  %3063 = vmatmul.msk.f32.vlgmr.msra.gmra.mxu1 %vm661_vm5, %v4502_v5  ;;  %v1004_v29 = vsel %vm1003_vm8, %v1001_v27, %v998_v36  ;;  %v937_v32 = vadd.f32 1.0, %v936_v14  ;;  %3358 = vlog2.f32 %v888_v21  ;;  %v939_v18 = vand.u32 2147483647, %v4496_v15  ;;  %v4602_v36 = vpop.permute.xlu1 %1063 }
 0x1be   : > { %v1028_v55 = vmul.f32 %v1004_v29, %v3980_v22  ;;  %v1007_v54 = vmul.f32 0.6931472, %v3353_v35  ;;  %v3355_v48 = vpop.eup %3354  ;;  %v900_v6 = vmul.f32 -0.5, %v4400_v30  ;;  %v1041_v50 = vsel %vm817_vm14, %v4395_v17, %v1025_v60  ;;  %v3053_v17 = vld [vmem:[%s5988_s1 + $0x50] sm:$0xff] }
 0x1bf   : > { %v926_v39 = vmul.f32 0.6931472, %v3355_v48  ;;  %v938_v25 = vmul.f32 %v4496_v15, %v937_v32  ;;  %vm940_vm0 = vcmp.lt.f32.partialorder %v939_v18, 0.0004427343  ;;  %v903_v9 = vand.u32 2147483647, %v4400_v30 }
 0x1c0   : > { %v1044_v61 = vsel %vm820_vm6, %v4424_v12, %v1028_v55  ;;  %v1013_v42 = vsel %vm1012_vm12, %v1010_v59, %v1007_v54  ;;  %v897_v12 = vadd.f32 1.0, %v4400_v30  ;;  %v901_v19 = vadd.f32 1.0, %v900_v6  ;;  %v4607_v59 = vpop.permute.xlu0 %1068 }
 0x1c1   : > { %1158 = vmatpush.msra.mxu2 %v1044_v61  ;;  %v1029_v26 = vmul.f32 %v1013_v42, %v3980_v22  ;;  %v932_v53 = vsel %vm931_vm13, %v929_v16, %v926_v39  ;;  %vm813_vm1 = vcmp.gt.f32.partialorder %v4375_v41, 20.0  ;;  %vm895_vm2 = vcmp.lt.f32.partialorder %v894_v8, 0.0004427343 }
 0x1c2   : > { %3060 = vmatmul.msk.f32.gmra.mxu0 %vm661_vm5, %v4539_v62  ;;  %v1020_v10 = vmul.f32 %v932_v53, %v3980_v22  ;;  %3360 = vlog2.f32 %v897_v12  ;;  %v3357_v46 = vpop.eup %3356  ;;  %v902_v28 = vmul.f32 %v4400_v30, %v901_v19  ;;  %vm904_vm3 = vcmp.lt.f32.partialorder %v903_v9, 0.0004427343 }
 0x1c3   : > { %v1045_v52 = vsel %vm821_vm11, %v4441_v57, %v1029_v26  ;;  %1159 = vmatpush.msra.mxu2 %v1040_v24  ;;  %v892_v57 = vadd.f32 1.0, %v891_v13  ;;  %v935_v47 = vmul.f32 0.6931472, %v3357_v46  ;;  %v3359_v0 = vpop.eup %3358  ;;  %vm808_vm4 = vcmp.gt.f32.partialorder %v4338_v33, 20.0 }
 0x1c4   : > { %1187 = vmatpush.msra.mxu3 %v1045_v52  ;;  %v1036_v20 = vsel %vm812_vm15, %v4355_v63, %v1020_v10  ;;  %v890_v56 = vmul.f32 0.6931472, %v3359_v0  ;;  %vm809_vm6 = vcmp.gt.f32.partialorder %v4351_v49, 20.0 }
 0x1c5   : > { %3064 = vmatmul.msk.f32.gmra.mxu1 %vm661_vm5, %v4539_v62  ;;  %1160 = vmatpush.msra.mxu2 %v1036_v20  ;;  %v941_v34 = vsel %vm940_vm0, %v938_v25, %v935_v47  ;;  %v893_v63 = vmul.f32 %v4372_v58, %v892_v57 }
 0x1c6   : > { %1188 = vmatpush.msra.mxu3 %v1041_v50  ;;  %v1021_v45 = vmul.f32 %v941_v34, %v3980_v22 }
 0x1c7   : > { %v896_v1 = vsel %vm895_vm2, %v893_v63, %v890_v56 }
 0x1c8   : > { %v3361_v38 = vpop.eup %3360  ;;  %v1037_v15 = vsel %vm813_vm1, %v4368_v31, %v1021_v45  ;;  %v1016_v11 = vmul.f32 %v896_v1, %v3980_v22  ;;  %v3054_v31 = vld [vmem:[%s5988_s1 + $0x58] sm:$0xff] }
 0x1c9   : > { %v899_v27 = vmul.f32 0.6931472, %v3361_v38  ;;  %1189 = vmatpush.msra.mxu3 %v1037_v15 }
 0x1ca   : > { %3061 = vmatmul.msk.f32.gmra.mxu0 %vm661_vm5, %v3053_v17  ;;  %v1032_v58 = vsel %vm808_vm4, %v4329_v23, %v1016_v11 }
 0x1cb   : > { %v905_v2 = vsel %vm904_vm3, %v902_v28, %v899_v27  ;;  %1161 = vmatpush.msra.mxu2 %v1032_v58 }
 0x1cc   : > { %v1017_v41 = vmul.f32 %v905_v2, %v3980_v22  ;;  %3067 = vmatmul.msk.f32.vlgmr.msra.gmra.mxu2 %vm661_vm5, %v4502_v5 }
 0x1cd   : > { %3065 = vmatmul.msk.f32.gmra.mxu1 %vm661_vm5, %v3053_v17 }
 0x1ce   : > { %v1033_v30 = vsel %vm809_vm6, %v4343_v37, %v1017_v41  ;;  %v4600_v37 = vpop.permute.xlu2 %1073 }
 0x1cf   : > { %1190 = vmatpush.msra.mxu3 %v1033_v30 }
 0x1d0   : > { %3071 = vmatmul.msk.f32.vlgmr.msra.gmra.mxu3 %vm661_vm5, %v4502_v5 }
 0x1d2   : > { %3062 = vmatmul.msk.f32.gmra.mxu0 %vm661_vm5, %v3054_v31 }
 0x1d4   : > { %3068 = vmatmul.msk.f32.gmra.mxu2 %vm661_vm5, %v4539_v62 }
 0x1d5   : > { %3066 = vmatmul.msk.f32.gmra.mxu1 %vm661_vm5, %v3054_v31 }
 0x1d6   : > { %v1059_v40 = vpop.permute.xlu2 %1058 }
 0x1d8   : > { %3072 = vmatmul.msk.f32.gmra.mxu3 %vm661_vm5, %v4539_v62 }
 0x1dc   : > { %3069 = vmatmul.msk.f32.gmra.mxu2 %vm661_vm5, %v3053_v17 }
 0x1e0   : > { %3073 = vmatmul.msk.f32.gmra.mxu3 %vm661_vm5, %v3053_v17 }
 0x1e4   : > { %3070 = vmatmul.msk.f32.gmra.mxu2 %vm661_vm5, %v3054_v31 }
 0x1e8   : > { %3074 = vmatmul.msk.f32.gmra.mxu3 %vm661_vm5, %v3054_v31 }
 0x237   : > { %v1105_v23 = vpop.f32.mrf.mxu0 }
 0x238   : > { %v4609_v4 = vadd.f32 %v1105_v23, %v1059_v40 }
 0x23a   : > { %v1134_v33 = vpop.f32.mrf.mxu1  ;;  %v4623_v54 = vmul.f32 100.0, %v4609_v4 }
 0x23b   : > { %v4617_v7 = vadd.f32 %v1134_v33, %v1059_v40 }
 0x23c   : > { %v1236_v60 = vmin.f32 %v4623_v54, 20.0  ;;  %vm1220_vm2 = vcmp.gt.f32.partialorder %v4623_v54, 20.0 }
 0x23d   : > { %v4637_v61 = vmul.f32 100.0, %v4617_v7 }
 0x23e   : > { %v1252_v18 = vmul.f32 1.442695, %v1236_v60 }
 0x23f   : > { %v1108_v49 = vpop.f32.mrf.mxu0  ;;  %v1237_v12 = vmin.f32 %v4637_v61, 20.0  ;;  %vm1221_vm6 = vcmp.gt.f32.partialorder %v4637_v61, 20.0 }
 0x240   : > { %v4605_v3 = vadd.f32 %v1108_v49, %v4602_v36 }
 0x241   : > { %v1254_v8 = vmul.f32 1.442695, %v1237_v12 }
 0x242   : > { %v1137_v5 = vpop.f32.mrf.mxu1  ;;  %v4612_v29 = vmul.f32 100.0, %v4605_v3 }
 0x243   : > { %v4630_v24 = vadd.f32 %v1137_v5, %v4602_v36 }
 0x244   : > { %v1240_v14 = vmin.f32 %v4612_v29, 20.0  ;;  %vm1224_vm15 = vcmp.gt.f32.partialorder %v4612_v29, 20.0 }
 0x245   : > { %v4642_v16 = vmul.f32 100.0, %v4630_v24 }
 0x246   : > { %v1260_v39 = vmul.f32 1.442695, %v1240_v14 }
 0x247   : > { %v1111_v35 = vpop.f32.mrf.mxu0  ;;  %v1241_v46 = vmin.f32 %v4642_v16, 20.0  ;;  %vm1225_vm3 = vcmp.gt.f32.partialorder %v4642_v16, 20.0 }
 0x248   : > { %v4615_v44 = vadd.f32 %v1111_v35, %v4607_v59 }
 0x249   : > { %v1262_v34 = vmul.f32 1.442695, %v1241_v46 }
 0x24a   : > { %v4620_v51 = vmul.f32 100.0, %v4615_v44  ;;  %v1140_v55 = vpop.f32.mrf.mxu1 }
 0x24b   : > { %v4626_v43 = vadd.f32 %v1140_v55, %v4607_v59 }
 0x24c   : > { %v1244_v62 = vmin.f32 %v4620_v51, 20.0  ;;  %vm1228_vm11 = vcmp.gt.f32.partialorder %v4620_v51, 20.0 }
 0x24d   : > { %v4634_v48 = vmul.f32 100.0, %v4626_v43 }
 0x24e   : > { %v1268_v42 = vmul.f32 1.442695, %v1244_v62 }
 0x24f   : > { %v1245_v21 = vmin.f32 %v4634_v48, 20.0  ;;  %v1114_v26 = vpop.f32.mrf.mxu0  ;;  %v1163_v6 = vpop.f32.mrf.mxu2  ;;  %vm1229_vm12 = vcmp.gt.f32.partialorder %v4634_v48, 20.0 }
 0x250   : > { %3362 = vpow2.f32 %v1268_v42  ;;  %v4645_v13 = vadd.f32 %v1114_v26, %v4600_v37  ;;  %v4656_v57 = vadd.f32 %v1163_v6, %v1059_v40 }
 0x251   : > { %v1270_v32 = vmul.f32 1.442695, %v1245_v21 }
 0x252   : > { %v4649_v52 = vmul.f32 100.0, %v4645_v13  ;;  %v1143_v53 = vpop.f32.mrf.mxu1  ;;  %v4663_v45 = vmul.f32 100.0, %v4656_v57 }
 0x253   : > { %3364 = vpow2.f32 %v1270_v32  ;;  %v4652_v10 = vadd.f32 %v1143_v53, %v4600_v37  ;;  %v1192_v20 = vpop.f32.mrf.mxu3 }
 0x254   : > { %3366 = vpow2.f32 %v1260_v39  ;;  %v1248_v50 = vmin.f32 %v4649_v52, 20.0  ;;  %v1238_v2 = vmin.f32 %v4663_v45, 20.0  ;;  %v4673_v58 = vadd.f32 %v1192_v20, %v1059_v40 }
 0x255   : > { %v4659_v47 = vmul.f32 100.0, %v4652_v10  ;;  %3368 = vpow2.f32 %v1252_v18  ;;  %vm1232_vm9 = vcmp.gt.f32.partialorder %v4649_v52, 20.0 }
 0x256   : > { %v3363_v25 = vpop.eup %3362  ;;  %v1276_v19 = vmul.f32 1.442695, %v1248_v50  ;;  %v4687_v32 = vmul.f32 100.0, %v4673_v58 }
 0x257   : > { %v1249_v17 = vmin.f32 %v4659_v47, 20.0  ;;  %v1356_v0 = vadd.f32 1.0, %v3363_v25  ;;  %v1166_v15 = vpop.f32.mrf.mxu2  ;;  %v1359_v1 = vmul.f32 -0.5, %v3363_v25  ;;  %v1362_v49 = vand.u32 2147483647, %v3363_v25 }
 0x258   : > { %3370 = vpow2.f32 %v1276_v19  ;;  %v4668_v27 = vadd.f32 %v1166_v15, %v4602_v36  ;;  %vm1233_vm13 = vcmp.gt.f32.partialorder %v4659_v47, 20.0 }
 0x259   : > { %v3365_v9 = vpop.eup %3364  ;;  %v1278_v56 = vmul.f32 1.442695, %v1249_v17  ;;  %3372 = vlog2.f32 %v1356_v0  ;;  %v1360_v62 = vadd.f32 1.0, %v1359_v1  ;;  %vm4694_vm7 = vcmp.lt.f32.partialorder %v1362_v49, 0.0004427343 }
 0x25a   : > { %v4665_v63 = vpop.eup %3366  ;;  %3374 = vpow2.f32 %v1254_v8  ;;  %v1365_v38 = vadd.f32 1.0, %v3365_v9  ;;  %v1368_v28 = vmul.f32 -0.5, %v3365_v9  ;;  %v4677_v23 = vmul.f32 100.0, %v4668_v27 }
 0x25b   : > { %3376 = vpow2.f32 %v1278_v56  ;;  %v4670_v11 = vpop.eup %3368  ;;  %v1195_v41 = vpop.f32.mrf.mxu3  ;;  %v1320_v31 = vadd.f32 1.0, %v4665_v63  ;;  %v1323_v5 = vmul.f32 -0.5, %v4665_v63  ;;  %v1371_v40 = vand.u32 2147483647, %v3365_v9 }
 0x25c   : > { %3378 = vpow2.f32 %v1262_v34  ;;  %v4680_v33 = vadd.f32 %v1195_v41, %v4602_v36  ;;  %v1242_v60 = vmin.f32 %v4677_v23, 20.0  ;;  %v1369_v26 = vadd.f32 1.0, %v1368_v28 }
 0x25d   : > { %3380 = vlog2.f32 %v1365_v38  ;;  %v1324_v50 = vadd.f32 1.0, %v1323_v5  ;;  %v1361_v0 = vmul.f32 %v3363_v25, %v1360_v62  ;;  %vm4698_vm8 = vcmp.lt.f32.partialorder %v1371_v40, 0.0004427343 }
 0x25e   : > { %v3371_v30 = vpop.eup %3370  ;;  %3382 = vlog2.f32 %v1320_v31  ;;  %v4690_v36 = vmul.f32 100.0, %v4680_v33  ;;  %v1264_v8 = vmul.f32 1.442695, %v1242_v60  ;;  %v1370_v1 = vmul.f32 %v3365_v9, %v1369_v26 }
 0x25f   : > { %v3373_v35 = vpop.eup %3372  ;;  %v1392_v55 = vadd.f32 1.0, %v3371_v30  ;;  %v1395_v14 = vmul.f32 -0.5, %v3371_v30  ;;  %v1398_v21 = vand.u32 2147483647, %v3371_v30  ;;  %v1169_v19 = vpop.f32.mrf.mxu2  ;;  %v1326_v40 = vand.u32 2147483647, %v4665_v63 }
 0x260   : > { %v4683_v42 = vpop.eup %3374  ;;  %v1358_v6 = vmul.f32 0.6931472, %v3373_v35  ;;  %v4704_v56 = vadd.f32 %v1169_v19, %v4607_v59  ;;  %v1243_v28 = vmin.f32 %v4690_v36, 20.0 }
 0x261   : > { %v3377_v39 = vpop.eup %3376  ;;  %3384 = vlog2.f32 %v1392_v55  ;;  %v1396_v12 = vadd.f32 1.0, %v1395_v14  ;;  %vm4706_vm10 = vcmp.lt.f32.partialorder %v1398_v21, 0.0004427343  ;;  %v1325_v14 = vmul.f32 %v4665_v63, %v1324_v50 }
 0x262   : > { %v4692_v53 = vpop.eup %3378  ;;  %v1401_v18 = vadd.f32 1.0, %v3377_v39  ;;  %v1404_v17 = vmul.f32 -0.5, %v3377_v39  ;;  %v1407_v15 = vand.u32 2147483647, %v3377_v39  ;;  %v4713_v5 = vmul.f32 100.0, %v4704_v56 }
 0x263   : > { %v3381_v20 = vpop.eup %3380  ;;  %v1198_v25 = vpop.f32.mrf.mxu3  ;;  %v1397_v41 = vmul.f32 %v3371_v30, %v1396_v12  ;;  %v1364_v55 = vsel %vm4694_vm7, %v1361_v0, %v1358_v6  ;;  %vm4736_vm0 = vcmp.lt.f32.partialorder %v1326_v40, 0.0004427343  ;;  %v1329_v6 = vadd.f32 1.0, %v4692_v53 }
 0x264   : > { %3386 = vlog2.f32 %v1401_v18  ;;  %v1367_v31 = vmul.f32 0.6931472, %v3381_v20  ;;  %v3383_v49 = vpop.eup %3382  ;;  %v4716_v35 = vadd.f32 %v1198_v25, %v4607_v59  ;;  %v1405_v9 = vadd.f32 1.0, %v1404_v17 }
 0x265   : > { %3388 = vpow2.f32 %v1264_v8  ;;  %v1322_v30 = vmul.f32 0.6931472, %v3383_v49  ;;  %v1246_v60 = vmin.f32 %v4713_v5, 20.0  ;;  %vm4728_vm14 = vcmp.lt.f32.partialorder %v1407_v15, 0.0004427343 }
 0x266   : > { %v4726_v59 = vmul.f32 100.0, %v4716_v35  ;;  %v1436_v12 = vmul.f32 %v1364_v55, %v3980_v22  ;;  %v1373_v18 = vsel %vm4698_vm8, %v1370_v1, %v1367_v31  ;;  %v1332_v8 = vmul.f32 -0.5, %v4692_v53 }
 0x267   : > { %v3385_v62 = vpop.eup %3384  ;;  %v1272_v46 = vmul.f32 1.442695, %v1246_v60  ;;  %v1172_v17 = vpop.f32.mrf.mxu2  ;;  %v1406_v34 = vmul.f32 %v3377_v39, %v1405_v9  ;;  %v1328_v15 = vsel %vm4736_vm0, %v1325_v14, %v1322_v30  ;;  %3390 = vlog2.f32 %v1329_v6 }
 0x268   : > { %v1394_v21 = vmul.f32 0.6931472, %v3385_v62  ;;  %v1247_v50 = vmin.f32 %v4726_v59, 20.0  ;;  %v4749_v25 = vadd.f32 %v1172_v17, %v4600_v37  ;;  %v1437_v49 = vmul.f32 %v1373_v18, %v3980_v22 }
 0x269   : > { %3392 = vpow2.f32 %v1272_v46  ;;  %v1452_v39 = vsel %vm1228_vm11, %v4615_v44, %v1436_v12  ;;  %v1432_v14 = vmul.f32 %v1328_v15, %v3980_v22  ;;  %v1333_v40 = vadd.f32 1.0, %v1332_v8 }
 0x26a   : > { %v1400_v20 = vsel %vm4706_vm10, %v1397_v41, %v1394_v21  ;;  %v3387_v19 = vpop.eup %3386  ;;  %v1274_v1 = vmul.f32 1.442695, %v1247_v50  ;;  %v4762_v62 = vmul.f32 100.0, %v4749_v25  ;;  %v1335_v52 = vand.u32 2147483647, %v4692_v53 }
 0x26b   : > { %v1440_v0 = vmul.f32 %v1400_v20, %v3980_v22  ;;  %v1403_v31 = vmul.f32 0.6931472, %v3387_v19  ;;  %v4752_v38 = vpop.eup %3388  ;;  %v1201_v41 = vpop.f32.mrf.mxu3  ;;  %v1284_v44 = vadd.f32 1.0, %v4670_v11  ;;  %v1287_v21 = vmul.f32 -0.5, %v4670_v11 }
 0x26c   : > { %v4765_v9 = vadd.f32 %v1201_v41, %v4600_v37  ;;  %3394 = vpow2.f32 %v1274_v1  ;;  %v1250_v51 = vmin.f32 %v4762_v62, 20.0  ;;  %v1453_v37 = vsel %vm1229_vm12, %v4626_v43, %v1437_v49 }
 0x26d   : > { %v1456_v55 = vsel %vm1232_vm9, %v4645_v13, %v1440_v0  ;;  %v1409_v30 = vsel %vm4728_vm14, %v1406_v34, %v1403_v31  ;;  %v3391_v26 = vpop.eup %3390  ;;  %v1448_v18 = vsel %vm1224_vm15, %v4605_v3, %v1432_v14  ;;  %3396 = vlog2.f32 %v1284_v44 }
 0x26e   : > { %1514 = vmatpush.msrb.mxu0 %v1456_v55  ;;  %v1441_v13 = vmul.f32 %v1409_v30, %v3980_v22  ;;  %v4774_v60 = vmul.f32 100.0, %v4765_v9  ;;  %v1293_v63 = vadd.f32 1.0, %v4683_v42  ;;  %v1280_v6 = vmul.f32 1.442695, %v1250_v51 }
 0x26f   : > { %v1331_v43 = vmul.f32 0.6931472, %v3391_v26  ;;  %v1334_v48 = vmul.f32 %v4692_v53, %v1333_v40  ;;  %v4789_v50 = vpop.eup %3392  ;;  %vm1336_vm1 = vcmp.lt.f32.partialorder %v1335_v52, 0.0004427343  ;;  %v1288_v47 = vadd.f32 1.0, %v1287_v21 }
 0x270   : > { %1515 = vmatpush.msrb.mxu0 %v1452_v39  ;;  %v1457_v12 = vsel %vm1233_vm13, %v4652_v10, %v1441_v13  ;;  %v1251_v46 = vmin.f32 %v4774_v60, 20.0  ;;  %3398 = vlog2.f32 %v1293_v63  ;;  %v1296_v10 = vmul.f32 -0.5, %v4683_v42 }
 0x271   : > { %1543 = vmatpush.msrb.mxu1 %v1457_v12  ;;  %3400 = vpow2.f32 %v1280_v6  ;;  %v1337_v29 = vsel %vm1336_vm1, %v1334_v48, %v1331_v43  ;;  %v1239_v8 = vmin.f32 %v4687_v32, 20.0  ;;  %v1266_v53 = vmul.f32 1.442695, %v1243_v28 }
 0x272   : > { %1516 = vmatpush.msrb.mxu0 %v1448_v18  ;;  %v1282_v3 = vmul.f32 1.442695, %v1251_v46  ;;  %v4793_v20 = vpop.eup %3394  ;;  %v1433_v19 = vmul.f32 %v1337_v29, %v3980_v22  ;;  %v1290_v17 = vand.u32 2147483647, %v4670_v11  ;;  %v1297_v0 = vadd.f32 1.0, %v1296_v10 }
 0x273   : > { %1544 = vmatpush.msrb.mxu1 %v1453_v37  ;;  %v1374_v34 = vadd.f32 1.0, %v4789_v50  ;;  %v3397_v15 = vpop.eup %3396  ;;  %v1256_v1 = vmul.f32 1.442695, %v1238_v2  ;;  %v1289_v49 = vmul.f32 %v4670_v11, %v1288_v47  ;;  %v1299_v28 = vand.u32 2147483647, %v4683_v42  ;;  %v4815_v37 = vld [vmem:[%s5988_s1 + $0x60] sm:$0xff] }
 0x274   : > { %3402 = vpow2.f32 %v1282_v3  ;;  %v1449_v31 = vsel %vm1225_vm3, %v4630_v24, %v1433_v19  ;;  %v1286_v41 = vmul.f32 0.6931472, %v3397_v15  ;;  %v1377_v55 = vmul.f32 -0.5, %v4789_v50 }
 0x275   : > { %1545 = vmatpush.msrb.mxu1 %v1449_v31  ;;  %3404 = vlog2.f32 %v1374_v34  ;;  %v1383_v16 = vadd.f32 1.0, %v4793_v20  ;;  %v1258_v14 = vmul.f32 1.442695, %v1239_v8  ;;  %vm1291_vm4 = vcmp.lt.f32.partialorder %v1290_v17, 0.0004427343 }
 0x276   : > { %v3399_v39 = vpop.eup %3398  ;;  %3406 = vpow2.f32 %v1266_v53  ;;  %v1292_v30 = vsel %vm1291_vm4, %v1289_v49, %v1286_v41  ;;  %v1298_v11 = vmul.f32 %v4683_v42, %v1297_v0  ;;  %vm1300_vm7 = vcmp.lt.f32.partialorder %v1299_v28, 0.0004427343  ;;  %v4856_v41 = vld [vmem:[%s5988_s1 + $0x68] sm:$0xff] }
 0x277   : > { %v3401_v2 = vpop.eup %3400  ;;  %v1295_v24 = vmul.f32 0.6931472, %v3399_v39  ;;  %3408 = vlog2.f32 %v1383_v16  ;;  %v1428_v40 = vmul.f32 %v1292_v30, %v3980_v22  ;;  %v1378_v21 = vadd.f32 1.0, %v1377_v55 }
 0x278   : > { %v1410_v13 = vadd.f32 1.0, %v3401_v2  ;;  %v1413_v52 = vmul.f32 -0.5, %v3401_v2  ;;  %3410 = vpow2.f32 %v1256_v1  ;;  %v1386_v26 = vmul.f32 -0.5, %v4793_v20 }
 0x279   : > { %v1301_v51 = vsel %vm1300_vm7, %v1298_v11, %v1295_v24  ;;  %v1444_v42 = vsel %vm1220_vm2, %v4609_v4, %v1428_v40  ;;  %v1338_v18 = vadd.f32 1.0, %v4752_v38  ;;  %v1380_v43 = vand.u32 2147483647, %v4789_v50 }
 0x27a   : > { %v3403_v44 = vpop.eup %3402  ;;  %v1429_v12 = vmul.f32 %v1301_v51, %v3980_v22  ;;  %3412 = vlog2.f32 %v1410_v13  ;;  %1517 = vmatpush.msrb.mxu0 %v1444_v42  ;;  %v1389_v48 = vand.u32 2147483647, %v4793_v20  ;;  %v1414_v54 = vadd.f32 1.0, %v1413_v52 }
 0x27b   : > { %v3405_v63 = vpop.eup %3404  ;;  %v1419_v6 = vadd.f32 1.0, %v3403_v44  ;;  %v1422_v46 = vmul.f32 -0.5, %v3403_v44  ;;  %3414 = vpow2.f32 %v1258_v14  ;;  %3083 = vmatmul.msk.f32.vlgmr.msrb.gmra.mxu0 %vm661_vm5, %v4815_v37  ;;  %vm1234_vm8 = vcmp.gt.f32.partialorder %v4762_v62, 20.0 }
 0x27c   : > { %v4825_v47 = vpop.eup %3406  ;;  %v1445_v4 = vsel %vm1221_vm6, %v4617_v7, %v1429_v12  ;;  %v1376_v10 = vmul.f32 0.6931472, %v3405_v63  ;;  %v1379_v29 = vmul.f32 %v4789_v50, %v1378_v21  ;;  %v1387_v8 = vadd.f32 1.0, %v1386_v26 }
 0x27d   : > { %v3409_v3 = vpop.eup %3408  ;;  %1546 = vmatpush.msrb.mxu1 %v1445_v4  ;;  %3416 = vlog2.f32 %v1419_v6  ;;  %v1341_v53 = vmul.f32 -0.5, %v4752_v38  ;;  %v1416_v61 = vand.u32 2147483647, %v3401_v2  ;;  %v1423_v7 = vadd.f32 1.0, %v1422_v46 }
 0x27e   : > { %3087 = vmatmul.msk.f32.vlgmr.msrb.gmra.mxu1 %vm661_vm5, %v4815_v37  ;;  %v1425_v19 = vand.u32 2147483647, %v3403_v44  ;;  %vm1230_vm9 = vcmp.gt.f32.partialorder %v4713_v5, 20.0  ;;  %3418 = vlog2.f32 %v1338_v18  ;;  %v4838_v17 = vpop.eup %3410  ;;  %vm4840_vm10 = vcmp.lt.f32.partialorder %v1380_v43, 0.0004427343  ;;  %v3077_v5 = vld [vmem:[%s5988_s1 + $0x70] sm:$0xff] }
 0x27f   : > { %v1385_v34 = vmul.f32 0.6931472, %v3409_v3  ;;  %vm4844_vm11 = vcmp.lt.f32.partialorder %v1389_v48, 0.0004427343  ;;  %vm1235_vm12 = vcmp.gt.f32.partialorder %v4774_v60, 20.0  ;;  %v1415_v1 = vmul.f32 %v3401_v2, %v1414_v54 }
 0x280   : > { %v3413_v15 = vpop.eup %3412  ;;  %v1382_v31 = vsel %vm4840_vm10, %v1379_v29, %v1376_v10  ;;  %v1344_v49 = vand.u32 2147483647, %v4752_v38  ;;  %v1347_v28 = vadd.f32 1.0, %v4825_v47  ;;  %v1388_v16 = vmul.f32 %v4793_v20, %v1387_v8 }
 0x281   : > { %v1412_v55 = vmul.f32 0.6931472, %v3413_v15  ;;  %vm1226_vm13 = vcmp.gt.f32.partialorder %v4677_v23, 20.0  ;;  %v1342_v39 = vadd.f32 1.0, %v1341_v53  ;;  %v1350_v14 = vmul.f32 -0.5, %v4825_v47  ;;  %v4861_v2 = vpop.eup %3414 }
 0x282   : > { %vm1417_vm14 = vcmp.lt.f32.partialorder %v1416_v61, 0.0004427343  ;;  %v1424_v30 = vmul.f32 %v3403_v44, %v1423_v7  ;;  %vm4863_vm15 = vcmp.lt.f32.partialorder %v1425_v19, 0.0004427343  ;;  %3420 = vlog2.f32 %v1347_v28 }
 0x283   : > { %v3417_v11 = vpop.eup %3416  ;;  %v1418_v40 = vsel %vm1417_vm14, %v1415_v1, %v1412_v55  ;;  %v1438_v13 = vmul.f32 %v1382_v31, %v3980_v22  ;;  %v1391_v20 = vsel %vm4844_vm11, %v1388_v16, %v1385_v34  ;;  %v1302_v52 = vadd.f32 1.0, %v4838_v17  ;;  %3084 = vmatmul.msk.f32.gmra.mxu0 %vm661_vm5, %v4856_v41 }
 0x284   : > { %v3419_v51 = vpop.eup %3418  ;;  %v1442_v44 = vmul.f32 %v1418_v40, %v3980_v22  ;;  %v1421_v21 = vmul.f32 0.6931472, %v3417_v11  ;;  %vm4874_vm0 = vcmp.lt.f32.partialorder %v1344_v49, 0.0004427343  ;;  %v1305_v42 = vmul.f32 -0.5, %v4838_v17 }
 0x285   : > { %v1340_v12 = vmul.f32 0.6931472, %v3419_v51  ;;  %v1343_v18 = vmul.f32 %v4752_v38, %v1342_v39  ;;  %v1351_v63 = vadd.f32 1.0, %v1350_v14  ;;  %3422 = vlog2.f32 %v1302_v52 }
 0x286   : > { %3088 = vmatmul.msk.f32.gmra.mxu1 %vm661_vm5, %v4856_v41  ;;  %v1458_v6 = vsel %vm1234_vm8, %v4749_v25, %v1442_v44  ;;  %v1427_v46 = vsel %vm4863_vm15, %v1424_v30, %v1421_v21  ;;  %v1353_v43 = vand.u32 2147483647, %v4825_v47  ;;  %v1311_v48 = vadd.f32 1.0, %v4861_v2  ;;  %v4960_v30 = vpop.permute.xlu2 %1477 }
 0x287   : > { %1572 = vmatpush.msrb.mxu2 %v1458_v6  ;;  %v1443_v4 = vmul.f32 %v1427_v46, %v3980_v22  ;;  %v1454_v38 = vsel %vm1230_vm9, %v4704_v56, %v1438_v13  ;;  %v1439_v54 = vmul.f32 %v1391_v20, %v3980_v22  ;;  %v1346_v62 = vsel %vm4874_vm0, %v1343_v18, %v1340_v12  ;;  %v4976_v12 = vpop.permute.xlu1 %1482 }
 0x288   : > { %v3421_v25 = vpop.eup %3420  ;;  %v1434_v10 = vmul.f32 %v1346_v62, %v3980_v22  ;;  %v1306_v3 = vadd.f32 1.0, %v1305_v42  ;;  %3424 = vlog2.f32 %v1311_v48  ;;  %v1314_v29 = vmul.f32 -0.5, %v4861_v2 }
 0x289   : > { %v1459_v8 = vsel %vm1235_vm12, %v4765_v9, %v1443_v4  ;;  %1573 = vmatpush.msrb.mxu2 %v1454_v38  ;;  %v1349_v53 = vmul.f32 0.6931472, %v3421_v25  ;;  %v1352_v56 = vmul.f32 %v4825_v47, %v1351_v63  ;;  %v1308_v61 = vand.u32 2147483647, %v4838_v17 }
 0x28a   : > { %1601 = vmatpush.msrb.mxu3 %v1459_v8  ;;  %vm1231_vm1 = vcmp.gt.f32.partialorder %v4726_v59, 20.0  ;;  %v1450_v7 = vsel %vm1226_vm13, %v4668_v27, %v1434_v10  ;;  %vm1354_vm2 = vcmp.lt.f32.partialorder %v1353_v43, 0.0004427343  ;;  %v1315_v47 = vadd.f32 1.0, %v1314_v29 }
 0x28b   : > { %v3423_v60 = vpop.eup %3422  ;;  %v1455_v9 = vsel %vm1231_vm1, %v4716_v35, %v1439_v54  ;;  %1574 = vmatpush.msrb.mxu2 %v1450_v7  ;;  %v1355_v19 = vsel %vm1354_vm2, %v1352_v56, %v1349_v53  ;;  %3085 = vmatmul.msk.f32.gmra.mxu0 %vm661_vm5, %v3077_v5  ;;  %v1307_v50 = vmul.f32 %v4838_v17, %v1306_v3  ;;  %v1317_v59 = vand.u32 2147483647, %v4861_v2 }
 0x28c   : > { %1602 = vmatpush.msrb.mxu3 %v1455_v9  ;;  %v1435_v0 = vmul.f32 %v1355_v19, %v3980_v22  ;;  %v1304_v34 = vmul.f32 0.6931472, %v3423_v60  ;;  %vm1227_vm3 = vcmp.gt.f32.partialorder %v4690_v36, 20.0  ;;  %vm1309_vm4 = vcmp.lt.f32.partialorder %v1308_v61, 0.0004427343  ;;  %v3078_v36 = vld [vmem:[%s5988_s1 + $0x78] sm:$0xff] }
 0x28d   : > { %v1316_v31 = vmul.f32 %v4861_v2, %v1315_v47  ;;  %vm1222_vm6 = vcmp.gt.f32.partialorder %v4663_v45, 20.0  ;;  %vm1318_vm7 = vcmp.lt.f32.partialorder %v1317_v59, 0.0004427343  ;;  %vm1223_vm8 = vcmp.gt.f32.partialorder %v4687_v32, 20.0 }
 0x28e   : > { %v3425_v27 = vpop.eup %3424  ;;  %v1451_v23 = vsel %vm1227_vm3, %v4680_v33, %v1435_v0  ;;  %3089 = vmatmul.msk.f32.gmra.mxu1 %vm661_vm5, %v3077_v5  ;;  %v1310_v35 = vsel %vm1309_vm4, %v1307_v50, %v1304_v34 }
 0x28f   : > { %1603 = vmatpush.msrb.mxu3 %v1451_v23  ;;  %v1430_v15 = vmul.f32 %v1310_v35, %v3980_v22  ;;  %v1313_v1 = vmul.f32 0.6931472, %v3425_v27 }
 0x291   : > { %v1446_v17 = vsel %vm1222_vm6, %v4656_v57, %v1430_v15  ;;  %v1319_v49 = vsel %vm1318_vm7, %v1316_v31, %v1313_v1  ;;  %v4942_v57 = vpop.permute.xlu0 %1487 }
 0x292   : > { %1575 = vmatpush.msrb.mxu2 %v1446_v17  ;;  %v1431_v33 = vmul.f32 %v1319_v49, %v3980_v22 }
 0x293   : > { %3091 = vmatmul.msk.f32.vlgmr.msrb.gmra.mxu2 %vm661_vm5, %v4815_v37  ;;  %3086 = vmatmul.msk.f32.gmra.mxu0 %vm661_vm5, %v3078_v36 }
 0x294   : > { %v1447_v28 = vsel %vm1223_vm8, %v4673_v58, %v1431_v33 }
 0x295   : > { %1604 = vmatpush.msrb.mxu3 %v1447_v28 }
 0x296   : > { %3095 = vmatmul.msk.f32.vlgmr.msrb.gmra.mxu3 %vm661_vm5, %v4815_v37  ;;  %3090 = vmatmul.msk.f32.gmra.mxu1 %vm661_vm5, %v3078_v36 }
 0x299   : > { %v4944_v45 = vpop.permute.xlu0 %1472 }
 0x29b   : > { %3092 = vmatmul.msk.f32.gmra.mxu2 %vm661_vm5, %v4856_v41 }
 0x29e   : > { %3096 = vmatmul.msk.f32.gmra.mxu3 %vm661_vm5, %v4856_v41 }
 0x2a3   : > { %3093 = vmatmul.msk.f32.gmra.mxu2 %vm661_vm5, %v3077_v5 }
 0x2a6   : > { %3097 = vmatmul.msk.f32.gmra.mxu3 %vm661_vm5, %v3077_v5 }
 0x2ab   : > { %3094 = vmatmul.msk.f32.gmra.mxu2 %vm661_vm5, %v3078_v36 }
 0x2ae   : > { %3098 = vmatmul.msk.f32.gmra.mxu3 %vm661_vm5, %v3078_v36 }
 0x2f8   : > { %v1519_v58 = vpop.f32.mrf.mxu0 }
 0x2f9   : > { %v4947_v32 = vadd.f32 %v1519_v58, %v4944_v45 }
 0x2fb   : > { %v1548_v37 = vpop.f32.mrf.mxu1  ;;  %v4950_v55 = vmul.f32 100.0, %v4947_v32 }
 0x2fc   : > { %v4953_v41 = vadd.f32 %v1548_v37, %v4944_v45 }
 0x2fd   : > { %v1650_v16 = vmin.f32 %v4950_v55, 20.0  ;;  %vm1634_vm11 = vcmp.gt.f32.partialorder %v4950_v55, 20.0 }
 0x2fe   : > { %v4957_v39 = vmul.f32 100.0, %v4953_v41 }
 0x2ff   : > { %v1666_v14 = vmul.f32 1.442695, %v1650_v16 }
 0x300   : > { %v1651_v2 = vmin.f32 %v4957_v39, 20.0  ;;  %v1522_v24 = vpop.f32.mrf.mxu0  ;;  %vm1635_vm12 = vcmp.gt.f32.partialorder %v4957_v39, 20.0 }
 0x301   : > { %3426 = vpow2.f32 %v1666_v14  ;;  %v4963_v40 = vadd.f32 %v1522_v24, %v4960_v30 }
 0x302   : > { %v1668_v11 = vmul.f32 1.442695, %v1651_v2 }
 0x303   : > { %v1551_v13 = vpop.f32.mrf.mxu1  ;;  %v4966_v20 = vmul.f32 100.0, %v4963_v40 }
 0x304   : > { %3428 = vpow2.f32 %v1668_v11  ;;  %v4969_v52 = vadd.f32 %v1551_v13, %v4960_v30 }
 0x305   : > { %v1654_v51 = vmin.f32 %v4966_v20, 20.0  ;;  %vm1638_vm15 = vcmp.gt.f32.partialorder %v4966_v20, 20.0 }
 0x306   : > { %v4973_v44 = vmul.f32 100.0, %v4969_v52 }
 0x307   : > { %v3427_v21 = vpop.eup %3426  ;;  %v1674_v26 = vmul.f32 1.442695, %v1654_v51 }
 0x308   : > { %v1655_v42 = vmin.f32 %v4973_v44, 20.0  ;;  %v1698_v18 = vadd.f32 1.0, %v3427_v21  ;;  %v1701_v63 = vmul.f32 -0.5, %v3427_v21  ;;  %v1525_v6 = vpop.f32.mrf.mxu0  ;;  %v1704_v29 = vand.u32 2147483647, %v3427_v21 }
 0x309   : > { %3430 = vpow2.f32 %v1674_v26  ;;  %v4979_v48 = vadd.f32 %v1525_v6, %v4976_v12  ;;  %vm1639_vm0 = vcmp.gt.f32.partialorder %v4973_v44, 20.0 }
 0x30a   : > { %v3429_v46 = vpop.eup %3428  ;;  %v1676_v43 = vmul.f32 1.442695, %v1655_v42  ;;  %3432 = vlog2.f32 %v1698_v18  ;;  %v1702_v25 = vadd.f32 1.0, %v1701_v63  ;;  %vm1705_vm9 = vcmp.lt.f32.partialorder %v1704_v29, 0.0004427343 }
 0x30b   : > { %v1707_v4 = vadd.f32 1.0, %v3429_v46  ;;  %v1554_v38 = vpop.f32.mrf.mxu1  ;;  %v1710_v54 = vmul.f32 -0.5, %v3429_v46  ;;  %v4982_v62 = vmul.f32 100.0, %v4979_v48  ;;  %v1713_v8 = vand.u32 2147483647, %v3429_v46 }
 0x30c   : > { %3434 = vpow2.f32 %v1676_v43  ;;  %v4985_v10 = vadd.f32 %v1554_v38, %v4976_v12  ;;  %v1703_v60 = vmul.f32 %v3427_v21, %v1702_v25 }
 0x30d   : > { %3436 = vlog2.f32 %v1707_v4  ;;  %v1658_v3 = vmin.f32 %v4982_v62, 20.0  ;;  %v1711_v5 = vadd.f32 1.0, %v1710_v54  ;;  %vm4995_vm10 = vcmp.lt.f32.partialorder %v1713_v8, 0.0004427343 }
 0x30e   : > { %v4989_v53 = vmul.f32 100.0, %v4985_v10  ;;  %vm1642_vm2 = vcmp.gt.f32.partialorder %v4982_v62, 20.0 }
 0x30f   : > { %v3431_v56 = vpop.eup %3430  ;;  %v1682_v61 = vmul.f32 1.442695, %v1658_v3  ;;  %v1712_v31 = vmul.f32 %v3429_v46, %v1711_v5 }
 0x310   : > { %v3433_v7 = vpop.eup %3432  ;;  %v1734_v9 = vadd.f32 1.0, %v3431_v56  ;;  %v1737_v19 = vmul.f32 -0.5, %v3431_v56  ;;  %v1528_v47 = vpop.f32.mrf.mxu0  ;;  %v1659_v50 = vmin.f32 %v4989_v53, 20.0  ;;  %v1740_v37 = vand.u32 2147483647, %v3431_v56 }
 0x311   : > { %v1700_v34 = vmul.f32 0.6931472, %v3433_v7  ;;  %3438 = vpow2.f32 %v1682_v61  ;;  %v4993_v59 = vadd.f32 %v1528_v47, %v4942_v57  ;;  %vm1643_vm4 = vcmp.gt.f32.partialorder %v4989_v53, 20.0 }
 0x312   : > { %v3435_v0 = vpop.eup %3434  ;;  %3440 = vlog2.f32 %v1734_v9  ;;  %v1738_v36 = vadd.f32 1.0, %v1737_v19  ;;  %v1684_v33 = vmul.f32 1.442695, %v1659_v50  ;;  %vm1741_vm13 = vcmp.lt.f32.partialorder %v1740_v37, 0.0004427343 }
 0x313   : > { %v3437_v27 = vpop.eup %3436  ;;  %v1743_v35 = vadd.f32 1.0, %v3435_v0  ;;  %v1706_v15 = vsel %vm1705_vm9, %v1703_v60, %v1700_v34  ;;  %v1746_v17 = vmul.f32 -0.5, %v3435_v0  ;;  %v1557_v28 = vpop.f32.mrf.mxu1  ;;  %v5004_v16 = vmul.f32 100.0, %v4993_v59 }
 0x314   : > { %v1709_v1 = vmul.f32 0.6931472, %v3437_v27  ;;  %v1842_v49 = vmul.f32 %v1706_v15, %v3980_v22  ;;  %v1749_v13 = vand.u32 2147483647, %v3435_v0  ;;  %v5013_v51 = vadd.f32 %v1557_v28, %v4942_v57 }
 0x315   : > { %3442 = vlog2.f32 %v1743_v35  ;;  %v1747_v24 = vadd.f32 1.0, %v1746_v17  ;;  %v1662_v55 = vmin.f32 %v5004_v16, 20.0  ;;  %vm1646_vm7 = vcmp.gt.f32.partialorder %v5004_v16, 20.0 }
 0x316   : > { %v1715_v58 = vsel %vm4995_vm10, %v1712_v31, %v1709_v1  ;;  %v5007_v14 = vsel %vm1634_vm11, %v4947_v32, %v1842_v49  ;;  %3444 = vpow2.f32 %v1684_v33  ;;  %v1577_v21 = vpop.f32.mrf.mxu2  ;;  %v1739_v32 = vmul.f32 %v3431_v56, %v1738_v36 }
 0x317   : > { %v1843_v2 = vmul.f32 %v1715_v58, %v3980_v22  ;;  %v3439_v11 = vpop.eup %3438  ;;  %v1690_v46 = vmul.f32 1.442695, %v1662_v55  ;;  %v5019_v43 = vmul.f32 100.0, %v5013_v51  ;;  %v5022_v39 = vadd.f32 %v1577_v21, %v4944_v45 }
 0x318   : > { %v3441_v26 = vpop.eup %3440  ;;  %v1770_v18 = vadd.f32 1.0, %v3439_v11  ;;  %v1773_v63 = vmul.f32 -0.5, %v3439_v11  ;;  %v1748_v54 = vmul.f32 %v3435_v0, %v1747_v24  ;;  %vm1750_vm14 = vcmp.lt.f32.partialorder %v1749_v13, 0.0004427343 }
 0x319   : > { %v5016_v42 = vsel %vm1635_vm12, %v4953_v41, %v1843_v2  ;;  %v1736_v6 = vmul.f32 0.6931472, %v3441_v26  ;;  %v1606_v4 = vpop.f32.mrf.mxu3  ;;  %v1776_v41 = vand.u32 2147483647, %v3439_v11  ;;  %v1663_v56 = vmin.f32 %v5019_v43, 20.0 }
 0x31a   : > { %3446 = vlog2.f32 %v1770_v18  ;;  %v5027_v5 = vmul.f32 100.0, %v5022_v39  ;;  %v1774_v7 = vadd.f32 1.0, %v1773_v63  ;;  %vm1647_vm9 = vcmp.gt.f32.partialorder %v5019_v43, 20.0 }
 0x31b   : > { %v3443_v38 = vpop.eup %3442  ;;  %v1742_v25 = vsel %vm1741_vm13, %v1739_v32, %v1736_v6  ;;  %3448 = vpow2.f32 %v1690_v46  ;;  %v1692_v0 = vmul.f32 1.442695, %v1663_v56  ;;  %vm5035_vm1 = vcmp.lt.f32.partialorder %v1776_v41, 0.0004427343 }
 0x31c   : > { %v1745_v3 = vmul.f32 0.6931472, %v3443_v38  ;;  %v3445_v29 = vpop.eup %3444  ;;  %v1846_v8 = vmul.f32 %v1742_v25, %v3980_v22  ;;  %v1652_v50 = vmin.f32 %v5027_v5, 20.0  ;;  %v1775_v44 = vmul.f32 %v3439_v11, %v1774_v7 }
 0x31d   : > { %v1779_v60 = vadd.f32 1.0, %v3445_v29  ;;  %v1782_v47 = vmul.f32 -0.5, %v3445_v29  ;;  %v1785_v23 = vand.u32 2147483647, %v3445_v29  ;;  %vm1636_vm11 = vcmp.gt.f32.partialorder %v5027_v5, 20.0 }
 0x31e   : > { %v1751_v61 = vsel %vm1750_vm14, %v1748_v54, %v1745_v3  ;;  %v5031_v9 = vsel %vm1638_vm15, %v4963_v40, %v1846_v8  ;;  %v5044_v40 = vadd.f32 %v1606_v4, %v4944_v45  ;;  %v1580_v35 = vpop.f32.mrf.mxu2  ;;  %v1670_v31 = vmul.f32 1.442695, %v1652_v50 }
 0x31f   : > { %v1847_v19 = vmul.f32 %v1751_v61, %v3980_v22  ;;  %3450 = vlog2.f32 %v1779_v60  ;;  %v5047_v17 = vadd.f32 %v1580_v35, %v4960_v30  ;;  %v1783_v36 = vadd.f32 1.0, %v1782_v47 }
 0x320   : > { %v3447_v20 = vpop.eup %3446  ;;  %3452 = vpow2.f32 %v1692_v0  ;;  %vm1786_vm3 = vcmp.lt.f32.partialorder %v1785_v23, 0.0004427343 }
 0x321   : > { %v5041_v27 = vsel %vm1639_vm0, %v4969_v52, %v1847_v19  ;;  %v3449_v15 = vpop.eup %3448  ;;  %v1772_v1 = vmul.f32 0.6931472, %v3447_v20  ;;  %v1609_v49 = vpop.f32.mrf.mxu3  ;;  %v5050_v52 = vmul.f32 100.0, %v5044_v40  ;;  %3454 = vpow2.f32 %v1670_v31  ;;  %v1894_v20 = vld.sshfl [vmem:[#allocation1 + $0x8] sm:$0xff pattern:$0x75316420] }
 0x322   : > { %v1806_v33 = vadd.f32 1.0, %v3449_v15  ;;  %v1809_v28 = vmul.f32 -0.5, %v3449_v15  ;;  %v5055_v45 = vmul.f32 100.0, %v5047_v17  ;;  %v5058_v37 = vadd.f32 %v1609_v49, %v4960_v30 }
 0x323   : > { %v1778_v58 = vsel %vm5035_vm1, %v1775_v44, %v1772_v1  ;;  %v1653_v11 = vmin.f32 %v5050_v52, 20.0  ;;  %v1784_v32 = vmul.f32 %v3445_v29, %v1783_v36  ;;  %v1812_v30 = vand.u32 2147483647, %v3449_v15 }
 0x324   : > { %v1850_v2 = vmul.f32 %v1778_v58, %v3980_v22  ;;  %3456 = vlog2.f32 %v1806_v33  ;;  %v1656_v13 = vmin.f32 %v5055_v45, 20.0  ;;  %v1810_v18 = vadd.f32 1.0, %v1809_v28 }
 0x325   : > { %v3451_v24 = vpop.eup %3450  ;;  %v5068_v6 = vmul.f32 100.0, %v5058_v37  ;;  %v1672_v62 = vmul.f32 1.442695, %v1653_v11  ;;  %vm1813_vm6 = vcmp.lt.f32.partialorder %v1812_v30, 0.0004427343  ;;  %v1898_v28 = vrot.slane %v1894_v20, 3 }
 0x326   : > { %v3453_v55 = vpop.eup %3452  ;;  %v5065_v21 = vsel %vm1642_vm2, %v4979_v48, %v1850_v2  ;;  %v1781_v26 = vmul.f32 0.6931472, %v3451_v24  ;;  %v1678_v38 = vmul.f32 1.442695, %v1656_v13  ;;  %v1583_v8 = vpop.f32.mrf.mxu2  ;;  %v1811_v7 = vmul.f32 %v3449_v15, %v1810_v18 }
 0x327   : > { %v1815_v63 = vadd.f32 1.0, %v3453_v55  ;;  %v1818_v4 = vmul.f32 -0.5, %v3453_v55  ;;  %v3455_v54 = vpop.eup %3454  ;;  %v1893_v48 = vld.sshfl [vmem:[#allocation1] sm:$0xff pattern:$0x75316420]  ;;  %v1657_v19 = vmin.f32 %v5068_v6, 20.0  ;;  %v5077_v53 = vadd.f32 %v1583_v8, %v4976_v12 }
 0x328   : > { %v1787_v46 = vsel %vm1786_vm3, %v1784_v32, %v1781_v26  ;;  %v1716_v41 = vadd.f32 1.0, %v3455_v54  ;;  %v1719_v29 = vmul.f32 -0.5, %v3455_v54  ;;  %v1897_v0 = vrot.slane %v1893_v48, 3 }
 0x329   : > { %v1851_v25 = vmul.f32 %v1787_v46, %v3980_v22  ;;  %3458 = vlog2.f32 %v1815_v63  ;;  %v1819_v60 = vadd.f32 1.0, %v1818_v4  ;;  %v1821_v34 = vand.u32 2147483647, %v3453_v55  ;;  %v1612_v36 = vpop.f32.mrf.mxu3 }
 0x32a   : > { %v3457_v3 = vpop.eup %3456  ;;  %3460 = vpow2.f32 %v1672_v62  ;;  %v1720_v23 = vadd.f32 1.0, %v1719_v29  ;;  %v1722_v15 = vand.u32 2147483647, %v3455_v54  ;;  %v5083_v2 = vmul.f32 100.0, %v5077_v53 }
 0x32b   : > { %v5073_v56 = vsel %vm1643_vm4, %v4985_v10, %v1851_v25  ;;  %v1808_v61 = vmul.f32 0.6931472, %v3457_v3  ;;  %3462 = vpow2.f32 %v1678_v38  ;;  %v1680_v10 = vmul.f32 1.442695, %v1657_v19 }
 0x32c   : > { %3464 = vlog2.f32 %v1716_v41  ;;  %v1820_v49 = vmul.f32 %v3453_v55, %v1819_v60  ;;  %vm1822_vm8 = vcmp.lt.f32.partialorder %v1821_v34, 0.0004427343  ;;  %v1721_v16 = vmul.f32 %v3455_v54, %v1720_v23 }
 0x32d   : > { %v1814_v47 = vsel %vm1813_vm6, %v1811_v7, %v1808_v61  ;;  %3466 = vpow2.f32 %v1680_v10  ;;  %vm1723_vm10 = vcmp.lt.f32.partialorder %v1722_v15, 0.0004427343  ;;  %v1660_v62 = vmin.f32 %v5083_v2, 20.0 }
 0x32e   : > { %v1854_v50 = vmul.f32 %v1814_v47, %v3980_v22  ;;  %v1586_v30 = vpop.f32.mrf.mxu2  ;;  %v5091_v3 = vadd.f32 %v1612_v36, %v4976_v12  ;;  %vm1637_vm14 = vcmp.gt.f32.partialorder %v5050_v52, 20.0  ;;  %vm1640_vm15 = vcmp.gt.f32.partialorder %v5055_v45, 20.0 }
 0x32f   : > { %v3459_v35 = vpop.eup %3458  ;;  %v5094_v43 = vadd.f32 %v1586_v30, %v4942_v57  ;;  %v1686_v8 = vmul.f32 1.442695, %v1660_v62  ;;  %vm1641_vm1 = vcmp.gt.f32.partialorder %v5068_v6, 20.0  ;;  %v5154_v6 = vld [vmem:[%s5988_s1 + $0x88] sm:$0xff]  ;;  %vm1644_vm3 = vcmp.gt.f32.partialorder %v5083_v2, 20.0 }
 0x330   : > { %v3461_v1 = vpop.eup %3460  ;;  %v1870_v44 = vsel %vm1646_vm7, %v4993_v59, %v1854_v50  ;;  %v1817_v31 = vmul.f32 0.6931472, %v3459_v35  ;;  %v5101_v61 = vmul.f32 100.0, %v5091_v3 }
 0x331   : > { %v3463_v33 = vpop.eup %3462  ;;  %1886 = vst [vmem:[#allocation2 + $0x60] sm:$0xff] %v1870_v44  ;;  %v1725_v58 = vadd.f32 1.0, %v3461_v1  ;;  %v1728_v13 = vmul.f32 -0.5, %v3461_v1  ;;  %v1731_v18 = vand.u32 2147483647, %v3461_v1  ;;  %v5104_v7 = vmul.f32 100.0, %v5094_v43  ;;  %v1615_v5 = vpop.f32.mrf.mxu3 }
 0x332   : > { %v3465_v24 = vpop.eup %3464  ;;  %1905 = vst [vmem:[#allocation2 + $0x60] sm:$0xe0] %v1897_v0  ;;  %v1823_v11 = vsel %vm1822_vm8, %v1820_v49, %v1817_v31  ;;  %v1752_v26 = vadd.f32 1.0, %v3463_v33  ;;  %v1755_v55 = vmul.f32 -0.5, %v3463_v33  ;;  %v1758_v4 = vand.u32 2147483647, %v3463_v33 }
 0x333   : > { %v1855_v59 = vmul.f32 %v1823_v11, %v3980_v22  ;;  %v1718_v32 = vmul.f32 0.6931472, %v3465_v24  ;;  %3468 = vlog2.f32 %v1725_v58  ;;  %v3467_v38 = vpop.eup %3466  ;;  %v1729_v25 = vadd.f32 1.0, %v1728_v13 }
 0x334   : > { %3470 = vlog2.f32 %v1752_v26  ;;  %v1756_v48 = vadd.f32 1.0, %v1755_v55  ;;  %v1764_v41 = vmul.f32 -0.5, %v3467_v38  ;;  %vm5106_vm12 = vcmp.lt.f32.partialorder %v1731_v18, 0.0004427343 }
 0x335   : > { %v1871_v63 = vsel %vm1647_vm9, %v5013_v51, %v1855_v59  ;;  %v1724_v46 = vsel %vm1723_vm10, %v1721_v16, %v1718_v32  ;;  %v1761_v51 = vadd.f32 1.0, %v3467_v38  ;;  %v1730_v0 = vmul.f32 %v3461_v1, %v1729_v25 }
 0x336   : > { %1887 = vst [vmem:[#allocation2 + $0x70] sm:$0xff] %v1871_v63  ;;  %v1844_v54 = vmul.f32 %v1724_v46, %v3980_v22  ;;  %v1757_v50 = vmul.f32 %v3463_v33, %v1756_v48  ;;  %vm1759_vm13 = vcmp.lt.f32.partialorder %v1758_v4, 0.0004427343  ;;  %v1664_v20 = vmin.f32 %v5104_v7, 20.0 }
 0x337   : > { %1906 = vst [vmem:[#allocation2 + $0x70] sm:$0xe0] %v1898_v28  ;;  %3472 = vlog2.f32 %v1761_v51  ;;  %v1765_v35 = vadd.f32 1.0, %v1764_v41  ;;  %v5115_v44 = vadd.f32 %v1615_v5, %v4942_v57  ;;  %v1767_v49 = vand.u32 2147483647, %v3467_v38 }
 0x338   : > { %v5098_v29 = vsel %vm1636_vm11, %v5022_v39, %v1844_v54  ;;  %3474 = vpow2.f32 %v1686_v8  ;;  %v1661_v39 = vmin.f32 %v5101_v61, 20.0  ;;  %v1694_v36 = vmul.f32 1.442695, %v1664_v20 }
 0x339   : > { %v3469_v12 = vpop.eup %3468  ;;  %v1921_v23 = vld [vmem:[#allocation2 + $0x60] sm:$0xff]  ;;  %v5121_v28 = vmul.f32 100.0, %v5115_v44  ;;  %v1766_v13 = vmul.f32 %v3467_v38, %v1765_v35  ;;  %vm1768_vm0 = vcmp.lt.f32.partialorder %v1767_v49, 0.0004427343  ;;  %vm1645_vm7 = vcmp.gt.f32.partialorder %v5101_v61, 20.0 }
 0x33a   : > { %v3471_v19 = vpop.eup %3470  ;;  %v1727_v47 = vmul.f32 0.6931472, %v3469_v12  ;;  %v1688_v15 = vmul.f32 1.442695, %v1661_v39  ;;  %1979 = vmatpush.msra.mxu0 %v1921_v23  ;;  %vm1648_vm8 = vcmp.gt.f32.partialorder %v5104_v7, 20.0 }
 0x33b   : > { %v1754_v34 = vmul.f32 0.6931472, %v3471_v19  ;;  %v1665_v26 = vmin.f32 %v5121_v28, 20.0  ;;  %vm1649_vm10 = vcmp.gt.f32.partialorder %v5121_v28, 20.0 }
 0x33c   : > { %v1733_v10 = vsel %vm5106_vm12, %v1730_v0, %v1727_v47  ;;  %3476 = vpow2.f32 %v1688_v15  ;;  %1980 = vmatpush.msra.mxu0 %v5065_v21  ;;  %v5136_v21 = vld [vmem:[%s5988_s1 + $0x80] sm:$0xff]  ;;  %v1895_v0 = vld.sshfl [vmem:[#allocation1 + $0x10] sm:$0xff pattern:$0x75316420] }
 0x33d   : > { %v1845_v1 = vmul.f32 %v1733_v10, %v3980_v22  ;;  %v1760_v31 = vsel %vm1759_vm13, %v1757_v50, %v1754_v34  ;;  %v3473_v24 = vpop.eup %3472  ;;  %3478 = vpow2.f32 %v1694_v36  ;;  %v1696_v32 = vmul.f32 1.442695, %v1665_v26  ;;  %v3101_v10 = vld [vmem:[%s5988_s1 + $0x90] sm:$0xff] }
 0x33e   : > { %v1848_v33 = vmul.f32 %v1760_v31, %v3980_v22  ;;  %v1922_v58 = vld [vmem:[#allocation2 + $0x70] sm:$0xff]  ;;  %v3475_v11 = vpop.eup %3474  ;;  %v1763_v16 = vmul.f32 0.6931472, %v3473_v24  ;;  %1981 = vmatpush.msra.mxu0 %v5031_v9  ;;  %v1899_v31 = vrot.slane %v1895_v0, 3 }
 0x33f   : > { %v5125_v57 = vsel %vm1637_vm14, %v5044_v40, %v1845_v1  ;;  %2008 = vmatpush.msra.mxu1 %v1922_v58  ;;  %v1788_v40 = vadd.f32 1.0, %v3475_v11  ;;  %v1791_v59 = vmul.f32 -0.5, %v3475_v11  ;;  %v1896_v24 = vld.sshfl [vmem:[#allocation1 + $0x18] sm:$0xff pattern:$0x75316420] }
 0x340   : > { %v5129_v52 = vsel %vm1640_vm15, %v5047_v17, %v1848_v33  ;;  %v1769_v45 = vsel %vm1768_vm0, %v1766_v13, %v1763_v16  ;;  %1982 = vmatpush.msra.mxu0 %v5007_v14  ;;  %v1900_v16 = vrot.slane %v1896_v24, 3 }
 0x341   : > { %2009 = vmatpush.msra.mxu1 %v5073_v56  ;;  %v1849_v17 = vmul.f32 %v1769_v45, %v3980_v22  ;;  %3480 = vlog2.f32 %v1788_v40  ;;  %3107 = vmatmul.msk.f32.vlgmr.msra.gmra.mxu0 %vm661_vm5, %v5136_v21  ;;  %v1792_v14 = vadd.f32 1.0, %v1791_v59 }
 0x342   : > { %v3477_v9 = vpop.eup %3476  ;;  %3482 = vpow2.f32 %v1696_v32 }
 0x343   : > { %2010 = vmatpush.msra.mxu1 %v5041_v27  ;;  %v3479_v55 = vpop.eup %3478  ;;  %v5146_v56 = vsel %vm1641_vm1, %v5058_v37, %v1849_v17  ;;  %v1797_v18 = vadd.f32 1.0, %v3477_v9  ;;  %v1800_v30 = vmul.f32 -0.5, %v3477_v9  ;;  %v1794_v27 = vand.u32 2147483647, %v3475_v11  ;;  %v5215_v17 = vpop.permute.xlu0 %1942 }
 0x344   : > { %v1824_v63 = vadd.f32 1.0, %v3479_v55  ;;  %v1827_v46 = vmul.f32 -0.5, %v3479_v55  ;;  %v1793_v38 = vmul.f32 %v3475_v11, %v1792_v14  ;;  %v1803_v54 = vand.u32 2147483647, %v3477_v9 }
 0x345   : > { %2011 = vmatpush.msra.mxu1 %v5016_v42  ;;  %3484 = vlog2.f32 %v1797_v18  ;;  %v1801_v42 = vadd.f32 1.0, %v1800_v30  ;;  %vm1795_vm2 = vcmp.lt.f32.partialorder %v1794_v27, 0.0004427343  ;;  %v1830_v41 = vand.u32 2147483647, %v3479_v55  ;;  %v5224_v30 = vpop.permute.xlu2 %1947 }
 0x346   : > { %3111 = vmatmul.msk.f32.vlgmr.msra.gmra.mxu1 %vm661_vm5, %v5136_v21  ;;  %3486 = vlog2.f32 %v1824_v63  ;;  %v1828_v25 = vadd.f32 1.0, %v1827_v46  ;;  %vm1804_vm4 = vcmp.lt.f32.partialorder %v1803_v54, 0.0004427343 }
 0x347   : > { %v3481_v37 = vpop.eup %3480  ;;  %v1802_v47 = vmul.f32 %v3477_v9, %v1801_v42  ;;  %vm1831_vm6 = vcmp.lt.f32.partialorder %v1830_v41, 0.0004427343 }
 0x348   : > { %v3483_v4 = vpop.eup %3482  ;;  %v1790_v62 = vmul.f32 0.6931472, %v3481_v37  ;;  %v1829_v50 = vmul.f32 %v3479_v55, %v1828_v25 }
 0x349   : > { %v1833_v48 = vadd.f32 1.0, %v3483_v4  ;;  %3108 = vmatmul.msk.f32.gmra.mxu0 %vm661_vm5, %v5154_v6  ;;  %v1836_v8 = vmul.f32 -0.5, %v3483_v4  ;;  %v1839_v15 = vand.u32 2147483647, %v3483_v4 }
 0x34a   : > { %v1796_v51 = vsel %vm1795_vm2, %v1793_v38, %v1790_v62 }
 0x34b   : > { %v3485_v12 = vpop.eup %3484  ;;  %v1852_v60 = vmul.f32 %v1796_v51, %v3980_v22  ;;  %3488 = vlog2.f32 %v1833_v48  ;;  %v1837_v23 = vadd.f32 1.0, %v1836_v8  ;;  %vm1840_vm9 = vcmp.lt.f32.partialorder %v1839_v15, 0.0004427343 }
 0x34c   : > { %v3487_v5 = vpop.eup %3486  ;;  %v1799_v19 = vmul.f32 0.6931472, %v3485_v12 }
 0x34d   : > { %v1868_v39 = vsel %vm1644_vm3, %v5077_v53, %v1852_v60  ;;  %v1826_v34 = vmul.f32 0.6931472, %v3487_v5  ;;  %v1838_v58 = vmul.f32 %v3483_v4, %v1837_v23 }
 0x34e   : > { %3112 = vmatmul.msk.f32.gmra.mxu1 %vm661_vm5, %v5154_v6  ;;  %v1805_v20 = vsel %vm1804_vm4, %v1802_v47, %v1799_v19 }
 0x34f   : > { %v1853_v2 = vmul.f32 %v1805_v20, %v3980_v22  ;;  %v1832_v35 = vsel %vm1831_vm6, %v1829_v50, %v1826_v34 }
 0x350   : > { %v1856_v1 = vmul.f32 %v1832_v35, %v3980_v22 }
 0x351   : > { %v3489_v53 = vpop.eup %3488  ;;  %v1869_v49 = vsel %vm1645_vm7, %v5091_v3, %v1853_v2  ;;  %3109 = vmatmul.msk.f32.gmra.mxu0 %vm661_vm5, %v3101_v10  ;;  %v3102_v3 = vld [vmem:[%s5988_s1 + $0x98] sm:$0xff] }
 0x352   : > { %v1872_v36 = vsel %vm1648_vm8, %v5094_v43, %v1856_v1  ;;  %v1835_v33 = vmul.f32 0.6931472, %v3489_v53 }
 0x353   : > { %1888 = vst [vmem:[#allocation2 + $0x78] sm:$0xff] %v1872_v36 }
 0x354   : > { %1907 = vst [vmem:[#allocation2 + $0x78] sm:$0xe0] %v1899_v31  ;;  %v1841_v11 = vsel %vm1840_vm9, %v1838_v58, %v1835_v33 }
 0x355   : > { %v1857_v61 = vmul.f32 %v1841_v11, %v3980_v22 }
 0x356   : > { %3113 = vmatmul.msk.f32.gmra.mxu1 %vm661_vm5, %v3101_v10 }
 0x357   : > { %v1873_v43 = vsel %vm1649_vm10, %v5115_v44, %v1857_v61 }
 0x358   : > { %1889 = vst [vmem:[#allocation2 + $0x28] sm:$0xff] %v1873_v43 }
 0x359   : > { %1908 = vst [vmem:[#allocation2 + $0x28] sm:$0xe0] %v1900_v16  ;;  %3110 = vmatmul.msk.f32.gmra.mxu0 %vm661_vm5, %v3102_v3 }
 0x35b   : > { %v1923_v7 = vld [vmem:[#allocation2 + $0x78] sm:$0xff] }
 0x35c   : > { %2037 = vmatpush.msra.mxu2 %v1923_v7 }
 0x35e   : > { %3114 = vmatmul.msk.f32.gmra.mxu1 %vm661_vm5, %v3102_v3  ;;  %2038 = vmatpush.msra.mxu2 %v1868_v39 }
 0x360   : > { %v1924_v13 = vld [vmem:[#allocation2 + $0x28] sm:$0xff]  ;;  %2039 = vmatpush.msra.mxu2 %v5129_v52 }
 0x361   : > { %2066 = vmatpush.msra.mxu3 %v1924_v13 }
 0x362   : > { %2040 = vmatpush.msra.mxu2 %v5098_v29  ;;  %v5198_v29 = vpop.permute.xlu1 %1952 }
 0x363   : > { %2067 = vmatpush.msra.mxu3 %v1869_v49  ;;  %3115 = vmatmul.msk.f32.vlgmr.msra.gmra.mxu2 %vm661_vm5, %v5136_v21 }
 0x365   : > { %2068 = vmatpush.msra.mxu3 %v5146_v56 }
 0x367   : > { %2069 = vmatpush.msra.mxu3 %v5125_v57 }
 0x368   : > { %3119 = vmatmul.msk.f32.vlgmr.msra.gmra.mxu3 %vm661_vm5, %v5136_v21 }
 0x36a   : > { %v5200_v57 = vpop.permute.xlu1 %1937 }
 0x36b   : > { %3116 = vmatmul.msk.f32.gmra.mxu2 %vm661_vm5, %v5154_v6 }
 0x370   : > { %3120 = vmatmul.msk.f32.gmra.mxu3 %vm661_vm5, %v5154_v6 }
 0x373   : > { %3117 = vmatmul.msk.f32.gmra.mxu2 %vm661_vm5, %v3101_v10 }
 0x378   : > { %3121 = vmatmul.msk.f32.gmra.mxu3 %vm661_vm5, %v3101_v10 }
 0x37b   : > { %3118 = vmatmul.msk.f32.gmra.mxu2 %vm661_vm5, %v3102_v3 }
 0x380   : > { %3122 = vmatmul.msk.f32.gmra.mxu3 %vm661_vm5, %v3102_v3 }
 0x3be   : > { %v1984_v44 = vpop.f32.mrf.mxu0 }
 0x3bf   : > { %v5203_v52 = vadd.f32 %v1984_v44, %v5200_v57 }
 0x3c1   : > { %v5209_v40 = vmul.f32 100.0, %v5203_v52 }
 0x3c3   : > { %v2013_v28 = vpop.f32.mrf.mxu1  ;;  %v2115_v32 = vmin.f32 %v5209_v40, 20.0  ;;  %vm2099_vm9 = vcmp.gt.f32.partialorder %v5209_v40, 20.0 }
 0x3c4   : > { %v5206_v26 = vadd.f32 %v2013_v28, %v5200_v57 }
 0x3c5   : > { %v2131_v18 = vmul.f32 1.442695, %v2115_v32 }
 0x3c6   : > { %v1987_v21 = vpop.f32.mrf.mxu0  ;;  %v5212_v45 = vmul.f32 100.0, %v5206_v26 }
 0x3c7   : > { %v5219_v55 = vadd.f32 %v1987_v21, %v5215_v17  ;;  %3490 = vpow2.f32 %v2131_v18 }
 0x3c8   : > { %v2116_v9 = vmin.f32 %v5212_v45, 20.0 }
 0x3c9   : > { %v5230_v6 = vmul.f32 100.0, %v5219_v55 }
 0x3ca   : > { %v2133_v63 = vmul.f32 1.442695, %v2116_v9 }
 0x3cb   : > { %v2016_v59 = vpop.f32.mrf.mxu1  ;;  %v2119_v62 = vmin.f32 %v5230_v6, 20.0  ;;  %vm2103_vm6 = vcmp.gt.f32.partialorder %v5230_v6, 20.0 }
 0x3cc   : > { %v5222_v14 = vadd.f32 %v2016_v59, %v5215_v17  ;;  %3492 = vpow2.f32 %v2133_v63 }
 0x3cd   : > { %v3491_v48 = vpop.eup %3490  ;;  %v2139_v12 = vmul.f32 1.442695, %v2119_v62 }
 0x3ce   : > { %v1990_v56 = vpop.f32.mrf.mxu0  ;;  %v5233_v37 = vmul.f32 100.0, %v5222_v14  ;;  %v2163_v34 = vadd.f32 1.0, %v3491_v48  ;;  %v2166_v15 = vmul.f32 -0.5, %v3491_v48  ;;  %v2169_v33 = vand.u32 2147483647, %v3491_v48 }
 0x3cf   : > { %v5227_v27 = vadd.f32 %v1990_v56, %v5224_v30  ;;  %3494 = vpow2.f32 %v2139_v12 }
 0x3d0   : > { %v2120_v42 = vmin.f32 %v5233_v37, 20.0  ;;  %v2167_v36 = vadd.f32 1.0, %v2166_v15  ;;  %vm5275_vm11 = vcmp.lt.f32.partialorder %v2169_v33, 0.0004427343  ;;  %vm2104_vm10 = vcmp.gt.f32.partialorder %v5233_v37, 20.0 }
 0x3d1   : > { %v5236_v4 = vmul.f32 100.0, %v5227_v27 }
 0x3d2   : > { %v3493_v5 = vpop.eup %3492  ;;  %v2141_v19 = vmul.f32 1.442695, %v2120_v42  ;;  %v2168_v32 = vmul.f32 %v3491_v48, %v2167_v36 }
 0x3d3   : > { %v2019_v46 = vpop.f32.mrf.mxu1  ;;  %v2123_v51 = vmin.f32 %v5236_v4, 20.0  ;;  %v2172_v23 = vadd.f32 1.0, %v3493_v5  ;;  %v2175_v1 = vmul.f32 -0.5, %v3493_v5  ;;  %v2178_v61 = vand.u32 2147483647, %v3493_v5 }
 0x3d4   : > { %v5244_v25 = vadd.f32 %v2019_v46, %v5224_v30  ;;  %3496 = vpow2.f32 %v2141_v19  ;;  %vm2107_vm3 = vcmp.gt.f32.partialorder %v5236_v4, 20.0 }
 0x3d5   : > { %v2147_v50 = vmul.f32 1.442695, %v2123_v51  ;;  %3498 = vlog2.f32 %v2163_v34  ;;  %v3495_v31 = vpop.eup %3494  ;;  %v2176_v11 = vadd.f32 1.0, %v2175_v1  ;;  %vm5284_vm12 = vcmp.lt.f32.partialorder %v2178_v61, 0.0004427343 }
 0x3d6   : > { %v1993_v38 = vpop.f32.mrf.mxu0  ;;  %v5255_v0 = vmul.f32 100.0, %v5244_v25  ;;  %v2199_v43 = vadd.f32 1.0, %v3495_v31  ;;  %v2202_v7 = vmul.f32 -0.5, %v3495_v31  ;;  %v2205_v18 = vand.u32 2147483647, %v3495_v31 }
 0x3d7   : > { %v5241_v54 = vadd.f32 %v1993_v38, %v5198_v29  ;;  %3500 = vpow2.f32 %v2147_v50  ;;  %v5282_v46 = vmul.f32 %v3493_v5, %v2176_v11 }
 0x3d8   : > { %v2124_v2 = vmin.f32 %v5255_v0, 20.0  ;;  %3502 = vlog2.f32 %v2172_v23  ;;  %v2203_v48 = vadd.f32 1.0, %v2202_v7  ;;  %vm5310_vm13 = vcmp.lt.f32.partialorder %v2205_v18, 0.0004427343 }
 0x3d9   : > { %v5248_v41 = vmul.f32 100.0, %v5241_v54  ;;  %vm2108_vm8 = vcmp.gt.f32.partialorder %v5255_v0, 20.0 }
 0x3da   : > { %v2149_v53 = vmul.f32 1.442695, %v2124_v2  ;;  %v5262_v49 = vpop.eup %3496 }
 0x3db   : > { %v2022_v8 = vpop.f32.mrf.mxu1  ;;  %v2127_v47 = vmin.f32 %v5248_v41, 20.0  ;;  %v3499_v58 = vpop.eup %3498  ;;  %v2208_v44 = vadd.f32 1.0, %v5262_v49  ;;  %v2211_v63 = vmul.f32 -0.5, %v5262_v49  ;;  %v2214_v51 = vand.u32 2147483647, %v5262_v49 }
 0x3dc   : > { %v5251_v60 = vadd.f32 %v2022_v8, %v5198_v29  ;;  %v2165_v59 = vmul.f32 0.6931472, %v3499_v58  ;;  %v2204_v58 = vmul.f32 %v3495_v31, %v2203_v48  ;;  %vm2111_vm14 = vcmp.gt.f32.partialorder %v5248_v41, 20.0 }
 0x3dd   : > { %v2155_v10 = vmul.f32 1.442695, %v2127_v47  ;;  %v5264_v16 = vpop.eup %3500  ;;  %v2212_v2 = vadd.f32 1.0, %v2211_v63  ;;  %vm5330_vm15 = vcmp.lt.f32.partialorder %v2214_v51, 0.0004427343 }
 0x3de   : > { %v5258_v39 = vmul.f32 100.0, %v5251_v60  ;;  %v3503_v13 = vpop.eup %3502  ;;  %v2235_v34 = vadd.f32 1.0, %v5264_v16  ;;  %v2171_v50 = vsel %vm5275_vm11, %v2168_v32, %v2165_v59  ;;  %v2241_v31 = vand.u32 2147483647, %v5264_v16 }
 0x3df   : > { %3504 = vpow2.f32 %v2155_v10  ;;  %v5294_v19 = vmul.f32 0.6931472, %v3503_v13  ;;  %v2238_v10 = vmul.f32 -0.5, %v5264_v16  ;;  %vm2100_vm11 = vcmp.gt.f32.partialorder %v5212_v45, 20.0 }
 0x3e0   : > { %v2128_v20 = vmin.f32 %v5258_v39, 20.0  ;;  %vm2112_vm0 = vcmp.gt.f32.partialorder %v5258_v39, 20.0  ;;  %vm5357_vm4 = vcmp.lt.f32.partialorder %v2241_v31, 0.0004427343 }
 0x3e1   : > { %v2180_v7 = vsel %vm5284_vm12, %v5282_v46, %v5294_v19  ;;  %v2239_v59 = vadd.f32 1.0, %v2238_v10 }
 0x3e2   : > { %v2157_v35 = vmul.f32 1.442695, %v2128_v20  ;;  %v2308_v40 = vmul.f32 %v2180_v7, %v3980_v22 }
 0x3e4   : > { %3506 = vpow2.f32 %v2157_v35 }
 0x3e5   : > { %3508 = vpow2.f32 %v2149_v53  ;;  %v5270_v28 = vpop.eup %3504 }
 0x3e6   : > { %v2042_v24 = vpop.f32.mrf.mxu2  ;;  %3510 = vlog2.f32 %v2199_v43  ;;  %v2271_v12 = vadd.f32 1.0, %v5270_v28  ;;  %v2274_v5 = vmul.f32 -0.5, %v5270_v28  ;;  %v2277_v1 = vand.u32 2147483647, %v5270_v28 }
 0x3e7   : > { %v5267_v3 = vadd.f32 %v2042_v24, %v5200_v57  ;;  %3512 = vlog2.f32 %v2208_v44  ;;  %v5318_v24 = vmul.f32 %v2171_v50, %v3980_v22 }
 0x3e8   : > { %3514 = vlog2.f32 %v2271_v12  ;;  %v2275_v43 = vadd.f32 1.0, %v2274_v5  ;;  %vm5335_vm1 = vcmp.lt.f32.partialorder %v2277_v1, 0.0004427343 }
 0x3e9   : > { %v5273_v21 = vmul.f32 100.0, %v5267_v3 }
 0x3ea   : > { %v5279_v56 = vpop.eup %3506 }
 0x3eb   : > { %v2117_v38 = vmin.f32 %v5273_v21, 20.0  ;;  %v2071_v42 = vpop.f32.mrf.mxu3  ;;  %v2280_v47 = vadd.f32 1.0, %v5279_v56  ;;  %v5301_v20 = vpop.eup %3508  ;;  %v2286_v53 = vand.u32 2147483647, %v5279_v56 }
 0x3ec   : > { %v5291_v8 = vadd.f32 %v2071_v42, %v5200_v57  ;;  %v2283_v57 = vmul.f32 -0.5, %v5279_v56  ;;  %v3511_v11 = vpop.eup %3510  ;;  %v2244_v32 = vadd.f32 1.0, %v5301_v20  ;;  %v2213_v42 = vmul.f32 %v5262_v49, %v2212_v2 }
 0x3ed   : > { %v2135_v35 = vmul.f32 1.442695, %v2117_v38  ;;  %3516 = vlog2.f32 %v2280_v47  ;;  %v3513_v13 = vpop.eup %3512  ;;  %vm5339_vm2 = vcmp.lt.f32.partialorder %v2286_v53, 0.0004427343  ;;  %v2247_v5 = vmul.f32 -0.5, %v5301_v20 }
 0x3ee   : > { %v2045_v23 = vpop.f32.mrf.mxu2  ;;  %v5315_v33 = vmul.f32 100.0, %v5291_v8  ;;  %3518 = vlog2.f32 %v2235_v34  ;;  %v2284_v44 = vadd.f32 1.0, %v2283_v57  ;;  %v3515_v48 = vpop.eup %3514  ;;  %v2201_v47 = vmul.f32 0.6931472, %v3511_v11 }
 0x3ef   : > { %v5306_v15 = vadd.f32 %v2045_v23, %v5215_v17  ;;  %3520 = vpow2.f32 %v2135_v35  ;;  %v2273_v50 = vmul.f32 0.6931472, %v3515_v48  ;;  %v2276_v23 = vmul.f32 %v5270_v28, %v2275_v43 }
 0x3f0   : > { %v2118_v51 = vmin.f32 %v5315_v33, 20.0  ;;  %3522 = vlog2.f32 %v2244_v32  ;;  %v2285_v2 = vmul.f32 %v5279_v56, %v2284_v44  ;;  %v2210_v43 = vmul.f32 0.6931472, %v3513_v13 }
 0x3f1   : > { %v5322_v61 = vmul.f32 100.0, %v5306_v15  ;;  %v2279_v28 = vsel %vm5335_vm1, %v2276_v23, %v2273_v50  ;;  %v2248_v44 = vadd.f32 1.0, %v2247_v5  ;;  %v2250_v63 = vand.u32 2147483647, %v5301_v20 }
 0x3f2   : > { %v2319_v32 = vmul.f32 %v2279_v28, %v3980_v22  ;;  %v5417_v28 = vld [vmem:[%s5988_s1 + $0xa0] sm:$0xff]  ;;  %v2137_v6 = vmul.f32 1.442695, %v2118_v51 }
 0x3f3   : > { %v2074_v18 = vpop.f32.mrf.mxu3  ;;  %v2121_v34 = vmin.f32 %v5322_v61, 20.0  ;;  %v3517_v57 = vpop.eup %3516  ;;  %vm2251_vm7 = vcmp.lt.f32.partialorder %v2250_v63, 0.0004427343 }
 0x3f4   : > { %v5346_v12 = vadd.f32 %v2074_v18, %v5215_v17  ;;  %v2240_v17 = vmul.f32 %v5264_v16, %v2239_v59  ;;  %v3519_v1 = vpop.eup %3518  ;;  %v2282_v11 = vmul.f32 0.6931472, %v3517_v57  ;;  %v2207_v16 = vsel %vm5310_vm13, %v2204_v58, %v2201_v47 }
 0x3f5   : > { %v2237_v56 = vmul.f32 0.6931472, %v3519_v1  ;;  %v5370_v59 = vpop.eup %3520  ;;  %v2143_v31 = vmul.f32 1.442695, %v2121_v34  ;;  %v2335_v5 = vsel %vm2111_vm14, %v5241_v54, %v2319_v32  ;;  %v2311_v23 = vmul.f32 %v2207_v16, %v3980_v22 }
 0x3f6   : > { %v5353_v49 = vmul.f32 100.0, %v5346_v12  ;;  %v2048_v10 = vpop.f32.mrf.mxu2  ;;  %v2288_v48 = vsel %vm5339_vm2, %v2285_v2, %v2282_v11  ;;  %v3523_v47 = vpop.eup %3522  ;;  %2393 = vmatpush.msrb.mxu0 %v2335_v5  ;;  %v2216_v57 = vsel %vm5330_vm15, %v2213_v42, %v2210_v43  ;;  %v2249_v2 = vmul.f32 %v5301_v20, %v2248_v44 }
 0x3f7   : > { %v5363_v53 = vadd.f32 %v2048_v10, %v5224_v30  ;;  %v2320_v36 = vmul.f32 %v2288_v48, %v3980_v22  ;;  %v2243_v58 = vsel %vm5357_vm4, %v2240_v17, %v2237_v56  ;;  %v2246_v10 = vmul.f32 0.6931472, %v3523_v47 }
 0x3f8   : > { %v2122_v13 = vmin.f32 %v5353_v49, 20.0  ;;  %v2315_v38 = vmul.f32 %v2243_v58, %v3980_v22  ;;  %3524 = vpow2.f32 %v2143_v31  ;;  %v2181_v7 = vadd.f32 1.0, %v5370_v59 }
 0x3f9   : > { %v5373_v18 = vmul.f32 100.0, %v5363_v53  ;;  %v2336_v54 = vsel %vm2112_vm0, %v5251_v60, %v2320_v36  ;;  %v2252_v1 = vsel %vm2251_vm7, %v2249_v2, %v2246_v10  ;;  %v2312_v60 = vmul.f32 %v2216_v57, %v3980_v22  ;;  %v5481_v10 = vld [vmem:[%s5988_s1 + $0xb0] sm:$0xff] }
 0x3fa   : > { %2422 = vmatpush.msrb.mxu1 %v2336_v54  ;;  %v2331_v35 = vsel %vm2107_vm3, %v5227_v27, %v2315_v38  ;;  %v2145_v9 = vmul.f32 1.442695, %v2122_v13  ;;  %v2316_v20 = vmul.f32 %v2252_v1, %v3980_v22  ;;  %v2327_v27 = vsel %vm2103_vm6, %v5219_v55, %v2311_v23 }
 0x3fb   : > { %v2125_v34 = vmin.f32 %v5373_v18, 20.0  ;;  %v2077_v50 = vpop.f32.mrf.mxu3  ;;  %2394 = vmatpush.msrb.mxu0 %v2331_v35  ;;  %v2323_v55 = vsel %vm2099_vm9, %v5203_v52, %v5318_v24  ;;  %v2328_v62 = vsel %vm2104_vm10, %v5222_v14, %v2312_v60  ;;  %v2324_v24 = vsel %vm2100_vm11, %v5206_v26, %v2308_v40  ;;  %v5459_v26 = vld [vmem:[%s5988_s1 + $0xa8] sm:$0xff] }
 0x3fc   : > { %v5391_v41 = vadd.f32 %v2077_v50, %v5224_v30  ;;  %v2332_v43 = vsel %vm2108_vm8, %v5244_v25, %v2316_v20  ;;  %v2184_v31 = vmul.f32 -0.5, %v5370_v59  ;;  %v2187_v35 = vand.u32 2147483647, %v5370_v59 }
 0x3fd   : > { %v2151_v17 = vmul.f32 1.442695, %v2125_v34  ;;  %2395 = vmatpush.msrb.mxu0 %v2327_v27  ;;  %2423 = vmatpush.msrb.mxu1 %v2332_v43  ;;  %vm2109_vm3 = vcmp.gt.f32.partialorder %v5373_v18, 20.0  ;;  %vm2105_vm6 = vcmp.gt.f32.partialorder %v5322_v61, 20.0  ;;  %vm2101_vm9 = vcmp.gt.f32.partialorder %v5273_v21, 20.0 }
 0x3fe   : > { %v5401_v42 = vmul.f32 100.0, %v5391_v41  ;;  %v2051_v30 = vpop.f32.mrf.mxu2  ;;  %v5434_v32 = vpop.eup %3524  ;;  %v2185_v50 = vadd.f32 1.0, %v2184_v31  ;;  %vm5503_vm15 = vcmp.lt.f32.partialorder %v2187_v35, 0.0004427343  ;;  %vm2106_vm11 = vcmp.gt.f32.partialorder %v5353_v49, 20.0 }
 0x3ff   : > { %3526 = vpow2.f32 %v2151_v17  ;;  %v5405_v39 = vadd.f32 %v2051_v30, %v5198_v29  ;;  %2396 = vmatpush.msrb.mxu0 %v2323_v55  ;;  %2424 = vmatpush.msrb.mxu1 %v2328_v62  ;;  %v2220_v13 = vmul.f32 -0.5, %v5434_v32  ;;  %v2223_v5 = vand.u32 2147483647, %v5434_v32 }
 0x400   : > { %v2126_v4 = vmin.f32 %v5401_v42, 20.0  ;;  %3528 = vpow2.f32 %v2145_v9  ;;  %3131 = vmatmul.msk.f32.vlgmr.msrb.gmra.mxu0 %vm661_vm5, %v5417_v28  ;;  %v2186_v55 = vmul.f32 %v5370_v59, %v2185_v50  ;;  %vm2110_vm10 = vcmp.gt.f32.partialorder %v5401_v42, 20.0  ;;  %v5592_v42 = vpop.permute.xlu1 %2356 }
 0x401   : > { %v5420_v11 = vmul.f32 100.0, %v5405_v39  ;;  %2425 = vmatpush.msrb.mxu1 %v2324_v24  ;;  %v2221_v2 = vadd.f32 1.0, %v2220_v13  ;;  %vm5483_vm12 = vcmp.lt.f32.partialorder %v2223_v5, 0.0004427343 }
 0x402   : > { %v2153_v0 = vmul.f32 1.442695, %v2126_v4  ;;  %3135 = vmatmul.msk.f32.vlgmr.msrb.gmra.mxu1 %vm661_vm5, %v5417_v28 }
 0x403   : > { %v2129_v52 = vmin.f32 %v5420_v11, 20.0  ;;  %v2080_v25 = vpop.f32.mrf.mxu3  ;;  %vm2113_vm13 = vcmp.gt.f32.partialorder %v5420_v11, 20.0  ;;  %v2222_v24 = vmul.f32 %v5434_v32, %v2221_v2 }
 0x404   : > { %3530 = vpow2.f32 %v2153_v0  ;;  %v5441_v46 = vadd.f32 %v2080_v25, %v5198_v29  ;;  %v2217_v29 = vadd.f32 1.0, %v5434_v32 }
 0x405   : > { %v5444_v37 = vpop.eup %3526  ;;  %v2159_v19 = vmul.f32 1.442695, %v2129_v52  ;;  %3532 = vpow2.f32 %v2137_v6 }
 0x406   : > { %v5449_v14 = vmul.f32 100.0, %v5441_v46  ;;  %v2253_v51 = vadd.f32 1.0, %v5444_v37  ;;  %v5461_v56 = vpop.eup %3528  ;;  %v2256_v58 = vmul.f32 -0.5, %v5444_v37  ;;  %v2259_v27 = vand.u32 2147483647, %v5444_v37 }
 0x407   : > { %3534 = vpow2.f32 %v2159_v19  ;;  %v2226_v47 = vadd.f32 1.0, %v5461_v56  ;;  %v2229_v60 = vmul.f32 -0.5, %v5461_v56  ;;  %v2232_v4 = vand.u32 2147483647, %v5461_v56 }
 0x408   : > { %v2130_v45 = vmin.f32 %v5449_v14, 20.0  ;;  %3536 = vlog2.f32 %v2181_v7  ;;  %3132 = vmatmul.msk.f32.gmra.mxu0 %vm661_vm5, %v5459_v26  ;;  %v2257_v30 = vadd.f32 1.0, %v2256_v58  ;;  %vm5499_vm14 = vcmp.lt.f32.partialorder %v2259_v27, 0.0004427343 }
 0x409   : > { %3538 = vlog2.f32 %v2253_v51  ;;  %vm5539_vm4 = vcmp.lt.f32.partialorder %v2232_v4, 0.0004427343  ;;  %vm2114_vm8 = vcmp.gt.f32.partialorder %v5449_v14, 20.0 }
 0x40a   : > { %v5463_v44 = vpop.eup %3530  ;;  %v2161_v16 = vmul.f32 1.442695, %v2130_v45  ;;  %3540 = vlog2.f32 %v2217_v29  ;;  %3136 = vmatmul.msk.f32.gmra.mxu1 %vm661_vm5, %v5459_v26  ;;  %v2258_v7 = vmul.f32 %v5444_v37, %v2257_v30 }
 0x40b   : > { %v2262_v48 = vadd.f32 1.0, %v5463_v44  ;;  %v5469_v63 = vpop.eup %3532  ;;  %v2265_v1 = vmul.f32 -0.5, %v5463_v44  ;;  %v2268_v59 = vand.u32 2147483647, %v5463_v44 }
 0x40c   : > { %3542 = vpow2.f32 %v2161_v16  ;;  %v2190_v57 = vadd.f32 1.0, %v5469_v63  ;;  %v2230_v16 = vadd.f32 1.0, %v2229_v60 }
 0x40d   : > { %v3535_v36 = vpop.eup %3534  ;;  %3544 = vlog2.f32 %v2262_v48  ;;  %v2266_v51 = vadd.f32 1.0, %v2265_v1  ;;  %v2193_v48 = vmul.f32 -0.5, %v5469_v63  ;;  %vm5522_vm1 = vcmp.lt.f32.partialorder %v2268_v59, 0.0004427343 }
 0x40e   : > { %v2289_v34 = vadd.f32 1.0, %v3535_v36  ;;  %v3537_v38 = vpop.eup %3536  ;;  %v2292_v23 = vmul.f32 -0.5, %v3535_v36  ;;  %v2295_v25 = vand.u32 2147483647, %v3535_v36 }
 0x40f   : > { %v3539_v54 = vpop.eup %3538  ;;  %v2183_v43 = vmul.f32 0.6931472, %v3537_v38  ;;  %v2194_v1 = vadd.f32 1.0, %v2193_v48  ;;  %v5614_v48 = vpop.permute.xlu0 %2361 }
 0x410   : > { %3546 = vlog2.f32 %v2289_v34  ;;  %v3541_v9 = vpop.eup %3540  ;;  %3133 = vmatmul.msk.f32.gmra.mxu0 %vm661_vm5, %v5481_v10  ;;  %v2293_v40 = vadd.f32 1.0, %v2292_v23  ;;  %v2255_v0 = vmul.f32 0.6931472, %v3539_v54  ;;  %vm2296_vm0 = vcmp.lt.f32.partialorder %v2295_v25, 0.0004427343  ;;  %v5515_v34 = vld [vmem:[%s5988_s1 + $0xb8] sm:$0xff] }
 0x411   : > { %3548 = vlog2.f32 %v2226_v47  ;;  %v2219_v19 = vmul.f32 0.6931472, %v3541_v9  ;;  %v2189_v38 = vsel %vm5503_vm15, %v2186_v55, %v2183_v43  ;;  %v2267_v54 = vmul.f32 %v5463_v44, %v2266_v51 }
 0x412   : > { %v3543_v20 = vpop.eup %3542  ;;  %3550 = vlog2.f32 %v2190_v57  ;;  %3137 = vmatmul.msk.f32.gmra.mxu1 %vm661_vm5, %v5481_v10  ;;  %v2294_v37 = vmul.f32 %v3535_v36, %v2293_v40  ;;  %v2261_v5 = vsel %vm5499_vm14, %v2258_v7, %v2255_v0  ;;  %v2231_v44 = vmul.f32 %v5461_v56, %v2230_v16 }
 0x413   : > { %v2298_v6 = vadd.f32 1.0, %v3543_v20  ;;  %v3545_v52 = vpop.eup %3544  ;;  %v2301_v62 = vmul.f32 -0.5, %v3543_v20  ;;  %v2225_v50 = vsel %vm5483_vm12, %v2222_v24, %v2219_v19  ;;  %v2304_v36 = vand.u32 2147483647, %v3543_v20 }
 0x414   : > { %v2264_v58 = vmul.f32 0.6931472, %v3545_v52  ;;  %v2317_v9 = vmul.f32 %v2261_v5, %v3980_v22  ;;  %v2313_v27 = vmul.f32 %v2225_v50, %v3980_v22  ;;  %v2196_v43 = vand.u32 2147483647, %v5469_v63 }
 0x415   : > { %3552 = vlog2.f32 %v2298_v6  ;;  %v2302_v47 = vadd.f32 1.0, %v2301_v62  ;;  %vm2305_vm2 = vcmp.lt.f32.partialorder %v2304_v36, 0.0004427343  ;;  %v2309_v25 = vmul.f32 %v2189_v38, %v3980_v22 }
 0x416   : > { %v3547_v29 = vpop.eup %3546  ;;  %v2270_v60 = vsel %vm5522_vm1, %v2267_v54, %v2264_v58  ;;  %v2333_v62 = vsel %vm2109_vm3, %v5363_v53, %v2317_v9  ;;  %vm2197_vm7 = vcmp.lt.f32.partialorder %v2196_v43, 0.0004427343  ;;  %v2329_v53 = vsel %vm2105_vm6, %v5306_v15, %v2313_v27 }
 0x417   : > { %v3549_v13 = vpop.eup %3548  ;;  %v2291_v32 = vmul.f32 0.6931472, %v3547_v29  ;;  %v2303_v6 = vmul.f32 %v3543_v20, %v2302_v47  ;;  %v2318_v18 = vmul.f32 %v2270_v60, %v3980_v22  ;;  %v2325_v24 = vsel %vm2101_vm9, %v5267_v3, %v2309_v25  ;;  %v5582_v3 = vpop.permute.xlu2 %2366 }
 0x418   : > { %v3551_v23 = vpop.eup %3550  ;;  %v2228_v30 = vmul.f32 0.6931472, %v3549_v13  ;;  %3134 = vmatmul.msk.f32.gmra.mxu0 %vm661_vm5, %v5515_v34  ;;  %vm2102_vm12 = vcmp.gt.f32.partialorder %v5315_v33, 20.0 }
 0x419   : > { %v2297_v57 = vsel %vm2296_vm0, %v2294_v37, %v2291_v32  ;;  %v2192_v0 = vmul.f32 0.6931472, %v3551_v23  ;;  %v2334_v61 = vsel %vm2110_vm10, %v5391_v41, %v2318_v18 }
 0x41a   : > { %v2321_v35 = vmul.f32 %v2297_v57, %v3980_v22  ;;  %v2234_v11 = vsel %vm5539_vm4, %v2231_v44, %v2228_v30  ;;  %3138 = vmatmul.msk.f32.gmra.mxu1 %vm661_vm5, %v5515_v34 }
 0x41b   : > { %v3553_v17 = vpop.eup %3552 }
 0x41c   : > { %v2337_v55 = vsel %vm2113_vm13, %v5405_v39, %v2321_v35  ;;  %v2300_v40 = vmul.f32 0.6931472, %v3553_v17  ;;  %v2195_v39 = vmul.f32 %v5469_v63, %v2194_v1  ;;  %v2314_v63 = vmul.f32 %v2234_v11, %v3980_v22 }
 0x41d   : > { %2451 = vmatpush.msrb.mxu2 %v2337_v55 }
 0x41e   : > { %v2306_v56 = vsel %vm2305_vm2, %v2303_v6, %v2300_v40  ;;  %v2198_v4 = vsel %vm2197_vm7, %v2195_v39, %v2192_v0  ;;  %v2330_v15 = vsel %vm2106_vm11, %v5346_v12, %v2314_v63 }
 0x41f   : > { %v2322_v20 = vmul.f32 %v2306_v56, %v3980_v22  ;;  %2452 = vmatpush.msrb.mxu2 %v2333_v62  ;;  %v2310_v14 = vmul.f32 %v2198_v4, %v3980_v22  ;;  %v5584_v33 = vpop.permute.xlu2 %2351 }
 0x421   : > { %v2338_v19 = vsel %vm2114_vm8, %v5441_v46, %v2322_v20  ;;  %2453 = vmatpush.msrb.mxu2 %v2329_v53  ;;  %v2326_v21 = vsel %vm2102_vm12, %v5291_v8, %v2310_v14 }
 0x422   : > { %2480 = vmatpush.msrb.mxu3 %v2338_v19 }
 0x423   : > { %2454 = vmatpush.msrb.mxu2 %v2325_v24 }
 0x424   : > { %2481 = vmatpush.msrb.mxu3 %v2334_v61  ;;  %3139 = vmatmul.msk.f32.vlgmr.msrb.gmra.mxu2 %vm661_vm5, %v5417_v28 }
 0x426   : > { %2482 = vmatpush.msrb.mxu3 %v2330_v15 }
 0x428   : > { %2483 = vmatpush.msrb.mxu3 %v2326_v21 }
 0x429   : > { %3143 = vmatmul.msk.f32.vlgmr.msrb.gmra.mxu3 %vm661_vm5, %v5417_v28 }
 0x42c   : > { %3140 = vmatmul.msk.f32.gmra.mxu2 %vm661_vm5, %v5459_v26 }
 0x431   : > { %3144 = vmatmul.msk.f32.gmra.mxu3 %vm661_vm5, %v5459_v26 }
 0x434   : > { %3141 = vmatmul.msk.f32.gmra.mxu2 %vm661_vm5, %v5481_v10 }
 0x439   : > { %3145 = vmatmul.msk.f32.gmra.mxu3 %vm661_vm5, %v5481_v10 }
 0x43c   : > { %3142 = vmatmul.msk.f32.gmra.mxu2 %vm661_vm5, %v5515_v34 }
 0x441   : > { %3146 = vmatmul.msk.f32.gmra.mxu3 %vm661_vm5, %v5515_v34 }
 0x47d   : > { %v2398_v8 = vpop.f32.mrf.mxu0 }
 0x47e   : > { %v5587_v12 = vadd.f32 %v2398_v8, %v5584_v33 }
 0x47f   : > { %v2427_v49 = vpop.f32.mrf.mxu1 }
 0x480   : > { %v5590_v41 = vmul.f32 100.0, %v5587_v12  ;;  %v5595_v46 = vadd.f32 %v2427_v49, %v5584_v33 }
 0x482   : > { %v2529_v10 = vmin.f32 %v5590_v41, 20.0  ;;  %v5605_v59 = vmul.f32 100.0, %v5595_v46  ;;  %vm2513_vm7 = vcmp.gt.f32.partialorder %v5590_v41, 20.0 }
 0x484   : > { %v2545_v16 = vmul.f32 1.442695, %v2529_v10  ;;  %v2530_v32 = vmin.f32 %v5605_v59, 20.0 }
 0x485   : > { %v2401_v28 = vpop.f32.mrf.mxu0 }
 0x486   : > { %v5598_v26 = vadd.f32 %v2401_v28, %v5592_v42  ;;  %3554 = vpow2.f32 %v2545_v16  ;;  %v2547_v50 = vmul.f32 1.442695, %v2530_v32 }
 0x487   : > { %v2430_v51 = vpop.f32.mrf.mxu1 }
 0x488   : > { %v5602_v7 = vmul.f32 100.0, %v5598_v26  ;;  %v5608_v29 = vadd.f32 %v2430_v51, %v5592_v42 }
 0x48a   : > { %v2533_v45 = vmin.f32 %v5602_v7, 20.0  ;;  %v5612_v31 = vmul.f32 100.0, %v5608_v29  ;;  %vm2517_vm3 = vcmp.gt.f32.partialorder %v5602_v7, 20.0  ;;  %v5780_v7 = vld [vmem:[%s5988_s1 + $0xc0] sm:$0xff] }
 0x48c   : > { %v2553_v5 = vmul.f32 1.442695, %v2533_v45  ;;  %v2534_v58 = vmin.f32 %v5612_v31, 20.0  ;;  %v3555_v35 = vpop.eup %3554  ;;  %vm2518_vm12 = vcmp.gt.f32.partialorder %v5612_v31, 20.0 }
 0x48d   : > { %v2404_v13 = vpop.f32.mrf.mxu0  ;;  %v2577_v44 = vadd.f32 1.0, %v3555_v35  ;;  %v2580_v62 = vmul.f32 -0.5, %v3555_v35  ;;  %v2583_v63 = vand.u32 2147483647, %v3555_v35 }
 0x48e   : > { %v5618_v37 = vadd.f32 %v2404_v13, %v5614_v48  ;;  %3556 = vpow2.f32 %v2553_v5  ;;  %v2555_v57 = vmul.f32 1.442695, %v2534_v58 }
 0x48f   : > { %v2433_v34 = vpop.f32.mrf.mxu1  ;;  %3558 = vpow2.f32 %v2547_v50  ;;  %v2581_v61 = vadd.f32 1.0, %v2580_v62  ;;  %vm5658_vm13 = vcmp.lt.f32.partialorder %v2583_v63, 0.0004427343 }
 0x490   : > { %v5622_v47 = vmul.f32 100.0, %v5618_v37  ;;  %v5626_v23 = vadd.f32 %v2433_v34, %v5614_v48  ;;  %3560 = vpow2.f32 %v2555_v57 }
 0x491   : > { %v5664_v50 = vmul.f32 %v3555_v35, %v2581_v61 }
 0x492   : > { %v2537_v38 = vmin.f32 %v5622_v47, 20.0  ;;  %v5629_v36 = vmul.f32 100.0, %v5626_v23  ;;  %vm2521_vm0 = vcmp.gt.f32.partialorder %v5622_v47, 20.0 }
 0x494   : > { %v2561_v54 = vmul.f32 1.442695, %v2537_v38  ;;  %v2538_v9 = vmin.f32 %v5629_v36, 20.0  ;;  %v3557_v60 = vpop.eup %3556  ;;  %vm2522_vm11 = vcmp.gt.f32.partialorder %v5629_v36, 20.0 }
 0x495   : > { %v2407_v2 = vpop.f32.mrf.mxu0  ;;  %v5642_v40 = vpop.eup %3558  ;;  %v2613_v52 = vadd.f32 1.0, %v3557_v60  ;;  %v2616_v4 = vmul.f32 -0.5, %v3557_v60  ;;  %v2619_v10 = vand.u32 2147483647, %v3557_v60 }
 0x496   : > { %v5633_v30 = vadd.f32 %v2407_v2, %v5582_v3  ;;  %v2563_v1 = vmul.f32 1.442695, %v2538_v9  ;;  %3562 = vpow2.f32 %v2561_v54  ;;  %v5647_v25 = vpop.eup %3560  ;;  %v2586_v39 = vadd.f32 1.0, %v5642_v40 }
 0x497   : > { %v2436_v27 = vpop.f32.mrf.mxu1  ;;  %v2589_v53 = vmul.f32 -0.5, %v5642_v40  ;;  %v2622_v19 = vadd.f32 1.0, %v5647_v25  ;;  %v2592_v8 = vand.u32 2147483647, %v5642_v40  ;;  %v2625_v51 = vmul.f32 -0.5, %v5647_v25 }
 0x498   : > { %v5636_v17 = vmul.f32 100.0, %v5633_v30  ;;  %3564 = vpow2.f32 %v2563_v1  ;;  %v5640_v55 = vadd.f32 %v2436_v27, %v5582_v3  ;;  %v2617_v13 = vadd.f32 1.0, %v2616_v4 }
 0x499   : > { %3566 = vlog2.f32 %v2577_v44  ;;  %v2590_v45 = vadd.f32 1.0, %v2589_v53  ;;  %v2628_v54 = vand.u32 2147483647, %v5647_v25  ;;  %vm5670_vm14 = vcmp.lt.f32.partialorder %v2619_v10, 0.0004427343 }
 0x49a   : > { %v2541_v43 = vmin.f32 %v5636_v17, 20.0  ;;  %v5645_v0 = vmul.f32 100.0, %v5640_v55  ;;  %v2626_v27 = vadd.f32 1.0, %v2625_v51  ;;  %v2618_v62 = vmul.f32 %v3557_v60, %v2617_v13 }
 0x49b   : > { %v5675_v44 = vmul.f32 %v5642_v40, %v2590_v45  ;;  %vm2525_vm15 = vcmp.gt.f32.partialorder %v5636_v17, 20.0  ;;  %vm5688_vm1 = vcmp.lt.f32.partialorder %v2628_v54, 0.0004427343  ;;  %vm5711_vm4 = vcmp.lt.f32.partialorder %v2592_v8, 0.0004427343 }
 0x49c   : > { %v2569_v6 = vmul.f32 1.442695, %v2541_v43  ;;  %v2542_v56 = vmin.f32 %v5645_v0, 20.0  ;;  %v3563_v11 = vpop.eup %3562  ;;  %v2627_v10 = vmul.f32 %v5647_v25, %v2626_v27  ;;  %vm2526_vm10 = vcmp.gt.f32.partialorder %v5645_v0, 20.0 }
 0x49d   : > { %v2649_v24 = vadd.f32 1.0, %v3563_v11  ;;  %v2652_v15 = vmul.f32 -0.5, %v3563_v11  ;;  %v2655_v9 = vand.u32 2147483647, %v3563_v11 }
 0x49e   : > { %3568 = vpow2.f32 %v2569_v6  ;;  %v5651_v20 = vpop.eup %3564  ;;  %v2571_v18 = vmul.f32 1.442695, %v2542_v56 }
 0x49f   : > { %3570 = vlog2.f32 %v2613_v52  ;;  %v3567_v14 = vpop.eup %3566  ;;  %v2658_v21 = vadd.f32 1.0, %v5651_v20  ;;  %v2653_v38 = vadd.f32 1.0, %v2652_v15  ;;  %v2661_v57 = vmul.f32 -0.5, %v5651_v20 }
 0x4a0   : > { %3572 = vpow2.f32 %v2571_v18  ;;  %v5662_v34 = vmul.f32 0.6931472, %v3567_v14  ;;  %vm5692_vm2 = vcmp.lt.f32.partialorder %v2655_v9, 0.0004427343 }
 0x4a1   : > { %3574 = vlog2.f32 %v2586_v39  ;;  %v2662_v61 = vadd.f32 1.0, %v2661_v57 }
 0x4a2   : > { %3576 = vlog2.f32 %v2649_v24  ;;  %v2585_v40 = vsel %vm5658_vm13, %v5664_v50, %v5662_v34  ;;  %v2654_v24 = vmul.f32 %v3563_v11, %v2653_v38  ;;  %vm2514_vm13 = vcmp.gt.f32.partialorder %v5605_v59, 20.0  ;;  %v5810_v59 = vld [vmem:[%s5988_s1 + $0xc8] sm:$0xff] }
 0x4a3   : > { %3578 = vlog2.f32 %v2622_v19  ;;  %v2663_v54 = vmul.f32 %v5651_v20, %v2662_v61 }
 0x4a4   : > { %v3569_v49 = vpop.eup %3568  ;;  %3580 = vlog2.f32 %v2658_v21 }
 0x4a5   : > { %v2685_v16 = vadd.f32 1.0, %v3569_v49  ;;  %v3571_v5 = vpop.eup %3570  ;;  %v2688_v58 = vmul.f32 -0.5, %v3569_v49  ;;  %v2691_v53 = vand.u32 2147483647, %v3569_v49 }
 0x4a6   : > { %v5668_v2 = vpop.eup %3572  ;;  %v2615_v56 = vmul.f32 0.6931472, %v3571_v5 }
 0x4a7   : > { %v2456_v28 = vpop.f32.mrf.mxu2  ;;  %3582 = vlog2.f32 %v2685_v16  ;;  %v3575_v43 = vpop.eup %3574  ;;  %v2694_v52 = vadd.f32 1.0, %v5668_v2  ;;  %v2689_v18 = vadd.f32 1.0, %v2688_v58  ;;  %v2697_v4 = vmul.f32 -0.5, %v5668_v2 }
 0x4a8   : > { %v5678_v35 = vadd.f32 %v2456_v28, %v5584_v33  ;;  %v3577_v39 = vpop.eup %3576  ;;  %v2664_v28 = vand.u32 2147483647, %v5651_v20  ;;  %v5698_v51 = vmul.f32 0.6931472, %v3575_v43  ;;  %v2621_v32 = vsel %vm5670_vm14, %v2618_v62, %v2615_v56 }
 0x4a9   : > { %v3579_v19 = vpop.eup %3578  ;;  %3584 = vlog2.f32 %v2694_v52  ;;  %v2651_v63 = vmul.f32 0.6931472, %v3577_v39  ;;  %v2690_v58 = vmul.f32 %v3569_v49, %v2689_v18  ;;  %v2698_v34 = vadd.f32 1.0, %v2697_v4 }
 0x4aa   : > { %v3581_v14 = vpop.eup %3580  ;;  %v5701_v11 = vmul.f32 100.0, %v5678_v35  ;;  %vm2692_vm6 = vcmp.lt.f32.partialorder %v2691_v53, 0.0004427343  ;;  %v2700_v57 = vand.u32 2147483647, %v5668_v2  ;;  %v2725_v20 = vmul.f32 %v2621_v32, %v3980_v22 }
 0x4ab   : > { %v2657_v13 = vsel %vm5692_vm2, %v2654_v24, %v2651_v63  ;;  %v2660_v50 = vmul.f32 0.6931472, %v3581_v14  ;;  %v2624_v27 = vmul.f32 0.6931472, %v3579_v19  ;;  %vm5727_vm8 = vcmp.lt.f32.partialorder %v2664_v28, 0.0004427343 }
 0x4ac   : > { %v2485_v6 = vpop.f32.mrf.mxu3  ;;  %v2729_v1 = vmul.f32 %v2657_v13, %v3980_v22  ;;  %v2531_v43 = vmin.f32 %v5701_v11, 20.0  ;;  %v2699_v39 = vmul.f32 %v5668_v2, %v2698_v34  ;;  %vm2701_vm9 = vcmp.lt.f32.partialorder %v2700_v57, 0.0004427343 }
 0x4ad   : > { %v3583_v45 = vpop.eup %3582  ;;  %v5716_v38 = vadd.f32 %v2485_v6, %v5584_v33  ;;  %v2666_v18 = vsel %vm5727_vm8, %v2663_v54, %v2660_v50  ;;  %v2721_v19 = vmul.f32 %v2585_v40, %v3980_v22  ;;  %v2630_v61 = vsel %vm5688_vm1, %v2627_v10, %v2624_v27 }
 0x4ae   : > { %v2687_v25 = vmul.f32 0.6931472, %v3583_v45  ;;  %v2745_v2 = vsel %vm2521_vm0, %v5618_v37, %v2729_v1  ;;  %v2730_v40 = vmul.f32 %v2666_v18, %v3980_v22  ;;  %v2741_v37 = vsel %vm2517_vm3, %v5598_v26, %v2725_v20 }
 0x4af   : > { %v2459_v15 = vpop.f32.mrf.mxu2  ;;  %v3585_v49 = vpop.eup %3584  ;;  %v5739_v53 = vmul.f32 100.0, %v5716_v38  ;;  %v2594_v47 = vsel %vm5711_vm4, %v5675_v44, %v5698_v51  ;;  %v2726_v0 = vmul.f32 %v2630_v61, %v3980_v22  ;;  %v2737_v26 = vsel %vm2513_vm7, %v5587_v12, %v2721_v19 }
 0x4b0   : > { %v5704_v16 = vadd.f32 %v2459_v15, %v5592_v42  ;;  %v2693_v8 = vsel %vm2692_vm6, %v2690_v58, %v2687_v25  ;;  %v2696_v62 = vmul.f32 0.6931472, %v3585_v49  ;;  %v2549_v15 = vmul.f32 1.442695, %v2531_v43 }
 0x4b1   : > { %v2733_v33 = vmul.f32 %v2693_v8, %v3980_v22  ;;  %v2532_v60 = vmin.f32 %v5739_v53, 20.0  ;;  %v2746_v45 = vsel %vm2522_vm11, %v5626_v23, %v2730_v40  ;;  %v2722_v13 = vmul.f32 %v2594_v47, %v3980_v22 }
 0x4b2   : > { %v5722_v9 = vmul.f32 100.0, %v5704_v16  ;;  %v2702_v24 = vsel %vm2701_vm9, %v2699_v39, %v2696_v62  ;;  %3586 = vpow2.f32 %v2549_v15  ;;  %v2742_v32 = vsel %vm2518_vm12, %v5608_v29, %v2726_v0 }
 0x4b3   : > { %v2749_v4 = vsel %vm2525_vm15, %v5633_v30, %v2733_v33  ;;  %v2734_v17 = vmul.f32 %v2702_v24, %v3980_v22  ;;  %v2551_v12 = vmul.f32 1.442695, %v2532_v60  ;;  %v2738_v25 = vsel %vm2514_vm13, %v5595_v46, %v2722_v13 }
 0x4b4   : > { %v2488_v52 = vpop.f32.mrf.mxu3  ;;  %v2535_v63 = vmin.f32 %v5722_v9, 20.0  ;;  %2805 = vmatpush.msra.mxu0 %v2749_v4  ;;  %vm2519_vm8 = vcmp.gt.f32.partialorder %v5722_v9, 20.0  ;;  %vm2515_vm11 = vcmp.gt.f32.partialorder %v5701_v11, 20.0 }
 0x4b5   : > { %v5733_v56 = vadd.f32 %v2488_v52, %v5592_v42  ;;  %v2750_v28 = vsel %vm2526_vm10, %v5640_v55, %v2734_v17 }
 0x4b6   : > { %2806 = vmatpush.msra.mxu0 %v2745_v2  ;;  %v2557_v10 = vmul.f32 1.442695, %v2535_v63  ;;  %2832 = vmatpush.msra.mxu1 %v2750_v28 }
 0x4b7   : > { %v2462_v42 = vpop.f32.mrf.mxu2  ;;  %v5752_v14 = vmul.f32 100.0, %v5733_v56 }
 0x4b8   : > { %v5755_v30 = vadd.f32 %v2462_v42, %v5614_v48  ;;  %2807 = vmatpush.msra.mxu0 %v2741_v37  ;;  %2833 = vmatpush.msra.mxu1 %v2746_v45  ;;  %3588 = vpow2.f32 %v2557_v10  ;;  %v3587_v34 = vpop.eup %3586 }
 0x4b9   : > { %v2536_v44 = vmin.f32 %v5752_v14, 20.0  ;;  %v2595_v49 = vadd.f32 1.0, %v3587_v34  ;;  %v2598_v20 = vmul.f32 -0.5, %v3587_v34  ;;  %v2601_v42 = vand.u32 2147483647, %v3587_v34 }
 0x4ba   : > { %v5769_v21 = vmul.f32 100.0, %v5755_v30  ;;  %2808 = vmatpush.msra.mxu0 %v2737_v26  ;;  %2834 = vmatpush.msra.mxu1 %v2742_v32  ;;  %vm2520_vm13 = vcmp.gt.f32.partialorder %v5752_v14, 20.0  ;;  %v2771_v14 = vpop.permute.xlu1 %2770 }
 0x4bb   : > { %3155 = vmatmul.msk.f32.vlgmr.msra.gmra.mxu0 %vm661_vm5, %v5780_v7  ;;  %v2599_v63 = vadd.f32 1.0, %v2598_v20  ;;  %vm5843_vm14 = vcmp.lt.f32.partialorder %v2601_v42, 0.0004427343 }
 0x4bc   : > { %v2539_v55 = vmin.f32 %v5769_v21, 20.0  ;;  %v2491_v51 = vpop.f32.mrf.mxu3  ;;  %2835 = vmatpush.msra.mxu1 %v2738_v25  ;;  %vm2523_vm6 = vcmp.gt.f32.partialorder %v5769_v21, 20.0 }
 0x4bd   : > { %v5787_v36 = vadd.f32 %v2491_v51, %v5614_v48  ;;  %v2559_v48 = vmul.f32 1.442695, %v2536_v44  ;;  %3159 = vmatmul.msk.f32.vlgmr.msra.gmra.mxu1 %vm661_vm5, %v5780_v7  ;;  %v5841_v60 = vmul.f32 %v3587_v34, %v2599_v63  ;;  %v5853_v51 = vld [vmem:[%s5988_s1 + $0xd0] sm:$0xff] }
 0x4be   : > { %v2565_v41 = vmul.f32 1.442695, %v2539_v55  ;;  %v5813_v54 = vpop.eup %3588 }
 0x4bf   : > { %v5794_v23 = vmul.f32 100.0, %v5787_v36  ;;  %v2465_v5 = vpop.f32.mrf.mxu2  ;;  %v2631_v6 = vadd.f32 1.0, %v5813_v54  ;;  %v2634_v40 = vmul.f32 -0.5, %v5813_v54  ;;  %v2637_v44 = vand.u32 2147483647, %v5813_v54 }
 0x4c0   : > { %3590 = vpow2.f32 %v2565_v41  ;;  %v5798_v31 = vadd.f32 %v2465_v5, %v5582_v3 }
 0x4c1   : > { %v2540_v29 = vmin.f32 %v5794_v23, 20.0  ;;  %3592 = vpow2.f32 %v2551_v12  ;;  %v2635_v41 = vadd.f32 1.0, %v2634_v40  ;;  %vm5864_vm0 = vcmp.lt.f32.partialorder %v2637_v44, 0.0004427343 }
 0x4c2   : > { %v5803_v58 = vmul.f32 100.0, %v5798_v31  ;;  %3594 = vpow2.f32 %v2559_v48  ;;  %vm2524_vm12 = vcmp.gt.f32.partialorder %v5794_v23, 20.0 }
 0x4c3   : > { %v2567_v50 = vmul.f32 1.442695, %v2540_v29  ;;  %3156 = vmatmul.msk.f32.gmra.mxu0 %vm661_vm5, %v5810_v59 }
 0x4c4   : > { %v2543_v46 = vmin.f32 %v5803_v58, 20.0  ;;  %v2494_v57 = vpop.f32.mrf.mxu3  ;;  %vm2527_vm15 = vcmp.gt.f32.partialorder %v5803_v58, 20.0 }
 0x4c5   : > { %3596 = vpow2.f32 %v2567_v50  ;;  %v5816_v8 = vadd.f32 %v2494_v57, %v5582_v3  ;;  %3160 = vmatmul.msk.f32.gmra.mxu1 %vm661_vm5, %v5810_v59 }
 0x4c6   : > { %v5818_v1 = vpop.eup %3590  ;;  %v2573_v27 = vmul.f32 1.442695, %v2543_v46 }
 0x4c7   : > { %v5823_v43 = vmul.f32 100.0, %v5816_v8  ;;  %v2667_v52 = vadd.f32 1.0, %v5818_v1  ;;  %v5826_v33 = vpop.eup %3592  ;;  %v2670_v2 = vmul.f32 -0.5, %v5818_v1  ;;  %v2673_v13 = vand.u32 2147483647, %v5818_v1 }
 0x4c8   : > { %3598 = vpow2.f32 %v2573_v27  ;;  %v5830_v62 = vpop.eup %3594  ;;  %v2604_v4 = vadd.f32 1.0, %v5826_v33  ;;  %v2607_v0 = vmul.f32 -0.5, %v5826_v33  ;;  %v2610_v55 = vand.u32 2147483647, %v5826_v33 }
 0x4c9   : > { %v2544_v3 = vmin.f32 %v5823_v43, 20.0  ;;  %3600 = vlog2.f32 %v2595_v49  ;;  %v2640_v61 = vadd.f32 1.0, %v5830_v62  ;;  %v2671_v26 = vadd.f32 1.0, %v2670_v2 }
 0x4ca   : > { %3602 = vlog2.f32 %v2667_v52  ;;  %v2643_v32 = vmul.f32 -0.5, %v5830_v62  ;;  %v2608_v27 = vadd.f32 1.0, %v2607_v0  ;;  %vm5868_vm1 = vcmp.lt.f32.partialorder %v2673_v13, 0.0004427343 }
 0x4cb   : > { %v5834_v39 = vpop.eup %3596  ;;  %v2575_v18 = vmul.f32 1.442695, %v2544_v3  ;;  %3604 = vlog2.f32 %v2631_v6  ;;  %3157 = vmatmul.msk.f32.gmra.mxu0 %vm661_vm5, %v5853_v51  ;;  %v2672_v52 = vmul.f32 %v5818_v1, %v2671_v26  ;;  %v2646_v0 = vand.u32 2147483647, %v5830_v62 }
 0x4cc   : > { %v2676_v19 = vadd.f32 1.0, %v5834_v39  ;;  %v2679_v12 = vmul.f32 -0.5, %v5834_v39  ;;  %v2682_v1 = vand.u32 2147483647, %v5834_v39  ;;  %vm2611_vm9 = vcmp.lt.f32.partialorder %v2610_v55, 0.0004427343 }
 0x4cd   : > { %3606 = vpow2.f32 %v2575_v18  ;;  %3161 = vmatmul.msk.f32.gmra.mxu1 %vm661_vm5, %v5853_v51  ;;  %vm5902_vm7 = vcmp.lt.f32.partialorder %v2646_v0, 0.0004427343  ;;  %vm2528_vm10 = vcmp.gt.f32.partialorder %v5823_v43, 20.0 }
 0x4ce   : > { %v3599_v24 = vpop.eup %3598  ;;  %3608 = vlog2.f32 %v2604_v4  ;;  %v2680_v18 = vadd.f32 1.0, %v2679_v12  ;;  %v2636_v4 = vmul.f32 %v5813_v54, %v2635_v41  ;;  %vm5890_vm3 = vcmp.lt.f32.partialorder %v2682_v1, 0.0004427343 }
 0x4cf   : > { %v2703_v17 = vadd.f32 1.0, %v3599_v24  ;;  %v3601_v15 = vpop.eup %3600  ;;  %v2706_v37 = vmul.f32 -0.5, %v3599_v24  ;;  %3610 = vlog2.f32 %v2676_v19  ;;  %v2709_v50 = vand.u32 2147483647, %v3599_v24 }
 0x4d0   : > { %v3603_v47 = vpop.eup %3602  ;;  %v2597_v29 = vmul.f32 0.6931472, %v3601_v15  ;;  %v2644_v19 = vadd.f32 1.0, %v2643_v32  ;;  %v2681_v44 = vmul.f32 %v5834_v39, %v2680_v18 }
 0x4d1   : > { %3612 = vlog2.f32 %v2703_v17  ;;  %v3605_v10 = vpop.eup %3604  ;;  %v2707_v5 = vadd.f32 1.0, %v2706_v37  ;;  %v2669_v25 = vmul.f32 0.6931472, %v3603_v47  ;;  %vm2710_vm2 = vcmp.lt.f32.partialorder %v2709_v50, 0.0004427343 }
 0x4d2   : > { %3614 = vlog2.f32 %v2640_v61  ;;  %v2633_v57 = vmul.f32 0.6931472, %v3605_v10  ;;  %v2603_v54 = vsel %vm5843_vm14, %v5841_v60, %v2597_v29  ;;  %v2645_v28 = vmul.f32 %v5830_v62, %v2644_v19 }
 0x4d3   : > { %v3607_v45 = vpop.eup %3606  ;;  %v2708_v2 = vmul.f32 %v3599_v24, %v2707_v5  ;;  %v2675_v61 = vsel %vm5868_vm1, %v2672_v52, %v2669_v25  ;;  %v3150_v24 = vld [vmem:[%s5988_s1 + $0xd8] sm:$0xff]  ;;  %v2609_v62 = vmul.f32 %v5826_v33, %v2608_v27  ;;  %v2723_v58 = vmul.f32 %v2603_v54, %v3980_v22 }
 0x4d4   : > { %v2712_v48 = vadd.f32 1.0, %v3607_v45  ;;  %v3609_v34 = vpop.eup %3608  ;;  %v2715_v46 = vmul.f32 -0.5, %v3607_v45  ;;  %v2639_v15 = vsel %vm5864_vm0, %v2636_v4, %v2633_v57  ;;  %v2718_v47 = vand.u32 2147483647, %v3607_v45  ;;  %3158 = vmatmul.msk.f32.gmra.mxu0 %vm661_vm5, %v3150_v24 }
 0x4d5   : > { %v3611_v49 = vpop.eup %3610  ;;  %v2731_v26 = vmul.f32 %v2675_v61, %v3980_v22  ;;  %3162 = vmatmul.msk.f32.gmra.mxu1 %vm661_vm5, %v3150_v24  ;;  %v2727_v60 = vmul.f32 %v2639_v15, %v3980_v22  ;;  %v2606_v32 = vmul.f32 0.6931472, %v3609_v34  ;;  %v2739_v9 = vsel %vm2515_vm11, %v5678_v35, %v2723_v58 }
 0x4d6   : > { %3616 = vlog2.f32 %v2712_v48  ;;  %v2716_v17 = vadd.f32 1.0, %v2715_v46  ;;  %v2678_v40 = vmul.f32 0.6931472, %v3611_v49  ;;  %vm2719_vm4 = vcmp.lt.f32.partialorder %v2718_v47, 0.0004427343 }
 0x4d7   : > { %v3613_v3 = vpop.eup %3612  ;;  %v2747_v50 = vsel %vm2523_vm6, %v5755_v30, %v2731_v26  ;;  %v2743_v21 = vsel %vm2519_vm8, %v5704_v16, %v2727_v60  ;;  %v2612_v30 = vsel %vm2611_vm9, %v2609_v62, %v2606_v32  ;;  %vm2516_vm14 = vcmp.gt.f32.partialorder %v5739_v53, 20.0 }
 0x4d8   : > { %v3615_v63 = vpop.eup %3614  ;;  %v2705_v42 = vmul.f32 0.6931472, %v3613_v3  ;;  %v2717_v48 = vmul.f32 %v3607_v45, %v2716_v17  ;;  %v2684_v25 = vsel %vm5890_vm3, %v2681_v44, %v2678_v40  ;;  %v2724_v43 = vmul.f32 %v2612_v30, %v3980_v22 }
 0x4d9   : > { %v2642_v13 = vmul.f32 0.6931472, %v3615_v63  ;;  %v2732_v46 = vmul.f32 %v2684_v25, %v3980_v22 }
 0x4da   : > { %v2711_v37 = vsel %vm2710_vm2, %v2708_v2, %v2705_v42  ;;  %v2740_v11 = vsel %vm2516_vm14, %v5716_v38, %v2724_v43 }
 0x4db   : > { %v2735_v10 = vmul.f32 %v2711_v37, %v3980_v22  ;;  %v2748_v33 = vsel %vm2524_vm12, %v5787_v36, %v2732_v46 }
 0x4dc   : > { %v3617_v12 = vpop.eup %3616 }
 0x4dd   : > { %v2751_v5 = vsel %vm2527_vm15, %v5798_v31, %v2735_v10  ;;  %v2714_v39 = vmul.f32 0.6931472, %v3617_v12  ;;  %v2648_v31 = vsel %vm5902_vm7, %v2645_v28, %v2642_v13 }
 0x4de   : > { %2859 = vmatpush.msra.mxu2 %v2751_v5  ;;  %v2728_v27 = vmul.f32 %v2648_v31, %v3980_v22 }
 0x4df   : > { %v2720_v34 = vsel %vm2719_vm4, %v2717_v48, %v2714_v39 }
 0x4e0   : > { %v2736_v45 = vmul.f32 %v2720_v34, %v3980_v22  ;;  %2860 = vmatpush.msra.mxu2 %v2747_v50  ;;  %v2744_v16 = vsel %vm2520_vm13, %v5733_v56, %v2728_v27  ;;  %v2766_v22 = vpop.permute.xlu0 %2765 }
 0x4e2   : > { %v2752_v57 = vsel %vm2528_vm10, %v5816_v8, %v2736_v45  ;;  %2861 = vmatpush.msra.mxu2 %v2743_v21 }
 0x4e3   : > { %2886 = vmatpush.msra.mxu3 %v2752_v57 }
 0x4e4   : > { %2862 = vmatpush.msra.mxu2 %v2739_v9 }
 0x4e5   : > { %2887 = vmatpush.msra.mxu3 %v2748_v33  ;;  %3163 = vmatmul.msk.f32.vlgmr.msra.gmra.mxu2 %vm661_vm5, %v5780_v7 }
 0x4e7   : > { %2888 = vmatpush.msra.mxu3 %v2744_v16 }
 0x4e9   : > { %2889 = vmatpush.msra.mxu3 %v2740_v11 }
 0x4ea   : > { %3167 = vmatmul.msk.f32.vlgmr.msra.gmra.mxu3 %vm661_vm5, %v5780_v7 }
 0x4ed   : > { %3164 = vmatmul.msk.f32.gmra.mxu2 %vm661_vm5, %v5810_v59 }
 0x4f2   : > { %3168 = vmatmul.msk.f32.gmra.mxu3 %vm661_vm5, %v5810_v59 }
 0x4f5   : > { %3165 = vmatmul.msk.f32.gmra.mxu2 %vm661_vm5, %v5853_v51 }
 0x4fa   : > { %3169 = vmatmul.msk.f32.gmra.mxu3 %vm661_vm5, %v5853_v51 }
 0x4fd   : > { %3166 = vmatmul.msk.f32.gmra.mxu2 %vm661_vm5, %v3150_v24 }
 0x502   : > { %3170 = vmatmul.msk.f32.gmra.mxu3 %vm661_vm5, %v3150_v24 }
 0x538   : > { %v2810_v35 = vpop.f32.mrf.mxu0 }
 0x539   : > { %v2811_v38 = vadd.f32 %v2810_v35, %v2766_v22 }
 0x53a   : > { %v2837_v56 = vpop.f32.mrf.mxu1 }
 0x53b   : > { %2901 = vst [vmem:[%s5944_s10] sm:$0xff] %v2811_v38  ;;  %v2838_v53 = vadd.f32 %v2837_v56, %v2766_v22 }
 0x53d   : > { %2902 = vst [vmem:[%s5944_s10 + $0x8] sm:$0xff] %v2838_v53 }
 0x540   : > { %v2813_v7 = vpop.f32.mrf.mxu0 }
 0x541   : > { %v2814_v36 = vadd.f32 %v2813_v7, %v2771_v14 }
 0x542   : > { %v2840_v23 = vpop.f32.mrf.mxu1 }
 0x543   : > { %2905 = vst [vmem:[%s5944_s10 + $0x20] sm:$0x3] %v2814_v36  ;;  %v2841_v59 = vadd.f32 %v2840_v23, %v2771_v14 }
 0x545   : > { %2906 = vst [vmem:[%s5944_s10 + $0x28] sm:$0x3] %v2841_v59 }
 0x548   : > { %v2816_v8 = vpop.f32.mrf.mxu0 }
 0x54a   : > { %v2843_v55 = vpop.f32.mrf.mxu1 }
 0x551   : > { %v2818_v51 = vpop.f32.mrf.mxu0 }
 0x552   : > { %v2845_v49 = vpop.f32.mrf.mxu1 }
 0x568   : > { %v2864_v52 = vpop.f32.mrf.mxu2 }
 0x569   : > { %v2865_v6 = vadd.f32 %v2864_v52, %v2766_v22 }
 0x56b   : > { %2903 = vst [vmem:[%s5944_s10 + $0x10] sm:$0xff] %v2865_v6 }
 0x56d   : > { %v2891_v3 = vpop.f32.mrf.mxu3 }
 0x56e   : > { %v2892_v20 = vadd.f32 %v2891_v3, %v2766_v22 }
 0x570   : > { %2904 = vst [vmem:[%s5944_s10 + $0x18] sm:$0xff] %v2892_v20  ;;  %v2867_v18 = vpop.f32.mrf.mxu2 }
 0x571   : > { %v2868_v4 = vadd.f32 %v2867_v18, %v2771_v14 }
 0x573   : > { %2907 = vst [vmem:[%s5944_s10 + $0x30] sm:$0x3] %v2868_v4 }
 0x575   : > { %v2894_v19 = vpop.f32.mrf.mxu3 }
 0x576   : > { %v2895_v63 = vadd.f32 %v2894_v19, %v2771_v14 }
 0x578   : > { %2908 = vst [vmem:[%s5944_s10 + $0x38] sm:$0x3] %v2895_v63  ;;  %v2870_v42 = vpop.f32.mrf.mxu2 }
 0x579   : > { %3675 = shalt.err (!%p3672_p4)
}
 0x57a   : > { %s3718_s26 = smov 512   ;;  %s3719_s23 = smov 2048  }
 0x57b   : > { %s3720_s8 = smov 32  }
 0x57c   : > { %3180 = dma.vmem_to_hbm [thread:$0]  (%p3790_p10), %s2923_s22, 1024, %s2925_s27, %s2910_s28, %s3718_s26, %s3719_s23, %s3720_s8  }
 0x57d   : > { %v2897_v2 = vpop.f32.mrf.mxu3 }
 0x580   : > { %v2872_v61 = vpop.f32.mrf.mxu2 }
 0x585   : > { %v2899_v1 = vpop.f32.mrf.mxu3 }
 0x586 PF: > { %p3191_p5 = scmp.ge.s32.totalorder %s3714_s15, 2  ;;  %s2939_s9 = sand.u32 1, %s3702_s12  }
 0x587   : > { %s2940_s10 = scalar_lea.sflag [#allocation5], %s2939_s9 }
 0x588   : > { %p3187_p7 = pnand %p3191_p5, %p3794_p11 }
 0x58a   : > { %p3188_p8 = pneg %p3187_p7 }
 0x58c   : > { %3697 = dma.done.wait (%p3188_p8), %s2940_s10, 1024  }
 0x58d   : > { %3699 = vsyncadd (%p3188_p8), %s2940_s10, 4294966272  ;;  %p16_p10 = scmp.ge.s32.totalorder %s3766_s18, 6   ;;  %s6124_s12 = smov %s3706_s13 }
 0x58e   : > { %s6125_s13 = smov %s3710_s14  ;;  %s6126_s14 = smov %s3778_s21 }
 0x58f   : > { %s6127_s15 = smov %s3766_s18  ;;  %18 = sbr.rel (!%p16_p10) target bundleno = 5 (0x5), region = 91 }
 0x594   :  { %2946 = vsyncpa [#allocation4], 1 }
 0x595   :  { %2948 = vsyncpa [#allocation4 + $0x1], 1 }
 0x596   :  { %2949 = vsyncpa [#allocation5], 1 }
 0x597   :  { %2951 = vsyncpa [#allocation5 + $0x1], 1 }

</bundles_post_ra>
